<compile_context>
chip_gen: v6e
topology: v6e:2x2x1
jax: 0.10.0
libtpu: 0.0.40
codegen_flags: <defaults>
</compile_context>

<pallas_src>
import functools

import jax
import jax.numpy as jnp
from jax.experimental import pallas as pl
from jax.experimental.pallas import tpu as pltpu


def _embed(features, weights, act):
    """internal_forward (Attentive per-feature scaling stack) + F.normalize(dim=1, p=2)."""
    h = features.astype(jnp.float32)
    L = weights.shape[0]
    for l in range(L):
        h = h * weights[l][None, :]
        if l != L - 1:
            if act == 'relu':
                h = jnp.maximum(h, 0.0)
            elif act == 'tanh':
                h = jnp.tanh(h)
    # Exact F.normalize semantics: eps (1e-12) applied to the norm.
    norm = jnp.sqrt(jnp.sum(h * h, axis=1, keepdims=True))
    return h / jnp.maximum(norm, 1e-12)


def att_learner_kernel(hn_ref, out_ref, *, k, block_rows):
    """One grid step: rows [i*TM, (i+1)*TM) of the processed similarity matrix.

    hn_ref : (N, Dp) bf16 resident normalized embeddings (single-buffered).
    out_ref: (TM, N) f32 output block.
    """
    i = pl.program_id(0)
    start = pl.multiple_of(i * block_rows, block_rows)
    q = hn_ref[pl.ds(start, block_rows), :]                    # (TM, Dp) bf16

    # Similarities: q @ hn^T via dot_general contracting on dim 1 (MXU consumes
    # the A.B^T form directly), bf16 operands, f32 accumulation.
    s = jax.lax.dot_general(q, hn_ref[...], (((1,), (1,)), ((), ())),
                            preferred_element_type=jnp.float32)  # (TM, N) f32

    # top_k(s, k+1): peel the per-row max (k+1) times, working directly off `s`
    # (no rewritten work buffer -> no extra full-tile stores). The last peeled
    # value is the per-row (k+1)-th largest and acts as the keep-threshold.
    # TODO(synk): torch.topk keeps exactly k+1 entries with index tie-break;
    #             this threshold scheme keeps every entry tied at the threshold.
    thresh = jnp.max(s, axis=-1, keepdims=True)                # round 0
    for _ in range(k):
        thresh = jnp.max(jnp.where(s < thresh, s, -jnp.inf),
                         axis=-1, keepdims=True)

    # Fused top-k select + apply_non_linearity('relu'): single lane-dense write.
    out_ref[...] = jnp.where(jnp.logical_and(s >= thresh, s > 0.0), s, 0.0)


def _run_pallas(hn, *, N, Dp, tm, k, vmem_limit, flops, bytes_accessed,
                single_buffer_resident):
    kernel = functools.partial(att_learner_kernel, k=k, block_rows=tm)

    if single_buffer_resident:
        in_spec = pl.BlockSpec((N, Dp), lambda i: (0, 0),
                               pipeline_mode=pl.Buffered(buffer_count=1))
    else:
        in_spec = pl.BlockSpec((N, Dp), lambda i: (0, 0))

    return pl.pallas_call(
        kernel,
        out_shape=jax.ShapeDtypeStruct((N, N), jnp.float32),
        grid=(N // tm,),
        in_specs=[in_spec],                                   # resident embeddings
        out_specs=pl.BlockSpec((tm, N), lambda i: (i, 0)),    # lane-dense row tile
        compiler_params=pltpu.CompilerParams(
            dimension_semantics=("parallel",),                # megacore split on v7x
            vmem_limit_bytes=vmem_limit),
        cost_estimate=pl.CostEstimate(flops=int(flops), transcendentals=0,
                                      bytes_accessed=int(bytes_accessed)),
    )(hn)


def att_learner_forward(features, weights, *, k, act='relu', block_rows=256):
    """Dense-mode ATT_learner forward.

    features: (N, D) float32
    weights:  (L, D) float32  (per-layer Attentive scaling vectors)
    returns:  (N, N) float32  processed similarity matrix
    """
    N, D = features.shape
    assert k + 1 <= N, "top_k needs k + 1 <= num_nodes"
    assert N % 8 == 0, "demo wrapper requires sublane-aligned N"

    # Hoisted embedding: Attentive stack + L2 normalize computed ONCE (plain XLA),
    # then cast to bf16 so the resident in-VMEM copy is half-size and the kernel
    # body does no per-grid-step elementwise / cast work.
    hn = _embed(features, weights, act)

    # Pad the feature dim to a multiple of 128 (lane / MXU contraction width).
    # Zero-padded columns contribute nothing to the dot products.
    Dp = max(128, ((D + 127) // 128) * 128)
    if Dp != D:
        hn = jnp.pad(hn, ((0, 0), (0, Dp - D)))
    hn = hn.astype(jnp.bfloat16)

    # Row tile: large tiles amortize per-step overhead and fill the 256-wide MXU
    # (v6e/v7x), but keep >= 2 grid steps so the 'parallel' axis can split across
    # v7x's two TensorCores.
    tm = min(block_rows, N)
    if N // tm < 2 and N >= 16 and (N // 2) % 8 == 0:
        tm = N // 2
    # TODO(synk): general N (not a multiple of the row tile) needs row padding
    #             plus masking of padded rows out of the top-k threshold.
    assert N % tm == 0, "demo wrapper requires N % row_tile == 0"

    # VMEM budget: resident bf16 hn (single-buffered) + double-buffered f32 output
    # block + in-kernel (TM, N) f32 temporaries (s, compare/select).
    needed = N * Dp * 2 + 2 * tm * N * 4 + 3 * tm * N * 4
    vmem_limit = int(min(max(2 * needed, 32 * 1024 * 1024), 56 * 1024 * 1024))

    flops = 2 * N * N * Dp
    bytes_accessed = N * Dp * 2 + N * N * 4

    try:
        return _run_pallas(hn, N=N, Dp=Dp, tm=tm, k=k, vmem_limit=vmem_limit,
                           flops=flops, bytes_accessed=bytes_accessed,
                           single_buffer_resident=True)
    except Exception:
        # TODO(synk): fallback for jax versions without BlockSpec pipeline_mode
        #             support — identical semantics, resident block double-buffered.
        return _run_pallas(hn, N=N, Dp=Dp, tm=tm, k=k, vmem_limit=vmem_limit,
                           flops=flops, bytes_accessed=bytes_accessed,
                           single_buffer_resident=False)


def reference_forward(features, weights, *, k, act='relu'):
    """Pure-JAX reference with the same hoisted embedding, bf16 MXU path and
    threshold-based top-k."""
    hn = _embed(features, weights, act)
    hn_b = hn.astype(jnp.bfloat16)
    s = jax.lax.dot_general(hn_b, hn_b, (((1,), (1,)), ((), ())),
                            preferred_element_type=jnp.float32)
    thresh = jnp.max(s, axis=-1, keepdims=True)
    for _ in range(k):
        thresh = jnp.max(jnp.where(s < thresh, s, -jnp.inf), axis=-1, keepdims=True)
    out = jnp.where((s >= thresh) & (s > 0.0), s, 0.0)
    return out, s, thresh


if __name__ == "__main__":
    # Module hyperparameters (small, consistent with ATT_learner signature).
    nlayers = 2        # -> 2 Attentive(isize) layers
    isize = 64         # feature dim of every layer
    k = 5              # top_k uses k + 1 = 6 per row
    mlp_act = 'relu'
    N = 256            # number of nodes

    key = jax.random.PRNGKey(0)
    kf, kw = jax.random.split(key)
    features = jax.random.normal(kf, (N, isize), dtype=jnp.float32)
    # Attentive init is torch.ones(isize); perturb around 1.0 so the per-feature
    # scaling is non-trivial in the test.
    weights = 1.0 + 0.1 * jax.random.normal(kw, (nlayers, isize), dtype=jnp.float32)

    out = att_learner_forward(features, weights, k=k, act=mlp_act)
    out = jax.block_until_ready(out)

    ref, s_ref, thresh_ref = reference_forward(features, weights, k=k, act=mlp_act)
    assert out.shape == (N, N)

    # The top-k select is discontinuous: entries whose similarity sits within a
    # tiny band of the per-row threshold may legitimately flip under fp-rounding
    # differences between the Pallas and XLA lowerings, so they are excluded.
    stable = jnp.abs(s_ref - thresh_ref) > 1e-3
    diff = jnp.abs(out - ref)
    tol = 1e-4 + 1e-4 * jnp.abs(ref)
    assert not bool(jnp.any((diff > tol) & stable)), "kernel/reference mismatch"

    print("KERNEL_OK")
</pallas_src>

<mosaic_0001>
module attributes {stable_mosaic.version = 11 : i64} {
  func.func @att_learner_kernel(%arg0: i32, %arg1: memref<256x128xbf16, #tpu.memory_space<vmem>>, %arg2: memref<128x256xf32, #tpu.memory_space<vmem>>) attributes {dimension_semantics = [#tpu.dimension_semantics<parallel>], iteration_bounds = array<i64: 2>, scalar_prefetch = 0 : i64, scratch_operands = 0 : i64, tpu.core_type = #tpu.core_type<tc>, window_params = [{pipeline_mode = #tpu.pipeline_mode<synchronous>, transform_indices = @transform_0, window_bounds = array<i64: 256, 128>}, {transform_indices = @transform_1, window_bounds = array<i64: 128, 256>}]} {
    %c128_i32 = arith.constant 128 : i32
    %0 = arith.muli %arg0, %c128_i32 : i32
    %1 = tpu.assume_multiple %0, 128 : i32
    %2 = arith.index_cast %1 : i32 to index
    %c0 = arith.constant 0 : index
    %3 = vector.load %arg1[%2, %c0] : memref<256x128xbf16, #tpu.memory_space<vmem>>, vector<128x128xbf16>
    %c0_0 = arith.constant 0 : index
    %c0_1 = arith.constant 0 : index
    %4 = vector.load %arg1[%c0_0, %c0_1] : memref<256x128xbf16, #tpu.memory_space<vmem>>, vector<256x128xbf16>
    %cst = arith.constant dense<0.000000e+00> : vector<128x256xf32>
    %5 = tpu.matmul %3, %4, %cst {dimension_numbers = #tpu.dot_dimension_numbers<[1], [1], [0], [0], [0, 0, 1, 0], [], []>} : vector<128x128xbf16>, vector<256x128xbf16>, vector<128x256xf32> -> vector<128x256xf32>
    %cst_2 = arith.constant dense<0xFF800000> : vector<128xf32>
    %6 = vector.multi_reduction <maximumf>, %5, %cst_2 [1] : vector<128x256xf32> to vector<128xf32>
    %7 = vector.shape_cast %6 : vector<128xf32> to vector<128x1xf32>
    %8 = vector.broadcast %7 : vector<128x1xf32> to vector<128x256xf32>
    %9 = arith.cmpf olt, %5, %8 : vector<128x256xf32>
    %cst_3 = arith.constant 0xFF800000 : f32
    %10 = vector.broadcast %cst_3 : f32 to vector<128x256xf32>
    %11 = arith.select %9, %5, %10 : vector<128x256xi1>, vector<128x256xf32>
    %cst_4 = arith.constant dense<0xFF800000> : vector<128xf32>
    %12 = vector.multi_reduction <maximumf>, %11, %cst_4 [1] : vector<128x256xf32> to vector<128xf32>
    %13 = vector.shape_cast %12 : vector<128xf32> to vector<128x1xf32>
    %14 = vector.broadcast %13 : vector<128x1xf32> to vector<128x256xf32>
    %15 = arith.cmpf olt, %5, %14 : vector<128x256xf32>
    %cst_5 = arith.constant 0xFF800000 : f32
    %16 = vector.broadcast %cst_5 : f32 to vector<128x256xf32>
    %17 = arith.select %15, %5, %16 : vector<128x256xi1>, vector<128x256xf32>
    %cst_6 = arith.constant dense<0xFF800000> : vector<128xf32>
    %18 = vector.multi_reduction <maximumf>, %17, %cst_6 [1] : vector<128x256xf32> to vector<128xf32>
    %19 = vector.shape_cast %18 : vector<128xf32> to vector<128x1xf32>
    %20 = vector.broadcast %19 : vector<128x1xf32> to vector<128x256xf32>
    %21 = arith.cmpf olt, %5, %20 : vector<128x256xf32>
    %cst_7 = arith.constant 0xFF800000 : f32
    %22 = vector.broadcast %cst_7 : f32 to vector<128x256xf32>
    %23 = arith.select %21, %5, %22 : vector<128x256xi1>, vector<128x256xf32>
    %cst_8 = arith.constant dense<0xFF800000> : vector<128xf32>
    %24 = vector.multi_reduction <maximumf>, %23, %cst_8 [1] : vector<128x256xf32> to vector<128xf32>
    %25 = vector.shape_cast %24 : vector<128xf32> to vector<128x1xf32>
    %26 = vector.broadcast %25 : vector<128x1xf32> to vector<128x256xf32>
    %27 = arith.cmpf olt, %5, %26 : vector<128x256xf32>
    %cst_9 = arith.constant 0xFF800000 : f32
    %28 = vector.broadcast %cst_9 : f32 to vector<128x256xf32>
    %29 = arith.select %27, %5, %28 : vector<128x256xi1>, vector<128x256xf32>
    %cst_10 = arith.constant dense<0xFF800000> : vector<128xf32>
    %30 = vector.multi_reduction <maximumf>, %29, %cst_10 [1] : vector<128x256xf32> to vector<128xf32>
    %31 = vector.shape_cast %30 : vector<128xf32> to vector<128x1xf32>
    %32 = vector.broadcast %31 : vector<128x1xf32> to vector<128x256xf32>
    %33 = arith.cmpf olt, %5, %32 : vector<128x256xf32>
    %cst_11 = arith.constant 0xFF800000 : f32
    %34 = vector.broadcast %cst_11 : f32 to vector<128x256xf32>
    %35 = arith.select %33, %5, %34 : vector<128x256xi1>, vector<128x256xf32>
    %cst_12 = arith.constant dense<0xFF800000> : vector<128xf32>
    %36 = vector.multi_reduction <maximumf>, %35, %cst_12 [1] : vector<128x256xf32> to vector<128xf32>
    %37 = vector.shape_cast %36 : vector<128xf32> to vector<128x1xf32>
    %38 = vector.broadcast %37 : vector<128x1xf32> to vector<128x256xf32>
    %39 = arith.cmpf oge, %5, %38 : vector<128x256xf32>
    %cst_13 = arith.constant 0.000000e+00 : f32
    %40 = vector.broadcast %cst_13 : f32 to vector<128x256xf32>
    %41 = arith.cmpf ogt, %5, %40 : vector<128x256xf32>
    %42 = arith.andi %39, %41 : vector<128x256xi1>
    %cst_14 = arith.constant 0.000000e+00 : f32
    %43 = vector.broadcast %cst_14 : f32 to vector<128x256xf32>
    %44 = arith.select %42, %5, %43 : vector<128x256xi1>, vector<128x256xf32>
    %c0_15 = arith.constant 0 : index
    %c0_16 = arith.constant 0 : index
    %45 = vector.load %arg2[%c0_15, %c0_16] : memref<128x256xf32, #tpu.memory_space<vmem>>, vector<128x256xf32>
    tpu.vector_store %arg2[%c0_15, %c0_16], %44 {strides = array<i32>} : memref<128x256xf32, #tpu.memory_space<vmem>>, vector<128x256xf32>,
    return
  }
  func.func @transform_0(%arg0: i32) -> (i32, i32) {
    %c0_i32 = arith.constant 0 : i32
    %c0_i32_0 = arith.constant 0 : i32
    %c0_i32_1 = arith.constant 0 : i32
    return %c0_i32, %c0_i32_0 : i32, i32
  }
  func.func @transform_1(%arg0: i32) -> (i32, i32) {
    %c0_i32 = arith.constant 0 : i32
    %c0_i32_0 = arith.constant 0 : i32
    return %arg0, %c0_i32 : i32, i32
  }
}

module attributes {stable_mosaic.version = 11 : i64} {
  func.func @att_learner_kernel(%arg0: i32, %arg1: memref<256x128xbf16, #tpu.memory_space<vmem>>, %arg2: memref<128x256xf32, #tpu.memory_space<vmem>>) attributes {dimension_semantics = [#tpu.dimension_semantics<parallel>], iteration_bounds = array<i64: 2>, scalar_prefetch = 0 : i64, scratch_operands = 0 : i64, tpu.core_type = #tpu.core_type<tc>, window_params = [{pipeline_mode = #tpu.pipeline_mode<synchronous>, transform_indices = @transform_0, window_bounds = array<i64: 256, 128>}, {transform_indices = @transform_1, window_bounds = array<i64: 128, 256>}]} {
    %c128_i32 = arith.constant 128 : i32
    %0 = arith.muli %arg0, %c128_i32 : i32
    %1 = tpu.assume_multiple %0, 128 : i32
    %2 = arith.index_cast %1 : i32 to index
    %c0 = arith.constant 0 : index
    %3 = vector.load %arg1[%2, %c0] : memref<256x128xbf16, #tpu.memory_space<vmem>>, vector<128x128xbf16>
    %c0_0 = arith.constant 0 : index
    %c0_1 = arith.constant 0 : index
    %4 = vector.load %arg1[%c0_0, %c0_1] : memref<256x128xbf16, #tpu.memory_space<vmem>>, vector<256x128xbf16>
    %cst = arith.constant dense<0.000000e+00> : vector<128x256xf32>
    %5 = tpu.matmul %3, %4, %cst {dimension_numbers = #tpu.dot_dimension_numbers<[1], [1], [0], [0], [0, 0, 1, 0], [], []>} : vector<128x128xbf16>, vector<256x128xbf16>, vector<128x256xf32> -> vector<128x256xf32>
    %cst_2 = arith.constant dense<0xFF800000> : vector<128xf32>
    %6 = vector.multi_reduction <maximumf>, %5, %cst_2 [1] : vector<128x256xf32> to vector<128xf32>
    %7 = vector.shape_cast %6 : vector<128xf32> to vector<128x1xf32>
    %8 = vector.broadcast %7 : vector<128x1xf32> to vector<128x256xf32>
    %9 = arith.cmpf olt, %5, %8 : vector<128x256xf32>
    %cst_3 = arith.constant 0xFF800000 : f32
    %10 = vector.broadcast %cst_3 : f32 to vector<128x256xf32>
    %11 = arith.select %9, %5, %10 : vector<128x256xi1>, vector<128x256xf32>
    %cst_4 = arith.constant dense<0xFF800000> : vector<128xf32>
    %12 = vector.multi_reduction <maximumf>, %11, %cst_4 [1] : vector<128x256xf32> to vector<128xf32>
    %13 = vector.shape_cast %12 : vector<128xf32> to vector<128x1xf32>
    %14 = vector.broadcast %13 : vector<128x1xf32> to vector<128x256xf32>
    %15 = arith.cmpf olt, %5, %14 : vector<128x256xf32>
    %cst_5 = arith.constant 0xFF800000 : f32
    %16 = vector.broadcast %cst_5 : f32 to vector<128x256xf32>
    %17 = arith.select %15, %5, %16 : vector<128x256xi1>, vector<128x256xf32>
    %cst_6 = arith.constant dense<0xFF800000> : vector<128xf32>
    %18 = vector.multi_reduction <maximumf>, %17, %cst_6 [1] : vector<128x256xf32> to vector<128xf32>
    %19 = vector.shape_cast %18 : vector<128xf32> to vector<128x1xf32>
    %20 = vector.broadcast %19 : vector<128x1xf32> to vector<128x256xf32>
    %21 = arith.cmpf olt, %5, %20 : vector<128x256xf32>
    %cst_7 = arith.constant 0xFF800000 : f32
    %22 = vector.broadcast %cst_7 : f32 to vector<128x256xf32>
    %23 = arith.select %21, %5, %22 : vector<128x256xi1>, vector<128x256xf32>
    %cst_8 = arith.constant dense<0xFF800000> : vector<128xf32>
    %24 = vector.multi_reduction <maximumf>, %23, %cst_8 [1] : vector<128x256xf32> to vector<128xf32>
    %25 = vector.shape_cast %24 : vector<128xf32> to vector<128x1xf32>
    %26 = vector.broadcast %25 : vector<128x1xf32> to vector<128x256xf32>
    %27 = arith.cmpf olt, %5, %26 : vector<128x256xf32>
    %cst_9 = arith.constant 0xFF800000 : f32
    %28 = vector.broadcast %cst_9 : f32 to vector<128x256xf32>
    %29 = arith.select %27, %5, %28 : vector<128x256xi1>, vector<128x256xf32>
    %cst_10 = arith.constant dense<0xFF800000> : vector<128xf32>
    %30 = vector.multi_reduction <maximumf>, %29, %cst_10 [1] : vector<128x256xf32> to vector<128xf32>
    %31 = vector.shape_cast %30 : vector<128xf32> to vector<128x1xf32>
    %32 = vector.broadcast %31 : vector<128x1xf32> to vector<128x256xf32>
    %33 = arith.cmpf olt, %5, %32 : vector<128x256xf32>
    %cst_11 = arith.constant 0xFF800000 : f32
    %34 = vector.broadcast %cst_11 : f32 to vector<128x256xf32>
    %35 = arith.select %33, %5, %34 : vector<128x256xi1>, vector<128x256xf32>
    %cst_12 = arith.constant dense<0xFF800000> : vector<128xf32>
    %36 = vector.multi_reduction <maximumf>, %35, %cst_12 [1] : vector<128x256xf32> to vector<128xf32>
    %37 = vector.shape_cast %36 : vector<128xf32> to vector<128x1xf32>
    %38 = vector.broadcast %37 : vector<128x1xf32> to vector<128x256xf32>
    %39 = arith.cmpf oge, %5, %38 : vector<128x256xf32>
    %cst_13 = arith.constant 0.000000e+00 : f32
    %40 = vector.broadcast %cst_13 : f32 to vector<128x256xf32>
    %41 = arith.cmpf ogt, %5, %40 : vector<128x256xf32>
    %42 = arith.andi %39, %41 : vector<128x256xi1>
    %cst_14 = arith.constant 0.000000e+00 : f32
    %43 = vector.broadcast %cst_14 : f32 to vector<128x256xf32>
    %44 = arith.select %42, %5, %43 : vector<128x256xi1>, vector<128x256xf32>
    %c0_15 = arith.constant 0 : index
    %c0_16 = arith.constant 0 : index
    %45 = vector.load %arg2[%c0_15, %c0_16] : memref<128x256xf32, #tpu.memory_space<vmem>>, vector<128x256xf32>
    tpu.vector_store %arg2[%c0_15, %c0_16], %44 {strides = array<i32>} : memref<128x256xf32, #tpu.memory_space<vmem>>, vector<128x256xf32>,
    return
  }
  func.func @transform_0(%arg0: i32) -> (i32, i32) {
    %c0_i32 = arith.constant 0 : i32
    %c0_i32_0 = arith.constant 0 : i32
    %c0_i32_1 = arith.constant 0 : i32
    return %c0_i32, %c0_i32_0 : i32, i32
  }
  func.func @transform_1(%arg0: i32) -> (i32, i32) {
    %c0_i32 = arith.constant 0 : i32
    %c0_i32_0 = arith.constant 0 : i32
    return %arg0, %c0_i32 : i32, i32
  }
}

</mosaic_0001>

<bundles_post_ra>
// kernel: tpu_custom_call.1
= control target key start
LH: loop header
LB: loop body
LE: loop exit
PB: predicated region body
PF: predicated region fallthrough
CT: control target
= control target key end

     0   :  { %6 = vsyncpa [#allocation3], 0  ;;  %s2224_s0 = inlined_call_operand.hbm [shape: bf16[256,128], index: 0, kind: input, shape index: {}]   ;;  %s2225_s1 = inlined_call_operand.hbm [shape: f32[256,256], index: 1, kind: output, shape index: {}]  }
   0x1   :  { %7 = vsyncpa [#allocation4], 0 }
   0x2   :  { %9 = vsyncpa [#allocation4 + $0x1], 0  ;;  %s1543_s6 = smov 0   ;;  %s1545_s7 = smov 0  }
   0x3   :  { %s1547_s8 = smov 0   ;;  %s1549_s9 = smov 0  }
   0x4 LB: > { %s1564_s10 = sadd.s32 4294967295, %s1525_s9   ;;  %s1269_s11 = sadd.s32 4294967294, %s1525_s9   ;;  %s1525_s9 = sphi %s1549_s9, %s2233_s9   ;;  %s1521_s8 = sphi %s1547_s8, %s2232_s8   ;;  %s1517_s7 = sphi %s1545_s7, %s2231_s7   ;;  %s1513_s6 = sphi %s1543_s6, %s2230_s6  }
   0x5   : > { %s1568_s12 = sadd.s32 1, %s1525_s9   ;;  %s43_s13 = sadd.s32 1, %s1521_s8 }
   0x6   : > { %s40_s14 = ssub.s32 %s1525_s9, %s1568_s12  ;;  %p53_p0 = scmp.ne.s32.totalorder %s1521_s8, %s1517_s7 }
   0x7   : > { %p41_p1 = scmp.eq.s32.totalorder %s40_s14, 0  ;;  %p54_p2 = scmp.eq.s32.totalorder %s1564_s10, 1 }
   0x8   : > { %p59_p3 = scmp.ne.s32.totalorder %s1517_s7, %s1513_s6  ;;  %p60_p4 = scmp.eq.s32.totalorder %s1269_s11, 1 }
   0x9   : > { %s1579_s15 = scalar_select %p41_p1, %s1521_s8, %s43_s13  }
   0xa   : > { %p1581_p5 = por %p54_p2, %p53_p0  ;;  %p1585_p6 = por %p60_p4, %p59_p3 }
   0xb   : > { %p1270_p7 = scmp.ge.s32.totalorder %s1525_s9, 1  ;;  %p67_p8 = scmp.lt.s32.totalorder %s1525_s9, 3 }
   0xc   : > { %s2227_s17 = scalar_select %p1585_p6, 1, 0 }
   0xd   : > { %p1371_p9 = scmp.eq.s32.totalorder %s1564_s10, 0  ;;  %p1592_p10 = pnand %p1270_p7, %p67_p8 }
   0xe   : > { %s1527_s19 = smov [#allocation2]  }
   0xf   : > { %s79_s20 = sshll.u32 %s1527_s19, 4  ;;  %p1363_p11 = pneg %p1592_p10  ;;  %s80_s20 = int_to_ptr.vmem [resolvable:$true] %s79_s20 }
  0x10   : > { %s1446_s21 = scalar_lea.vmem %s80_s20, 2048  ;;  %p1454_p3 = scmp.lt.s32.totalorder %s80_s20, %s80_s20 }
  0x11   : > { %p1364_p12 = pnand %p1371_p9, %p1363_p11  ;;  %p1447_p0 = scmp.ne.s32.totalorder %s80_s20, %s1446_s21 }
  0x12   : > { %p1455_p4 = scmp.lt.s32.totalorder %s1446_s21, %s1446_s21 }
  0x13   : > { %p1437_p13 = pneg %p1364_p12 }
  0x14   : > { %p1456_p6 = por %p1455_p4, %p1454_p3 }
  0x15   : > { %p1449_p1 = pnand %p1447_p0, %p1437_p13 }
  0x17   : > { %p1450_p2 = pneg %p1449_p1 }
  0x19   : > { %p1457_p7 = pnand %p1456_p6, %p1450_p2 }
  0x1b   : > { %1460 = shalt.err (!%p1457_p7)
}
  0x1c   : > { %s1528_s22 = smov 64   ;;  %s1529_s23 = smov 4  }
  0x1d   : > { %1366 = dma.hbm_to_vmem [thread:$0]  (!%p1364_p12), %s2224_s0, 2048, %s80_s20, [#allocation3], %s1528_s22, %s1528_s22, %s1529_s23  }
  0x1e   : > { %95 = sbr.rel (%p1592_p10) target bundleno = 1201 (0x4b1), region = 24 }
  0x23   : > { %1504 = dma.done.wait (%p1371_p9), [#allocation3], 2048  }
  0x24   : > { %1506 = vsyncadd (%p1371_p9), [#allocation3], 4294965248  ;;  %v1411_v0 = vld [vmem:[#allocation2 + $0x78] sm:$0xff]   ;;  %v1413_v2 = vld [vmem:[#allocation2 + $0x70] sm:$0xff]   ;;  %s1275_s26 = sshll.u32 %s1564_s10, 7  ;;  %s107_s30 = sand.u32 1, %s1517_s7  }
  0x25   : > { %v1412_v1 = vld [vmem:[#allocation2 + $0x38] sm:$0xff]   ;;  %1309 = vmatprep.subr.bf16.mxu0 %v1411_v0  ;;  %1341 = vmatprep.subr.bf16.mxu1 %v1411_v0  ;;  %v1414_v3 = vld [vmem:[#allocation2 + $0x30] sm:$0xff]   ;;  %s113_s27 = sshra.s32 %s1275_s26, 3  ;;  %v1415_v4 = vld [vmem:[#allocation2 + $0x68] sm:$0xff]   ;;  %s1274_s2 = sshll.u32 %s107_s30, 8 }
  0x26   : > { %1310 = vmatpush3.bf16.xpose.msra.mxu0 %v1412_v1  ;;  %1349 = vmatpush3.bf16.xpose.msra.mxu1 %v1412_v1  ;;  %s1276_s28 = sshll.u32 %s113_s27, 2  ;;  %v1416_v5 = vld [vmem:[#allocation2 + $0x28] sm:$0xff]   ;;  %v1417_v6 = vld [vmem:[#allocation2 + $0x60] sm:$0xff]   ;;  %v1419_v10 = vld [vmem:[#allocation2 + $0x58] sm:$0xff]   ;;  %s2049_s3 = scalar_lea.vmem [#allocation5], %s1274_s2 }
  0x27   : > { %1311 = vmatprep.subr.bf16.mxu0 %v1413_v2  ;;  %1342 = vmatprep.subr.bf16.mxu1 %v1413_v2  ;;  %s1610_s29 = scalar_lea.vmem [#allocation2], %s1276_s28  ;;  %v1418_v9 = vld [vmem:[#allocation2 + $0x20] sm:$0xff]   ;;  %v1420_v11 = vld [vmem:[#allocation2 + $0x18] sm:$0xff]   ;;  %v1421_v12 = vld [vmem:[#allocation2 + $0x50] sm:$0xff]   ;;  %s1308_s4 = sshll.u32 %s1564_s10, 12 }
  0x28   : > { %v1427_v7 = vld [vmem:[%s1610_s29] sm:$0xff]   ;;  %v1422_v13 = vld [vmem:[#allocation2 + $0x10] sm:$0xff]   ;;  %v1423_v14 = vld [vmem:[#allocation2 + $0x48] sm:$0xff]   ;;  %s1205_s5 = sshll.u32 %s2049_s3, 4  ;;  %s2174_s13 = scalar_lea.hbm %s2225_s1, %s1308_s4  ;;  %s2176_s5 = int_to_ptr.vmem [resolvable:$true] %s1205_s5 }
  0x29   : > { %v1428_v8 = vld [vmem:[%s1610_s29 + $0x20] sm:$0xff]   ;;  %1325 = vmatprep.mubr.bf16.mxu0 %v1427_v7  ;;  %v1424_v15 = vld [vmem:[#allocation2 + $0x8] sm:$0xff]   ;;  %v1431_v20 = vld [vmem:[%s1610_s29 + $0x10] sm:$0xff]   ;;  %s2184_s14 = scalar_lea.sflag [#allocation4], %s107_s30  ;;  %s1461_s18 = scalar_lea.vmem %s2176_s5, 4096 }
  0x2a   : > { %1333 = vmatprep.mubr.bf16.mxu1 %v1428_v8  ;;  %v1425_v16 = vld [vmem:[#allocation2 + $0x40] sm:$0xff]   ;;  %v1429_v18 = vld [vmem:[%s1610_s29 + $0x8] sm:$0xff]   ;;  %v1432_v21 = vld [vmem:[%s1610_s29 + $0x30] sm:$0xff]   ;;  %p1462_p6 = scmp.ne.s32.totalorder %s2176_s5, %s1461_s18  ;;  %s1530_s19 = smov [#allocation5]  }
  0x2b   : > { %v1426_v17 = vld [vmem:[#allocation2] sm:$0xff]   ;;  %v1430_v19 = vld [vmem:[%s1610_s29 + $0x28] sm:$0xff]   ;;  %v1433_v22 = vld [vmem:[%s1610_s29 + $0x18] sm:$0xff]   ;;  %s1465_s20 = sshll.u32 %s1530_s19, 4  ;;  %s1466_s20 = int_to_ptr.vmem [resolvable:$false] %s1465_s20 }
  0x2c   : > { %v1434_v23 = vld [vmem:[%s1610_s29 + $0x38] sm:$0xff]   ;;  %p1463_p8 = pnand %p1462_p6, %p1581_p5  ;;  %s1467_s21 = scalar_lea.vmem %s1466_s20, 8192 }
  0x2d   : > { %p1468_p10 = scmp.lt.s32.totalorder %s2176_s5, %s1466_s20  ;;  %p1469_p11 = scmp.lt.s32.totalorder %s1467_s21, %s1461_s18 }
  0x2e   : > { %1312 = vmatpush3.bf16.xpose.msra.mxu0 %v1414_v3  ;;  %1350 = vmatpush3.bf16.xpose.msra.mxu1 %v1414_v3  ;;  %p1464_p9 = pneg %p1463_p8 }
  0x2f   : > { %1313 = vmatprep.subr.bf16.mxu0 %v1415_v4  ;;  %1343 = vmatprep.subr.bf16.mxu1 %v1415_v4  ;;  %p1470_p12 = por %p1469_p11, %p1468_p10 }
  0x31   : > { %p1471_p13 = pnand %p1470_p12, %p1464_p9 }
  0x36   : > { %1314 = vmatpush3.bf16.xpose.msra.mxu0 %v1416_v5  ;;  %1351 = vmatpush3.bf16.xpose.msra.mxu1 %v1416_v5 }
  0x37   : > { %1315 = vmatprep.subr.bf16.mxu0 %v1417_v6  ;;  %1344 = vmatprep.subr.bf16.mxu1 %v1417_v6 }
  0x3e   : > { %1316 = vmatpush3.bf16.xpose.msra.mxu0 %v1418_v9  ;;  %1352 = vmatpush3.bf16.xpose.msra.mxu1 %v1418_v9 }
  0x3f   : > { %1317 = vmatprep.subr.bf16.mxu0 %v1419_v10  ;;  %1345 = vmatprep.subr.bf16.mxu1 %v1419_v10 }
  0x46   : > { %1318 = vmatpush3.bf16.xpose.msra.mxu0 %v1420_v11  ;;  %1353 = vmatpush3.bf16.xpose.msra.mxu1 %v1420_v11 }
  0x47   : > { %1319 = vmatprep.subr.bf16.mxu0 %v1421_v12  ;;  %1346 = vmatprep.subr.bf16.mxu1 %v1421_v12 }
  0x4e   : > { %1320 = vmatpush3.bf16.xpose.msra.mxu0 %v1422_v13  ;;  %1354 = vmatpush3.bf16.xpose.msra.mxu1 %v1422_v13 }
  0x4f   : > { %1321 = vmatprep.subr.bf16.mxu0 %v1423_v14  ;;  %1347 = vmatprep.subr.bf16.mxu1 %v1423_v14 }
  0x56   : > { %1322 = vmatpush3.bf16.xpose.msra.mxu0 %v1424_v15  ;;  %1355 = vmatpush3.bf16.xpose.msra.mxu1 %v1424_v15 }
  0x57   : > { %1323 = vmatprep.subr.bf16.mxu0 %v1425_v16  ;;  %1348 = vmatprep.subr.bf16.mxu1 %v1425_v16 }
  0x5e   : > { %1324 = vmatpush3.bf16.xpose.msra.mxu0 %v1426_v17  ;;  %1356 = vmatpush3.bf16.xpose.msra.mxu1 %v1426_v17 }
  0x65   : > { %1326 = vmatmul.mubr.bf16.vlgmr.msra.gmra.mxu0 %v1427_v7  ;;  %1334 = vmatmul.mubr.bf16.vlgmr.msra.gmra.mxu1 %v1428_v8 }
  0x66   : > { %1327 = vmatprep.mubr.bf16.mxu0 %v1429_v18  ;;  %1335 = vmatprep.mubr.bf16.mxu1 %v1430_v19 }
  0x6d   : > { %1328 = vmatmul.mubr.bf16.gmra.mxu0 %v1429_v18  ;;  %1336 = vmatmul.mubr.bf16.gmra.mxu1 %v1430_v19 }
  0x6e   : > { %1329 = vmatprep.mubr.bf16.mxu0 %v1431_v20  ;;  %1337 = vmatprep.mubr.bf16.mxu1 %v1432_v21 }
  0x75   : > { %1330 = vmatmul.mubr.bf16.gmra.mxu0 %v1431_v20  ;;  %1338 = vmatmul.mubr.bf16.gmra.mxu1 %v1432_v21 }
  0x76   : > { %1331 = vmatprep.mubr.bf16.mxu0 %v1433_v22  ;;  %1339 = vmatprep.mubr.bf16.mxu1 %v1434_v23 }
  0x7d   : > { %1332 = vmatmul.mubr.bf16.gmra.mxu0 %v1433_v22  ;;  %1340 = vmatmul.mubr.bf16.gmra.mxu1 %v1434_v23 }
 0x125   : > { %v1620_v24 = vpop.f32.mrf.mxu0  ;;  %v1622_v25 = vpop.f32.mrf.mxu1 }
 0x127   : > { %v1624_v26 = vpop.f32.mrf.mxu0  ;;  %v1626_v27 = vpop.f32.mrf.mxu1 }
 0x128   : > { %v422_v28 = vmax.f32 %v1620_v24, %v1624_v26  ;;  %v446_v34 = vmax.f32 %v1622_v25, %v1626_v27 }
 0x129   : > { %v1630_v29 = vpop.f32.mrf.mxu0  ;;  %v1632_v30 = vpop.f32.mrf.mxu1 }
 0x12a   : > { %423 = vmax.xlane.f32.xlu0 %v422_v28 }
 0x12b   : > { %v1634_v31 = vpop.f32.mrf.mxu0  ;;  %v1636_v32 = vpop.f32.mrf.mxu1 }
 0x12c   : > { %v449_v33 = vmax.f32 %v1632_v30, %v1636_v32  ;;  %v425_v39 = vmax.f32 %v1630_v29, %v1634_v31 }
 0x12d   : > { %v1642_v35 = vpop.f32.mrf.mxu0  ;;  %v1644_v36 = vpop.f32.mrf.mxu1 }
 0x12e   : > { %450 = vmax.xlane.f32.xlu1 %v449_v33  ;;  %447 = vmax.xlane.f32.xlu0 %v446_v34 }
 0x12f   : > { %v1646_v37 = vpop.f32.mrf.mxu0  ;;  %v1648_v38 = vpop.f32.mrf.mxu1 }
 0x130   : > { %v428_v40 = vmax.f32 %v1642_v35, %v1646_v37  ;;  %v452_v43 = vmax.f32 %v1644_v36, %v1648_v38 }
 0x131   : > { %v1654_v41 = vpop.f32.mrf.mxu0  ;;  %v1656_v42 = vpop.f32.mrf.mxu1 }
 0x132   : > { %426 = vmax.xlane.f32.xlu0 %v425_v39  ;;  %429 = vmax.xlane.f32.xlu1 %v428_v40 }
 0x133   : > { %v1660_v44 = vpop.f32.mrf.mxu0  ;;  %v1662_v45 = vpop.f32.mrf.mxu1 }
 0x134   : > { %v431_v46 = vmax.f32 %v1654_v41, %v1660_v44  ;;  %v455_v51 = vmax.f32 %v1656_v42, %v1662_v45 }
 0x135   : > { %v1666_v47 = vpop.f32.mrf.mxu0  ;;  %v1668_v48 = vpop.f32.mrf.mxu1 }
 0x136   : > { %453 = vmax.xlane.f32.xlu0 %v452_v43  ;;  %432 = vmax.xlane.f32.xlu1 %v431_v46 }
 0x137   : > { %v1670_v49 = vpop.f32.mrf.mxu0  ;;  %v1672_v50 = vpop.f32.mrf.mxu1 }
 0x138   : > { %v434_v52 = vmax.f32 %v1666_v47, %v1670_v49  ;;  %v458_v55 = vmax.f32 %v1668_v48, %v1672_v50 }
 0x139   : > { %v1678_v53 = vpop.f32.mrf.mxu0  ;;  %v1680_v54 = vpop.f32.mrf.mxu1 }
 0x13a   : > { %456 = vmax.xlane.f32.xlu1 %v455_v51  ;;  %435 = vmax.xlane.f32.xlu0 %v434_v52 }
 0x13b   : > { %v1684_v56 = vpop.f32.mrf.mxu0  ;;  %v1686_v57 = vpop.f32.mrf.mxu1 }
 0x13c   : > { %v437_v58 = vmax.f32 %v1678_v53, %v1684_v56  ;;  %v461_v63 = vmax.f32 %v1680_v54, %v1686_v57 }
 0x13d   : > { %v1690_v59 = vpop.f32.mrf.mxu0  ;;  %v1692_v60 = vpop.f32.mrf.mxu1 }
 0x13e   : > { %459 = vmax.xlane.f32.xlu0 %v458_v55  ;;  %438 = vmax.xlane.f32.xlu1 %v437_v58 }
 0x13f   : > { %v1694_v61 = vpop.f32.mrf.mxu0  ;;  %v1696_v62 = vpop.f32.mrf.mxu1 }
 0x140   : > { %v440_v0 = vmax.f32 %v1690_v59, %v1694_v61  ;;  %v464_v3 = vmax.f32 %v1692_v60, %v1696_v62 }
 0x141   : > { %v1702_v1 = vpop.f32.mrf.mxu0  ;;  %v1704_v2 = vpop.f32.mrf.mxu1 }
 0x142   : > { %462 = vmax.xlane.f32.xlu1 %v461_v63  ;;  %441 = vmax.xlane.f32.xlu0 %v440_v0 }
 0x143   : > { %v1708_v4 = vpop.f32.mrf.mxu0  ;;  %v1712_v6 = vpop.f32.mrf.mxu1 }
 0x144   : > { %v443_v5 = vmax.f32 %v1702_v1, %v1708_v4  ;;  %v467_v7 = vmax.f32 %v1704_v2, %v1712_v6 }
 0x146   : > { %465 = vmax.xlane.f32.xlu0 %v464_v3  ;;  %444 = vmax.xlane.f32.xlu1 %v443_v5 }
 0x14a   : > { %468 = vmax.xlane.f32.xlu1 %v467_v7 }
 0x1b3   : > { %v424_v8 = vpop.xlane.xlu0 %423 }
 0x1b4   : > { %vm470_vm0 = vcmp.lt.f32.partialorder %v1620_v24, %v424_v8  ;;  %vm471_vm1 = vcmp.lt.f32.partialorder %v1624_v26, %v424_v8 }
 0x1b5   : > { %v502_v9 = vsel %vm470_vm0, %v1620_v24, -inf  ;;  %v503_v10 = vsel %vm471_vm1, %v1624_v26, -inf }
 0x1b6   : > { %v534_v11 = vmax.f32 %v502_v9, %v503_v10 }
 0x1b7   : > { %v451_v12 = vpop.xlane.xlu1 %450  ;;  %v448_v13 = vpop.xlane.xlu0 %447 }
 0x1b8   : > { %vm486_vm2 = vcmp.lt.f32.partialorder %v1622_v25, %v448_v13  ;;  %vm487_vm3 = vcmp.lt.f32.partialorder %v1626_v27, %v448_v13  ;;  %535 = vmax.xlane.f32.xlu0 %v534_v11  ;;  %vm488_vm4 = vcmp.lt.f32.partialorder %v1632_v30, %v451_v12  ;;  %vm489_vm5 = vcmp.lt.f32.partialorder %v1636_v32, %v451_v12 }
 0x1b9   : > { %v518_v14 = vsel %vm486_vm2, %v1622_v25, -inf  ;;  %v519_v15 = vsel %vm487_vm3, %v1626_v27, -inf  ;;  %v520_v39 = vsel %vm488_vm4, %v1632_v30, -inf  ;;  %v521_v40 = vsel %vm489_vm5, %v1636_v32, -inf }
 0x1ba   : > { %v558_v16 = vmax.f32 %v518_v14, %v519_v15  ;;  %v561_v58 = vmax.f32 %v520_v39, %v521_v40 }
 0x1bb   : > { %v427_v17 = vpop.xlane.xlu0 %426  ;;  %v430_v18 = vpop.xlane.xlu1 %429 }
 0x1bc   : > { %vm472_vm6 = vcmp.lt.f32.partialorder %v1630_v29, %v427_v17  ;;  %vm473_vm7 = vcmp.lt.f32.partialorder %v1634_v31, %v427_v17  ;;  %vm474_vm8 = vcmp.lt.f32.partialorder %v1642_v35, %v430_v18  ;;  %vm475_vm9 = vcmp.lt.f32.partialorder %v1646_v37, %v430_v18  ;;  %559 = vmax.xlane.f32.xlu0 %v558_v16 }
 0x1bd   : > { %v506_v19 = vsel %vm474_vm8, %v1642_v35, -inf  ;;  %v507_v20 = vsel %vm475_vm9, %v1646_v37, -inf  ;;  %v504_v21 = vsel %vm472_vm6, %v1630_v29, -inf  ;;  %v505_v22 = vsel %vm473_vm7, %v1634_v31, -inf }
 0x1be   : > { %v540_v23 = vmax.f32 %v506_v19, %v507_v20  ;;  %v537_v28 = vmax.f32 %v504_v21, %v505_v22 }
 0x1bf   : > { %v454_v33 = vpop.xlane.xlu0 %453  ;;  %v433_v34 = vpop.xlane.xlu1 %432 }
 0x1c0   : > { %vm490_vm10 = vcmp.lt.f32.partialorder %v1644_v36, %v454_v33  ;;  %vm491_vm11 = vcmp.lt.f32.partialorder %v1648_v38, %v454_v33  ;;  %541 = vmax.xlane.f32.xlu0 %v540_v23  ;;  %vm476_vm12 = vcmp.lt.f32.partialorder %v1654_v41, %v433_v34  ;;  %vm477_vm13 = vcmp.lt.f32.partialorder %v1660_v44, %v433_v34 }
 0x1c1   : > { %538 = vmax.xlane.f32.xlu1 %v537_v28  ;;  %v522_v43 = vsel %vm490_vm10, %v1644_v36, -inf  ;;  %v523_v46 = vsel %vm491_vm11, %v1648_v38, -inf  ;;  %v508_v63 = vsel %vm476_vm12, %v1654_v41, -inf  ;;  %v509_v0 = vsel %vm477_vm13, %v1660_v44, -inf }
 0x1c2   : > { %v564_v51 = vmax.f32 %v522_v43, %v523_v46  ;;  %v543_v10 = vmax.f32 %v508_v63, %v509_v0 }
 0x1c3   : > { %v457_v52 = vpop.xlane.xlu1 %456  ;;  %v436_v55 = vpop.xlane.xlu0 %435 }
 0x1c4   : > { %vm478_vm14 = vcmp.lt.f32.partialorder %v1666_v47, %v436_v55  ;;  %vm479_vm15 = vcmp.lt.f32.partialorder %v1670_v49, %v436_v55  ;;  %565 = vmax.xlane.f32.xlu0 %v564_v51  ;;  %vm492_vm0 = vcmp.lt.f32.partialorder %v1656_v42, %v457_v52  ;;  %vm493_vm1 = vcmp.lt.f32.partialorder %v1662_v45, %v457_v52 }
 0x1c5   : > { %562 = vmax.xlane.f32.xlu1 %v561_v58  ;;  %v510_v3 = vsel %vm478_vm14, %v1666_v47, -inf  ;;  %v511_v5 = vsel %vm479_vm15, %v1670_v49, -inf  ;;  %v524_v11 = vsel %vm492_vm0, %v1656_v42, -inf  ;;  %v525_v12 = vsel %vm493_vm1, %v1662_v45, -inf }
 0x1c6   : > { %v546_v7 = vmax.f32 %v510_v3, %v511_v5  ;;  %v567_v18 = vmax.f32 %v524_v11, %v525_v12 }
 0x1c7   : > { %v460_v8 = vpop.xlane.xlu0 %459  ;;  %v439_v9 = vpop.xlane.xlu1 %438 }
 0x1c8   : > { %vm494_vm2 = vcmp.lt.f32.partialorder %v1668_v48, %v460_v8  ;;  %vm495_vm3 = vcmp.lt.f32.partialorder %v1672_v50, %v460_v8  ;;  %547 = vmax.xlane.f32.xlu0 %v546_v7  ;;  %vm480_vm4 = vcmp.lt.f32.partialorder %v1678_v53, %v439_v9  ;;  %vm481_vm5 = vcmp.lt.f32.partialorder %v1684_v56, %v439_v9 }
 0x1c9   : > { %544 = vmax.xlane.f32.xlu1 %v543_v10  ;;  %v526_v13 = vsel %vm494_vm2, %v1668_v48, -inf  ;;  %v527_v14 = vsel %vm495_vm3, %v1672_v50, -inf  ;;  %v512_v19 = vsel %vm480_vm4, %v1678_v53, -inf  ;;  %v513_v20 = vsel %vm481_vm5, %v1684_v56, -inf }
 0x1ca   : > { %v570_v15 = vmax.f32 %v526_v13, %v527_v14  ;;  %v549_v34 = vmax.f32 %v512_v19, %v513_v20 }
 0x1cb   : > { %v463_v16 = vpop.xlane.xlu1 %462  ;;  %v442_v17 = vpop.xlane.xlu0 %441 }
 0x1cc   : > { %vm482_vm6 = vcmp.lt.f32.partialorder %v1690_v59, %v442_v17  ;;  %vm483_vm7 = vcmp.lt.f32.partialorder %v1694_v61, %v442_v17  ;;  %571 = vmax.xlane.f32.xlu0 %v570_v15  ;;  %vm496_vm8 = vcmp.lt.f32.partialorder %v1680_v54, %v463_v16  ;;  %vm497_vm9 = vcmp.lt.f32.partialorder %v1686_v57, %v463_v16 }
 0x1cd   : > { %568 = vmax.xlane.f32.xlu1 %v567_v18  ;;  %v514_v21 = vsel %vm482_vm6, %v1690_v59, -inf  ;;  %v515_v22 = vsel %vm483_vm7, %v1694_v61, -inf  ;;  %v528_v39 = vsel %vm496_vm8, %v1680_v54, -inf  ;;  %v529_v40 = vsel %vm497_vm9, %v1686_v57, -inf }
 0x1ce   : > { %v552_v23 = vmax.f32 %v514_v21, %v515_v22  ;;  %v573_v55 = vmax.f32 %v528_v39, %v529_v40 }
 0x1cf   : > { %v466_v28 = vpop.xlane.xlu0 %465  ;;  %v445_v33 = vpop.xlane.xlu1 %444 }
 0x1d0   : > { %vm498_vm10 = vcmp.lt.f32.partialorder %v1692_v60, %v466_v28  ;;  %vm499_vm11 = vcmp.lt.f32.partialorder %v1696_v62, %v466_v28  ;;  %553 = vmax.xlane.f32.xlu0 %v552_v23  ;;  %vm484_vm12 = vcmp.lt.f32.partialorder %v1702_v1, %v445_v33  ;;  %vm485_vm13 = vcmp.lt.f32.partialorder %v1708_v4, %v445_v33 }
 0x1d1   : > { %550 = vmax.xlane.f32.xlu1 %v549_v34  ;;  %v530_v43 = vsel %vm498_vm10, %v1692_v60, -inf  ;;  %v531_v46 = vsel %vm499_vm11, %v1696_v62, -inf  ;;  %v516_v58 = vsel %vm484_vm12, %v1702_v1, -inf  ;;  %v517_v63 = vsel %vm485_vm13, %v1708_v4, -inf }
 0x1d2   : > { %v576_v51 = vmax.f32 %v530_v43, %v531_v46  ;;  %v555_v0 = vmax.f32 %v516_v58, %v517_v63 }
 0x1d3   : > { %v469_v52 = vpop.xlane.xlu1 %468 }
 0x1d4   : > { %577 = vmax.xlane.f32.xlu0 %v576_v51  ;;  %vm500_vm14 = vcmp.lt.f32.partialorder %v1704_v2, %v469_v52  ;;  %vm501_vm15 = vcmp.lt.f32.partialorder %v1712_v6, %v469_v52 }
 0x1d5   : > { %574 = vmax.xlane.f32.xlu1 %v573_v55  ;;  %v532_v3 = vsel %vm500_vm14, %v1704_v2, -inf  ;;  %v533_v5 = vsel %vm501_vm15, %v1712_v6, -inf }
 0x1d6   : > { %v579_v7 = vmax.f32 %v532_v3, %v533_v5 }
 0x1d9   : > { %556 = vmax.xlane.f32.xlu1 %v555_v0 }
 0x1dd   : > { %580 = vmax.xlane.f32.xlu1 %v579_v7 }
 0x241   : > { %v536_v8 = vpop.xlane.xlu0 %535 }
 0x242   : > { %vm582_vm0 = vcmp.lt.f32.partialorder %v1620_v24, %v536_v8  ;;  %vm583_vm1 = vcmp.lt.f32.partialorder %v1624_v26, %v536_v8 }
 0x243   : > { %v614_v9 = vsel %vm582_vm0, %v1620_v24, -inf  ;;  %v615_v10 = vsel %vm583_vm1, %v1624_v26, -inf }
 0x244   : > { %v646_v11 = vmax.f32 %v614_v9, %v615_v10 }
 0x245   : > { %v560_v12 = vpop.xlane.xlu0 %559 }
 0x246   : > { %vm598_vm2 = vcmp.lt.f32.partialorder %v1622_v25, %v560_v12  ;;  %vm599_vm3 = vcmp.lt.f32.partialorder %v1626_v27, %v560_v12  ;;  %647 = vmax.xlane.f32.xlu0 %v646_v11 }
 0x247   : > { %v630_v13 = vsel %vm598_vm2, %v1622_v25, -inf  ;;  %v631_v14 = vsel %vm599_vm3, %v1626_v27, -inf }
 0x248   : > { %v670_v15 = vmax.f32 %v630_v13, %v631_v14 }
 0x249   : > { %v542_v16 = vpop.xlane.xlu0 %541 }
 0x24a   : > { %vm586_vm4 = vcmp.lt.f32.partialorder %v1642_v35, %v542_v16  ;;  %vm587_vm5 = vcmp.lt.f32.partialorder %v1646_v37, %v542_v16  ;;  %v539_v17 = vpop.xlane.xlu1 %538  ;;  %671 = vmax.xlane.f32.xlu0 %v670_v15 }
 0x24b   : > { %vm584_vm6 = vcmp.lt.f32.partialorder %v1630_v29, %v539_v17  ;;  %vm585_vm7 = vcmp.lt.f32.partialorder %v1634_v31, %v539_v17  ;;  %v618_v18 = vsel %vm586_vm4, %v1642_v35, -inf  ;;  %v619_v19 = vsel %vm587_vm5, %v1646_v37, -inf }
 0x24c   : > { %v652_v20 = vmax.f32 %v618_v18, %v619_v19  ;;  %v616_v21 = vsel %vm584_vm6, %v1630_v29, -inf  ;;  %v617_v22 = vsel %vm585_vm7, %v1634_v31, -inf }
 0x24d   : > { %v566_v23 = vpop.xlane.xlu0 %565  ;;  %v649_v28 = vmax.f32 %v616_v21, %v617_v22 }
 0x24e   : > { %vm602_vm8 = vcmp.lt.f32.partialorder %v1644_v36, %v566_v23  ;;  %vm603_vm9 = vcmp.lt.f32.partialorder %v1648_v38, %v566_v23  ;;  %v563_v33 = vpop.xlane.xlu1 %562  ;;  %653 = vmax.xlane.f32.xlu0 %v652_v20 }
 0x24f   : > { %vm600_vm10 = vcmp.lt.f32.partialorder %v1632_v30, %v563_v33  ;;  %vm601_vm11 = vcmp.lt.f32.partialorder %v1636_v32, %v563_v33  ;;  %650 = vmax.xlane.f32.xlu1 %v649_v28  ;;  %v634_v34 = vsel %vm602_vm8, %v1644_v36, -inf  ;;  %v635_v39 = vsel %vm603_vm9, %v1648_v38, -inf }
 0x250   : > { %v676_v40 = vmax.f32 %v634_v34, %v635_v39  ;;  %v632_v43 = vsel %vm600_vm10, %v1632_v30, -inf  ;;  %v633_v46 = vsel %vm601_vm11, %v1636_v32, -inf }
 0x251   : > { %v548_v51 = vpop.xlane.xlu0 %547  ;;  %v673_v52 = vmax.f32 %v632_v43, %v633_v46 }
 0x252   : > { %vm590_vm12 = vcmp.lt.f32.partialorder %v1666_v47, %v548_v51  ;;  %vm591_vm13 = vcmp.lt.f32.partialorder %v1670_v49, %v548_v51  ;;  %v545_v55 = vpop.xlane.xlu1 %544  ;;  %677 = vmax.xlane.f32.xlu0 %v676_v40 }
 0x253   : > { %vm588_vm14 = vcmp.lt.f32.partialorder %v1654_v41, %v545_v55  ;;  %vm589_vm15 = vcmp.lt.f32.partialorder %v1660_v44, %v545_v55  ;;  %674 = vmax.xlane.f32.xlu1 %v673_v52  ;;  %v622_v58 = vsel %vm590_vm12, %v1666_v47, -inf  ;;  %v623_v63 = vsel %vm591_vm13, %v1670_v49, -inf }
 0x254   : > { %v658_v0 = vmax.f32 %v622_v58, %v623_v63  ;;  %v620_v3 = vsel %vm588_vm14, %v1654_v41, -inf  ;;  %v621_v5 = vsel %vm589_vm15, %v1660_v44, -inf }
 0x255   : > { %v572_v7 = vpop.xlane.xlu0 %571  ;;  %v655_v8 = vmax.f32 %v620_v3, %v621_v5 }
 0x256   : > { %vm606_vm0 = vcmp.lt.f32.partialorder %v1668_v48, %v572_v7  ;;  %vm607_vm1 = vcmp.lt.f32.partialorder %v1672_v50, %v572_v7  ;;  %v569_v9 = vpop.xlane.xlu1 %568  ;;  %659 = vmax.xlane.f32.xlu0 %v658_v0 }
 0x257   : > { %vm604_vm2 = vcmp.lt.f32.partialorder %v1656_v42, %v569_v9  ;;  %vm605_vm3 = vcmp.lt.f32.partialorder %v1662_v45, %v569_v9  ;;  %656 = vmax.xlane.f32.xlu1 %v655_v8  ;;  %v638_v10 = vsel %vm606_vm0, %v1668_v48, -inf  ;;  %v639_v11 = vsel %vm607_vm1, %v1672_v50, -inf }
 0x258   : > { %v682_v12 = vmax.f32 %v638_v10, %v639_v11  ;;  %v636_v13 = vsel %vm604_vm2, %v1656_v42, -inf  ;;  %v637_v14 = vsel %vm605_vm3, %v1662_v45, -inf }
 0x259   : > { %v554_v15 = vpop.xlane.xlu0 %553  ;;  %v679_v16 = vmax.f32 %v636_v13, %v637_v14 }
 0x25a   : > { %vm594_vm4 = vcmp.lt.f32.partialorder %v1690_v59, %v554_v15  ;;  %vm595_vm5 = vcmp.lt.f32.partialorder %v1694_v61, %v554_v15  ;;  %v551_v17 = vpop.xlane.xlu1 %550  ;;  %683 = vmax.xlane.f32.xlu0 %v682_v12 }
 0x25b   : > { %vm592_vm6 = vcmp.lt.f32.partialorder %v1678_v53, %v551_v17  ;;  %vm593_vm7 = vcmp.lt.f32.partialorder %v1684_v56, %v551_v17  ;;  %680 = vmax.xlane.f32.xlu1 %v679_v16  ;;  %v626_v18 = vsel %vm594_vm4, %v1690_v59, -inf  ;;  %v627_v19 = vsel %vm595_vm5, %v1694_v61, -inf }
 0x25c   : > { %v664_v20 = vmax.f32 %v626_v18, %v627_v19  ;;  %v624_v21 = vsel %vm592_vm6, %v1678_v53, -inf  ;;  %v625_v22 = vsel %vm593_vm7, %v1684_v56, -inf }
 0x25d   : > { %v578_v23 = vpop.xlane.xlu0 %577  ;;  %v661_v28 = vmax.f32 %v624_v21, %v625_v22 }
 0x25e   : > { %vm610_vm8 = vcmp.lt.f32.partialorder %v1692_v60, %v578_v23  ;;  %vm611_vm9 = vcmp.lt.f32.partialorder %v1696_v62, %v578_v23  ;;  %v575_v33 = vpop.xlane.xlu1 %574  ;;  %665 = vmax.xlane.f32.xlu0 %v664_v20 }
 0x25f   : > { %vm608_vm10 = vcmp.lt.f32.partialorder %v1680_v54, %v575_v33  ;;  %vm609_vm11 = vcmp.lt.f32.partialorder %v1686_v57, %v575_v33  ;;  %662 = vmax.xlane.f32.xlu1 %v661_v28  ;;  %v642_v34 = vsel %vm610_vm8, %v1692_v60, -inf  ;;  %v643_v39 = vsel %vm611_vm9, %v1696_v62, -inf }
 0x260   : > { %v688_v40 = vmax.f32 %v642_v34, %v643_v39  ;;  %v640_v43 = vsel %vm608_vm10, %v1680_v54, -inf  ;;  %v641_v46 = vsel %vm609_vm11, %v1686_v57, -inf }
 0x261   : > { %v685_v51 = vmax.f32 %v640_v43, %v641_v46 }
 0x262   : > { %v557_v52 = vpop.xlane.xlu1 %556  ;;  %689 = vmax.xlane.f32.xlu0 %v688_v40 }
 0x263   : > { %vm596_vm12 = vcmp.lt.f32.partialorder %v1702_v1, %v557_v52  ;;  %vm597_vm13 = vcmp.lt.f32.partialorder %v1708_v4, %v557_v52  ;;  %686 = vmax.xlane.f32.xlu1 %v685_v51 }
 0x264   : > { %v628_v55 = vsel %vm596_vm12, %v1702_v1, -inf  ;;  %v629_v58 = vsel %vm597_vm13, %v1708_v4, -inf }
 0x265   : > { %v667_v63 = vmax.f32 %v628_v55, %v629_v58 }
 0x266   : > { %v581_v0 = vpop.xlane.xlu1 %580 }
 0x267   : > { %vm612_vm14 = vcmp.lt.f32.partialorder %v1704_v2, %v581_v0  ;;  %vm613_vm15 = vcmp.lt.f32.partialorder %v1712_v6, %v581_v0  ;;  %668 = vmax.xlane.f32.xlu1 %v667_v63 }
 0x268   : > { %v644_v3 = vsel %vm612_vm14, %v1704_v2, -inf  ;;  %v645_v5 = vsel %vm613_vm15, %v1712_v6, -inf }
 0x269   : > { %v691_v7 = vmax.f32 %v644_v3, %v645_v5 }
 0x26b   : > { %692 = vmax.xlane.f32.xlu1 %v691_v7 }
 0x2cf   : > { %v648_v8 = vpop.xlane.xlu0 %647 }
 0x2d0   : > { %vm694_vm0 = vcmp.lt.f32.partialorder %v1620_v24, %v648_v8  ;;  %vm695_vm1 = vcmp.lt.f32.partialorder %v1624_v26, %v648_v8 }
 0x2d1   : > { %v726_v9 = vsel %vm694_vm0, %v1620_v24, -inf  ;;  %v727_v10 = vsel %vm695_vm1, %v1624_v26, -inf }
 0x2d2   : > { %v758_v11 = vmax.f32 %v726_v9, %v727_v10 }
 0x2d3   : > { %v672_v12 = vpop.xlane.xlu0 %671 }
 0x2d4   : > { %vm710_vm2 = vcmp.lt.f32.partialorder %v1622_v25, %v672_v12  ;;  %vm711_vm3 = vcmp.lt.f32.partialorder %v1626_v27, %v672_v12  ;;  %759 = vmax.xlane.f32.xlu0 %v758_v11 }
 0x2d5   : > { %v742_v13 = vsel %vm710_vm2, %v1622_v25, -inf  ;;  %v743_v14 = vsel %vm711_vm3, %v1626_v27, -inf }
 0x2d6   : > { %v782_v15 = vmax.f32 %v742_v13, %v743_v14 }
 0x2d7   : > { %v654_v16 = vpop.xlane.xlu0 %653 }
 0x2d8   : > { %vm698_vm4 = vcmp.lt.f32.partialorder %v1642_v35, %v654_v16  ;;  %vm699_vm5 = vcmp.lt.f32.partialorder %v1646_v37, %v654_v16  ;;  %v651_v17 = vpop.xlane.xlu1 %650  ;;  %783 = vmax.xlane.f32.xlu0 %v782_v15 }
 0x2d9   : > { %vm696_vm6 = vcmp.lt.f32.partialorder %v1630_v29, %v651_v17  ;;  %vm697_vm7 = vcmp.lt.f32.partialorder %v1634_v31, %v651_v17  ;;  %v730_v18 = vsel %vm698_vm4, %v1642_v35, -inf  ;;  %v731_v19 = vsel %vm699_vm5, %v1646_v37, -inf }
 0x2da   : > { %v764_v20 = vmax.f32 %v730_v18, %v731_v19  ;;  %v728_v21 = vsel %vm696_vm6, %v1630_v29, -inf  ;;  %v729_v22 = vsel %vm697_vm7, %v1634_v31, -inf }
 0x2db   : > { %v678_v23 = vpop.xlane.xlu0 %677  ;;  %v761_v28 = vmax.f32 %v728_v21, %v729_v22 }
 0x2dc   : > { %vm714_vm8 = vcmp.lt.f32.partialorder %v1644_v36, %v678_v23  ;;  %vm715_vm9 = vcmp.lt.f32.partialorder %v1648_v38, %v678_v23  ;;  %v675_v33 = vpop.xlane.xlu1 %674  ;;  %765 = vmax.xlane.f32.xlu0 %v764_v20 }
 0x2dd   : > { %vm712_vm10 = vcmp.lt.f32.partialorder %v1632_v30, %v675_v33  ;;  %vm713_vm11 = vcmp.lt.f32.partialorder %v1636_v32, %v675_v33  ;;  %762 = vmax.xlane.f32.xlu1 %v761_v28  ;;  %v746_v34 = vsel %vm714_vm8, %v1644_v36, -inf  ;;  %v747_v39 = vsel %vm715_vm9, %v1648_v38, -inf }
 0x2de   : > { %v788_v40 = vmax.f32 %v746_v34, %v747_v39  ;;  %v744_v43 = vsel %vm712_vm10, %v1632_v30, -inf  ;;  %v745_v46 = vsel %vm713_vm11, %v1636_v32, -inf }
 0x2df   : > { %v660_v51 = vpop.xlane.xlu0 %659  ;;  %v785_v52 = vmax.f32 %v744_v43, %v745_v46 }
 0x2e0   : > { %vm702_vm12 = vcmp.lt.f32.partialorder %v1666_v47, %v660_v51  ;;  %vm703_vm13 = vcmp.lt.f32.partialorder %v1670_v49, %v660_v51  ;;  %v657_v55 = vpop.xlane.xlu1 %656  ;;  %789 = vmax.xlane.f32.xlu0 %v788_v40 }
 0x2e1   : > { %vm700_vm14 = vcmp.lt.f32.partialorder %v1654_v41, %v657_v55  ;;  %vm701_vm15 = vcmp.lt.f32.partialorder %v1660_v44, %v657_v55  ;;  %786 = vmax.xlane.f32.xlu1 %v785_v52  ;;  %v734_v58 = vsel %vm702_vm12, %v1666_v47, -inf  ;;  %v735_v63 = vsel %vm703_vm13, %v1670_v49, -inf }
 0x2e2   : > { %v770_v0 = vmax.f32 %v734_v58, %v735_v63  ;;  %v732_v3 = vsel %vm700_vm14, %v1654_v41, -inf  ;;  %v733_v5 = vsel %vm701_vm15, %v1660_v44, -inf }
 0x2e3   : > { %v684_v7 = vpop.xlane.xlu0 %683  ;;  %v767_v8 = vmax.f32 %v732_v3, %v733_v5 }
 0x2e4   : > { %vm718_vm0 = vcmp.lt.f32.partialorder %v1668_v48, %v684_v7  ;;  %vm719_vm1 = vcmp.lt.f32.partialorder %v1672_v50, %v684_v7  ;;  %v681_v9 = vpop.xlane.xlu1 %680  ;;  %771 = vmax.xlane.f32.xlu0 %v770_v0 }
 0x2e5   : > { %vm716_vm2 = vcmp.lt.f32.partialorder %v1656_v42, %v681_v9  ;;  %vm717_vm3 = vcmp.lt.f32.partialorder %v1662_v45, %v681_v9  ;;  %768 = vmax.xlane.f32.xlu1 %v767_v8  ;;  %v750_v10 = vsel %vm718_vm0, %v1668_v48, -inf  ;;  %v751_v11 = vsel %vm719_vm1, %v1672_v50, -inf }
 0x2e6   : > { %v794_v12 = vmax.f32 %v750_v10, %v751_v11  ;;  %v748_v13 = vsel %vm716_vm2, %v1656_v42, -inf  ;;  %v749_v14 = vsel %vm717_vm3, %v1662_v45, -inf }
 0x2e7   : > { %v666_v15 = vpop.xlane.xlu0 %665  ;;  %v791_v16 = vmax.f32 %v748_v13, %v749_v14 }
 0x2e8   : > { %vm706_vm4 = vcmp.lt.f32.partialorder %v1690_v59, %v666_v15  ;;  %vm707_vm5 = vcmp.lt.f32.partialorder %v1694_v61, %v666_v15  ;;  %v663_v17 = vpop.xlane.xlu1 %662  ;;  %795 = vmax.xlane.f32.xlu0 %v794_v12 }
 0x2e9   : > { %vm704_vm6 = vcmp.lt.f32.partialorder %v1678_v53, %v663_v17  ;;  %vm705_vm7 = vcmp.lt.f32.partialorder %v1684_v56, %v663_v17  ;;  %792 = vmax.xlane.f32.xlu1 %v791_v16  ;;  %v738_v18 = vsel %vm706_vm4, %v1690_v59, -inf  ;;  %v739_v19 = vsel %vm707_vm5, %v1694_v61, -inf }
 0x2ea   : > { %v776_v20 = vmax.f32 %v738_v18, %v739_v19  ;;  %v736_v21 = vsel %vm704_vm6, %v1678_v53, -inf  ;;  %v737_v22 = vsel %vm705_vm7, %v1684_v56, -inf }
 0x2eb   : > { %v690_v23 = vpop.xlane.xlu0 %689  ;;  %v773_v28 = vmax.f32 %v736_v21, %v737_v22 }
 0x2ec   : > { %vm722_vm8 = vcmp.lt.f32.partialorder %v1692_v60, %v690_v23  ;;  %vm723_vm9 = vcmp.lt.f32.partialorder %v1696_v62, %v690_v23  ;;  %v687_v33 = vpop.xlane.xlu1 %686  ;;  %777 = vmax.xlane.f32.xlu0 %v776_v20 }
 0x2ed   : > { %vm720_vm10 = vcmp.lt.f32.partialorder %v1680_v54, %v687_v33  ;;  %vm721_vm11 = vcmp.lt.f32.partialorder %v1686_v57, %v687_v33  ;;  %774 = vmax.xlane.f32.xlu1 %v773_v28  ;;  %v754_v34 = vsel %vm722_vm8, %v1692_v60, -inf  ;;  %v755_v39 = vsel %vm723_vm9, %v1696_v62, -inf }
 0x2ee   : > { %v800_v40 = vmax.f32 %v754_v34, %v755_v39  ;;  %v752_v43 = vsel %vm720_vm10, %v1680_v54, -inf  ;;  %v753_v46 = vsel %vm721_vm11, %v1686_v57, -inf }
 0x2ef   : > { %v797_v51 = vmax.f32 %v752_v43, %v753_v46 }
 0x2f0   : > { %v669_v52 = vpop.xlane.xlu1 %668  ;;  %801 = vmax.xlane.f32.xlu0 %v800_v40 }
 0x2f1   : > { %vm708_vm12 = vcmp.lt.f32.partialorder %v1702_v1, %v669_v52  ;;  %vm709_vm13 = vcmp.lt.f32.partialorder %v1708_v4, %v669_v52  ;;  %798 = vmax.xlane.f32.xlu1 %v797_v51 }
 0x2f2   : > { %v740_v55 = vsel %vm708_vm12, %v1702_v1, -inf  ;;  %v741_v58 = vsel %vm709_vm13, %v1708_v4, -inf }
 0x2f3   : > { %v779_v63 = vmax.f32 %v740_v55, %v741_v58 }
 0x2f4   : > { %v693_v0 = vpop.xlane.xlu1 %692 }
 0x2f5   : > { %vm724_vm14 = vcmp.lt.f32.partialorder %v1704_v2, %v693_v0  ;;  %vm725_vm15 = vcmp.lt.f32.partialorder %v1712_v6, %v693_v0  ;;  %780 = vmax.xlane.f32.xlu1 %v779_v63 }
 0x2f6   : > { %v756_v3 = vsel %vm724_vm14, %v1704_v2, -inf  ;;  %v757_v5 = vsel %vm725_vm15, %v1712_v6, -inf }
 0x2f7   : > { %v803_v7 = vmax.f32 %v756_v3, %v757_v5 }
 0x2f9   : > { %804 = vmax.xlane.f32.xlu1 %v803_v7 }
 0x35d   : > { %v760_v8 = vpop.xlane.xlu0 %759 }
 0x35e   : > { %vm806_vm0 = vcmp.lt.f32.partialorder %v1620_v24, %v760_v8  ;;  %vm807_vm1 = vcmp.lt.f32.partialorder %v1624_v26, %v760_v8 }
 0x35f   : > { %v838_v9 = vsel %vm806_vm0, %v1620_v24, -inf  ;;  %v839_v10 = vsel %vm807_vm1, %v1624_v26, -inf }
 0x360   : > { %v870_v11 = vmax.f32 %v838_v9, %v839_v10 }
 0x361   : > { %v784_v12 = vpop.xlane.xlu0 %783 }
 0x362   : > { %vm822_vm2 = vcmp.lt.f32.partialorder %v1622_v25, %v784_v12  ;;  %vm823_vm3 = vcmp.lt.f32.partialorder %v1626_v27, %v784_v12  ;;  %871 = vmax.xlane.f32.xlu0 %v870_v11 }
 0x363   : > { %v854_v13 = vsel %vm822_vm2, %v1622_v25, -inf  ;;  %v855_v14 = vsel %vm823_vm3, %v1626_v27, -inf }
 0x364   : > { %v894_v15 = vmax.f32 %v854_v13, %v855_v14 }
 0x365   : > { %v766_v16 = vpop.xlane.xlu0 %765 }
 0x366   : > { %vm810_vm4 = vcmp.lt.f32.partialorder %v1642_v35, %v766_v16  ;;  %vm811_vm5 = vcmp.lt.f32.partialorder %v1646_v37, %v766_v16  ;;  %v763_v17 = vpop.xlane.xlu1 %762  ;;  %895 = vmax.xlane.f32.xlu0 %v894_v15 }
 0x367   : > { %vm808_vm6 = vcmp.lt.f32.partialorder %v1630_v29, %v763_v17  ;;  %vm809_vm7 = vcmp.lt.f32.partialorder %v1634_v31, %v763_v17  ;;  %v842_v18 = vsel %vm810_vm4, %v1642_v35, -inf  ;;  %v843_v19 = vsel %vm811_vm5, %v1646_v37, -inf }
 0x368   : > { %v876_v20 = vmax.f32 %v842_v18, %v843_v19  ;;  %v840_v21 = vsel %vm808_vm6, %v1630_v29, -inf  ;;  %v841_v22 = vsel %vm809_vm7, %v1634_v31, -inf }
 0x369   : > { %v790_v23 = vpop.xlane.xlu0 %789  ;;  %v873_v28 = vmax.f32 %v840_v21, %v841_v22 }
 0x36a   : > { %vm826_vm8 = vcmp.lt.f32.partialorder %v1644_v36, %v790_v23  ;;  %vm827_vm9 = vcmp.lt.f32.partialorder %v1648_v38, %v790_v23  ;;  %v787_v33 = vpop.xlane.xlu1 %786  ;;  %877 = vmax.xlane.f32.xlu0 %v876_v20 }
 0x36b   : > { %vm824_vm10 = vcmp.lt.f32.partialorder %v1632_v30, %v787_v33  ;;  %vm825_vm11 = vcmp.lt.f32.partialorder %v1636_v32, %v787_v33  ;;  %874 = vmax.xlane.f32.xlu1 %v873_v28  ;;  %v858_v34 = vsel %vm826_vm8, %v1644_v36, -inf  ;;  %v859_v39 = vsel %vm827_vm9, %v1648_v38, -inf }
 0x36c   : > { %v900_v40 = vmax.f32 %v858_v34, %v859_v39  ;;  %v856_v43 = vsel %vm824_vm10, %v1632_v30, -inf  ;;  %v857_v46 = vsel %vm825_vm11, %v1636_v32, -inf }
 0x36d   : > { %v772_v51 = vpop.xlane.xlu0 %771  ;;  %v897_v52 = vmax.f32 %v856_v43, %v857_v46 }
 0x36e   : > { %vm814_vm12 = vcmp.lt.f32.partialorder %v1666_v47, %v772_v51  ;;  %vm815_vm13 = vcmp.lt.f32.partialorder %v1670_v49, %v772_v51  ;;  %v769_v55 = vpop.xlane.xlu1 %768  ;;  %901 = vmax.xlane.f32.xlu0 %v900_v40 }
 0x36f   : > { %vm812_vm14 = vcmp.lt.f32.partialorder %v1654_v41, %v769_v55  ;;  %vm813_vm15 = vcmp.lt.f32.partialorder %v1660_v44, %v769_v55  ;;  %898 = vmax.xlane.f32.xlu1 %v897_v52  ;;  %v846_v58 = vsel %vm814_vm12, %v1666_v47, -inf  ;;  %v847_v63 = vsel %vm815_vm13, %v1670_v49, -inf }
 0x370   : > { %v882_v0 = vmax.f32 %v846_v58, %v847_v63  ;;  %v844_v3 = vsel %vm812_vm14, %v1654_v41, -inf  ;;  %v845_v5 = vsel %vm813_vm15, %v1660_v44, -inf }
 0x371   : > { %v796_v7 = vpop.xlane.xlu0 %795  ;;  %v879_v8 = vmax.f32 %v844_v3, %v845_v5 }
 0x372   : > { %vm830_vm0 = vcmp.lt.f32.partialorder %v1668_v48, %v796_v7  ;;  %vm831_vm1 = vcmp.lt.f32.partialorder %v1672_v50, %v796_v7  ;;  %v793_v9 = vpop.xlane.xlu1 %792  ;;  %883 = vmax.xlane.f32.xlu0 %v882_v0 }
 0x373   : > { %vm828_vm2 = vcmp.lt.f32.partialorder %v1656_v42, %v793_v9  ;;  %vm829_vm3 = vcmp.lt.f32.partialorder %v1662_v45, %v793_v9  ;;  %880 = vmax.xlane.f32.xlu1 %v879_v8  ;;  %v862_v10 = vsel %vm830_vm0, %v1668_v48, -inf  ;;  %v863_v11 = vsel %vm831_vm1, %v1672_v50, -inf }
 0x374   : > { %v906_v12 = vmax.f32 %v862_v10, %v863_v11  ;;  %v860_v13 = vsel %vm828_vm2, %v1656_v42, -inf  ;;  %v861_v14 = vsel %vm829_vm3, %v1662_v45, -inf }
 0x375   : > { %v778_v15 = vpop.xlane.xlu0 %777  ;;  %v903_v16 = vmax.f32 %v860_v13, %v861_v14 }
 0x376   : > { %vm818_vm4 = vcmp.lt.f32.partialorder %v1690_v59, %v778_v15  ;;  %vm819_vm5 = vcmp.lt.f32.partialorder %v1694_v61, %v778_v15  ;;  %v775_v17 = vpop.xlane.xlu1 %774  ;;  %907 = vmax.xlane.f32.xlu0 %v906_v12 }
 0x377   : > { %vm816_vm6 = vcmp.lt.f32.partialorder %v1678_v53, %v775_v17  ;;  %vm817_vm7 = vcmp.lt.f32.partialorder %v1684_v56, %v775_v17  ;;  %904 = vmax.xlane.f32.xlu1 %v903_v16  ;;  %v850_v18 = vsel %vm818_vm4, %v1690_v59, -inf  ;;  %v851_v19 = vsel %vm819_vm5, %v1694_v61, -inf }
 0x378   : > { %v888_v20 = vmax.f32 %v850_v18, %v851_v19  ;;  %v848_v21 = vsel %vm816_vm6, %v1678_v53, -inf  ;;  %v849_v22 = vsel %vm817_vm7, %v1684_v56, -inf }
 0x379   : > { %v802_v23 = vpop.xlane.xlu0 %801  ;;  %v885_v28 = vmax.f32 %v848_v21, %v849_v22 }
 0x37a   : > { %vm834_vm8 = vcmp.lt.f32.partialorder %v1692_v60, %v802_v23  ;;  %vm835_vm9 = vcmp.lt.f32.partialorder %v1696_v62, %v802_v23  ;;  %v799_v33 = vpop.xlane.xlu1 %798  ;;  %889 = vmax.xlane.f32.xlu0 %v888_v20 }
 0x37b   : > { %vm832_vm10 = vcmp.lt.f32.partialorder %v1680_v54, %v799_v33  ;;  %vm833_vm11 = vcmp.lt.f32.partialorder %v1686_v57, %v799_v33  ;;  %886 = vmax.xlane.f32.xlu1 %v885_v28  ;;  %v866_v34 = vsel %vm834_vm8, %v1692_v60, -inf  ;;  %v867_v39 = vsel %vm835_vm9, %v1696_v62, -inf }
 0x37c   : > { %v912_v40 = vmax.f32 %v866_v34, %v867_v39  ;;  %v864_v43 = vsel %vm832_vm10, %v1680_v54, -inf  ;;  %v865_v46 = vsel %vm833_vm11, %v1686_v57, -inf }
 0x37d   : > { %v909_v51 = vmax.f32 %v864_v43, %v865_v46 }
 0x37e   : > { %v781_v52 = vpop.xlane.xlu1 %780  ;;  %913 = vmax.xlane.f32.xlu0 %v912_v40 }
 0x37f   : > { %vm820_vm12 = vcmp.lt.f32.partialorder %v1702_v1, %v781_v52  ;;  %vm821_vm13 = vcmp.lt.f32.partialorder %v1708_v4, %v781_v52  ;;  %910 = vmax.xlane.f32.xlu1 %v909_v51 }
 0x380   : > { %v852_v55 = vsel %vm820_vm12, %v1702_v1, -inf  ;;  %v853_v58 = vsel %vm821_vm13, %v1708_v4, -inf }
 0x381   : > { %v891_v63 = vmax.f32 %v852_v55, %v853_v58 }
 0x382   : > { %v805_v0 = vpop.xlane.xlu1 %804 }
 0x383   : > { %vm836_vm14 = vcmp.lt.f32.partialorder %v1704_v2, %v805_v0  ;;  %vm837_vm15 = vcmp.lt.f32.partialorder %v1712_v6, %v805_v0  ;;  %892 = vmax.xlane.f32.xlu1 %v891_v63 }
 0x384   : > { %v868_v3 = vsel %vm836_vm14, %v1704_v2, -inf  ;;  %v869_v5 = vsel %vm837_vm15, %v1712_v6, -inf }
 0x385   : > { %v915_v7 = vmax.f32 %v868_v3, %v869_v5 }
 0x387   : > { %916 = vmax.xlane.f32.xlu1 %v915_v7 }
 0x3eb   : > { %v872_v8 = vpop.xlane.xlu0 %871 }
 0x3ec   : > { %vm918_vm0 = vcmp.lt.f32.partialorder %v1620_v24, %v872_v8  ;;  %vm919_vm1 = vcmp.lt.f32.partialorder %v1624_v26, %v872_v8 }
 0x3ed   : > { %v950_v9 = vsel %vm918_vm0, %v1620_v24, -inf  ;;  %v951_v10 = vsel %vm919_vm1, %v1624_v26, -inf }
 0x3ee   : > { %v982_v11 = vmax.f32 %v950_v9, %v951_v10 }
 0x3ef   : > { %v896_v12 = vpop.xlane.xlu0 %895 }
 0x3f0   : > { %vm934_vm2 = vcmp.lt.f32.partialorder %v1622_v25, %v896_v12  ;;  %vm935_vm3 = vcmp.lt.f32.partialorder %v1626_v27, %v896_v12  ;;  %983 = vmax.xlane.f32.xlu0 %v982_v11 }
 0x3f1   : > { %v966_v13 = vsel %vm934_vm2, %v1622_v25, -inf  ;;  %v967_v14 = vsel %vm935_vm3, %v1626_v27, -inf }
 0x3f2   : > { %v1006_v15 = vmax.f32 %v966_v13, %v967_v14 }
 0x3f3   : > { %v878_v16 = vpop.xlane.xlu0 %877 }
 0x3f4   : > { %vm922_vm4 = vcmp.lt.f32.partialorder %v1642_v35, %v878_v16  ;;  %vm923_vm5 = vcmp.lt.f32.partialorder %v1646_v37, %v878_v16  ;;  %v875_v17 = vpop.xlane.xlu1 %874  ;;  %1007 = vmax.xlane.f32.xlu0 %v1006_v15 }
 0x3f5   : > { %vm920_vm6 = vcmp.lt.f32.partialorder %v1630_v29, %v875_v17  ;;  %vm921_vm7 = vcmp.lt.f32.partialorder %v1634_v31, %v875_v17  ;;  %v954_v18 = vsel %vm922_vm4, %v1642_v35, -inf  ;;  %v955_v19 = vsel %vm923_vm5, %v1646_v37, -inf }
 0x3f6   : > { %v988_v20 = vmax.f32 %v954_v18, %v955_v19  ;;  %v952_v21 = vsel %vm920_vm6, %v1630_v29, -inf  ;;  %v953_v22 = vsel %vm921_vm7, %v1634_v31, -inf }
 0x3f7   : > { %v902_v23 = vpop.xlane.xlu0 %901  ;;  %v985_v28 = vmax.f32 %v952_v21, %v953_v22 }
 0x3f8   : > { %vm938_vm8 = vcmp.lt.f32.partialorder %v1644_v36, %v902_v23  ;;  %vm939_vm9 = vcmp.lt.f32.partialorder %v1648_v38, %v902_v23  ;;  %v899_v33 = vpop.xlane.xlu1 %898  ;;  %989 = vmax.xlane.f32.xlu0 %v988_v20 }
 0x3f9   : > { %vm936_vm10 = vcmp.lt.f32.partialorder %v1632_v30, %v899_v33  ;;  %vm937_vm11 = vcmp.lt.f32.partialorder %v1636_v32, %v899_v33  ;;  %986 = vmax.xlane.f32.xlu1 %v985_v28  ;;  %v970_v34 = vsel %vm938_vm8, %v1644_v36, -inf  ;;  %v971_v39 = vsel %vm939_vm9, %v1648_v38, -inf }
 0x3fa   : > { %v1012_v40 = vmax.f32 %v970_v34, %v971_v39  ;;  %v968_v43 = vsel %vm936_vm10, %v1632_v30, -inf  ;;  %v969_v46 = vsel %vm937_vm11, %v1636_v32, -inf }
 0x3fb   : > { %v884_v51 = vpop.xlane.xlu0 %883  ;;  %v1009_v52 = vmax.f32 %v968_v43, %v969_v46 }
 0x3fc   : > { %vm926_vm12 = vcmp.lt.f32.partialorder %v1666_v47, %v884_v51  ;;  %vm927_vm13 = vcmp.lt.f32.partialorder %v1670_v49, %v884_v51  ;;  %v881_v55 = vpop.xlane.xlu1 %880  ;;  %1013 = vmax.xlane.f32.xlu0 %v1012_v40 }
 0x3fd   : > { %vm924_vm14 = vcmp.lt.f32.partialorder %v1654_v41, %v881_v55  ;;  %vm925_vm15 = vcmp.lt.f32.partialorder %v1660_v44, %v881_v55  ;;  %1010 = vmax.xlane.f32.xlu1 %v1009_v52  ;;  %v958_v58 = vsel %vm926_vm12, %v1666_v47, -inf  ;;  %v959_v63 = vsel %vm927_vm13, %v1670_v49, -inf }
 0x3fe   : > { %v994_v0 = vmax.f32 %v958_v58, %v959_v63  ;;  %v956_v3 = vsel %vm924_vm14, %v1654_v41, -inf  ;;  %v957_v5 = vsel %vm925_vm15, %v1660_v44, -inf }
 0x3ff   : > { %v908_v7 = vpop.xlane.xlu0 %907  ;;  %v991_v8 = vmax.f32 %v956_v3, %v957_v5 }
 0x400   : > { %vm942_vm0 = vcmp.lt.f32.partialorder %v1668_v48, %v908_v7  ;;  %vm943_vm1 = vcmp.lt.f32.partialorder %v1672_v50, %v908_v7  ;;  %v905_v9 = vpop.xlane.xlu1 %904  ;;  %995 = vmax.xlane.f32.xlu0 %v994_v0 }
 0x401   : > { %vm940_vm2 = vcmp.lt.f32.partialorder %v1656_v42, %v905_v9  ;;  %vm941_vm3 = vcmp.lt.f32.partialorder %v1662_v45, %v905_v9  ;;  %992 = vmax.xlane.f32.xlu1 %v991_v8  ;;  %v974_v10 = vsel %vm942_vm0, %v1668_v48, -inf  ;;  %v975_v11 = vsel %vm943_vm1, %v1672_v50, -inf }
 0x402   : > { %v1018_v12 = vmax.f32 %v974_v10, %v975_v11  ;;  %v972_v13 = vsel %vm940_vm2, %v1656_v42, -inf  ;;  %v973_v14 = vsel %vm941_vm3, %v1662_v45, -inf  ;;  %vm1062_vm0 = vcmp.gt.f32.partialorder %v1620_v24, 0.0 }
 0x403   : > { %v890_v15 = vpop.xlane.xlu0 %889  ;;  %v1015_v16 = vmax.f32 %v972_v13, %v973_v14  ;;  %vm1063_vm3 = vcmp.gt.f32.partialorder %v1624_v26, 0.0 }
 0x404   : > { %vm930_vm4 = vcmp.lt.f32.partialorder %v1690_v59, %v890_v15  ;;  %vm931_vm5 = vcmp.lt.f32.partialorder %v1694_v61, %v890_v15  ;;  %v887_v17 = vpop.xlane.xlu1 %886  ;;  %1019 = vmax.xlane.f32.xlu0 %v1018_v12 }
 0x405   : > { %vm928_vm6 = vcmp.lt.f32.partialorder %v1678_v53, %v887_v17  ;;  %vm929_vm7 = vcmp.lt.f32.partialorder %v1684_v56, %v887_v17  ;;  %1016 = vmax.xlane.f32.xlu1 %v1015_v16  ;;  %v962_v18 = vsel %vm930_vm4, %v1690_v59, -inf  ;;  %v963_v19 = vsel %vm931_vm5, %v1694_v61, -inf }
 0x406   : > { %v1000_v20 = vmax.f32 %v962_v18, %v963_v19  ;;  %v960_v21 = vsel %vm928_vm6, %v1678_v53, -inf  ;;  %v961_v22 = vsel %vm929_vm7, %v1684_v56, -inf  ;;  %vm1078_vm6 = vcmp.gt.f32.partialorder %v1622_v25, 0.0 }
 0x407   : > { %v914_v23 = vpop.xlane.xlu0 %913  ;;  %v997_v28 = vmax.f32 %v960_v21, %v961_v22 }
 0x408   : > { %vm946_vm8 = vcmp.lt.f32.partialorder %v1692_v60, %v914_v23  ;;  %vm947_vm9 = vcmp.lt.f32.partialorder %v1696_v62, %v914_v23  ;;  %v911_v33 = vpop.xlane.xlu1 %910  ;;  %1001 = vmax.xlane.f32.xlu0 %v1000_v20 }
 0x409   : > { %vm944_vm10 = vcmp.lt.f32.partialorder %v1680_v54, %v911_v33  ;;  %vm945_vm11 = vcmp.lt.f32.partialorder %v1686_v57, %v911_v33  ;;  %998 = vmax.xlane.f32.xlu1 %v997_v28  ;;  %v978_v34 = vsel %vm946_vm8, %v1692_v60, -inf  ;;  %v979_v39 = vsel %vm947_vm9, %v1696_v62, -inf }
 0x40a   : > { %v1024_v40 = vmax.f32 %v978_v34, %v979_v39  ;;  %v976_v43 = vsel %vm944_vm10, %v1680_v54, -inf  ;;  %v977_v46 = vsel %vm945_vm11, %v1686_v57, -inf  ;;  %vm1079_vm9 = vcmp.gt.f32.partialorder %v1626_v27, 0.0 }
 0x40b   : > { %v1021_v51 = vmax.f32 %v976_v43, %v977_v46 }
 0x40c   : > { %v893_v52 = vpop.xlane.xlu1 %892  ;;  %1025 = vmax.xlane.f32.xlu0 %v1024_v40 }
 0x40d   : > { %vm932_vm12 = vcmp.lt.f32.partialorder %v1702_v1, %v893_v52  ;;  %vm933_vm13 = vcmp.lt.f32.partialorder %v1708_v4, %v893_v52  ;;  %1022 = vmax.xlane.f32.xlu1 %v1021_v51 }
 0x40e   : > { %v964_v55 = vsel %vm932_vm12, %v1702_v1, -inf  ;;  %v965_v58 = vsel %vm933_vm13, %v1708_v4, -inf  ;;  %vm1066_vm12 = vcmp.gt.f32.partialorder %v1642_v35, 0.0 }
 0x40f   : > { %v1003_v63 = vmax.f32 %v964_v55, %v965_v58 }
 0x410   : > { %v917_v0 = vpop.xlane.xlu1 %916 }
 0x411   : > { %vm948_vm14 = vcmp.lt.f32.partialorder %v1704_v2, %v917_v0  ;;  %vm949_vm15 = vcmp.lt.f32.partialorder %v1712_v6, %v917_v0  ;;  %1004 = vmax.xlane.f32.xlu1 %v1003_v63 }
 0x412   : > { %v980_v3 = vsel %vm948_vm14, %v1704_v2, -inf  ;;  %v981_v5 = vsel %vm949_vm15, %v1712_v6, -inf  ;;  %vm1067_vm15 = vcmp.gt.f32.partialorder %v1646_v37, 0.0 }
 0x413   : > { %v1027_v7 = vmax.f32 %v980_v3, %v981_v5 }
 0x415   : > { %1028 = vmax.xlane.f32.xlu1 %v1027_v7 }
 0x479   : > { %v984_v8 = vpop.xlane.xlu0 %983 }
 0x47a   : > { %vm1030_vm1 = vcmp.ge.f32.partialorder %v1620_v24, %v984_v8  ;;  %vm1031_vm2 = vcmp.ge.f32.partialorder %v1624_v26, %v984_v8 }
 0x47b   : > { %vm1094_vm4 = vmand %vm1030_vm1, %vm1062_vm0 }
 0x47c   : > { %vm1095_vm5 = vmand %vm1031_vm2, %vm1063_vm3  ;;  %v1126_v9 = vsel %vm1094_vm4, %v1620_v24, 0.0  ;;  %vm1064_vm4 = vcmp.gt.f32.partialorder %v1630_v29, 0.0 }
 0x47d   : > { %v1127_v10 = vsel %vm1095_vm5, %v1624_v26, 0.0  ;;  %1158 = vst [vmem:[%s2049_s3] sm:$0xff] %v1126_v9  ;;  %v1008_v11 = vpop.xlane.xlu0 %1007  ;;  %vm1065_vm5 = vcmp.gt.f32.partialorder %v1634_v31, 0.0 }
 0x47e   : > { %1159 = vst [vmem:[%s2049_s3 + $0x8] sm:$0xff] %v1127_v10  ;;  %vm1046_vm7 = vcmp.ge.f32.partialorder %v1622_v25, %v1008_v11  ;;  %vm1047_vm8 = vcmp.ge.f32.partialorder %v1626_v27, %v1008_v11 }
 0x47f   : > { %vm1110_vm10 = vmand %vm1046_vm7, %vm1078_vm6 }
 0x480   : > { %vm1111_vm11 = vmand %vm1047_vm8, %vm1079_vm9  ;;  %v1142_v24 = vsel %vm1110_vm10, %v1622_v25, 0.0  ;;  %vm1082_vm8 = vcmp.gt.f32.partialorder %v1644_v36, 0.0 }
 0x481   : > { %v1143_v26 = vsel %vm1111_vm11, %v1626_v27, 0.0  ;;  %1174 = vst [vmem:[%s2049_s3 + $0x80] sm:$0xff] %v1142_v24  ;;  %v990_v12 = vpop.xlane.xlu0 %989  ;;  %vm1083_vm11 = vcmp.gt.f32.partialorder %v1648_v38, 0.0 }
 0x482   : > { %1175 = vst [vmem:[%s2049_s3 + $0x88] sm:$0xff] %v1143_v26  ;;  %vm1034_vm13 = vcmp.ge.f32.partialorder %v1642_v35, %v990_v12  ;;  %vm1035_vm14 = vcmp.ge.f32.partialorder %v1646_v37, %v990_v12  ;;  %v987_v13 = vpop.xlane.xlu1 %986 }
 0x483   : > { %vm1098_vm0 = vmand %vm1034_vm13, %vm1066_vm12  ;;  %vm1032_vm1 = vcmp.ge.f32.partialorder %v1630_v29, %v987_v13  ;;  %vm1033_vm2 = vcmp.ge.f32.partialorder %v1634_v31, %v987_v13 }
 0x484   : > { %vm1099_vm3 = vmand %vm1035_vm14, %vm1067_vm15  ;;  %v1130_v25 = vsel %vm1098_vm0, %v1642_v35, 0.0  ;;  %vm1080_vm0 = vcmp.gt.f32.partialorder %v1632_v30, 0.0 }
 0x485   : > { %v1131_v27 = vsel %vm1099_vm3, %v1646_v37, 0.0  ;;  %1162 = vst [vmem:[%s2049_s3 + $0x20] sm:$0xff] %v1130_v25  ;;  %vm1096_vm6 = vmand %vm1032_vm1, %vm1064_vm4  ;;  %v1014_v14 = vpop.xlane.xlu0 %1013  ;;  %vm1081_vm1 = vcmp.gt.f32.partialorder %v1636_v32, 0.0  ;;  %vm1070_vm4 = vcmp.gt.f32.partialorder %v1666_v47, 0.0 }
 0x486   : > { %1163 = vst [vmem:[%s2049_s3 + $0x28] sm:$0xff] %v1131_v27  ;;  %vm1097_vm7 = vmand %vm1033_vm2, %vm1065_vm5  ;;  %v1128_v15 = vsel %vm1096_vm6, %v1630_v29, 0.0  ;;  %vm1050_vm9 = vcmp.ge.f32.partialorder %v1644_v36, %v1014_v14  ;;  %vm1051_vm10 = vcmp.ge.f32.partialorder %v1648_v38, %v1014_v14  ;;  %v1011_v35 = vpop.xlane.xlu1 %1010 }
 0x487   : > { %v1129_v37 = vsel %vm1097_vm7, %v1634_v31, 0.0  ;;  %1160 = vst [vmem:[%s2049_s3 + $0x10] sm:$0xff] %v1128_v15  ;;  %vm1114_vm12 = vmand %vm1050_vm9, %vm1082_vm8  ;;  %vm1048_vm13 = vcmp.ge.f32.partialorder %v1632_v30, %v1011_v35  ;;  %vm1049_vm14 = vcmp.ge.f32.partialorder %v1636_v32, %v1011_v35  ;;  %vm1071_vm7 = vcmp.gt.f32.partialorder %v1670_v49, 0.0 }
 0x488   : > { %1161 = vst [vmem:[%s2049_s3 + $0x18] sm:$0xff] %v1129_v37  ;;  %vm1115_vm15 = vmand %vm1051_vm10, %vm1083_vm11  ;;  %v1146_v29 = vsel %vm1114_vm12, %v1644_v36, 0.0  ;;  %vm1068_vm12 = vcmp.gt.f32.partialorder %v1654_v41, 0.0 }
 0x489   : > { %v1147_v16 = vsel %vm1115_vm15, %v1648_v38, 0.0  ;;  %1178 = vst [vmem:[%s2049_s3 + $0xa0] sm:$0xff] %v1146_v29  ;;  %vm1112_vm2 = vmand %vm1048_vm13, %vm1080_vm0  ;;  %v996_v31 = vpop.xlane.xlu0 %995  ;;  %vm1069_vm13 = vcmp.gt.f32.partialorder %v1660_v44, 0.0  ;;  %vm1086_vm0 = vcmp.gt.f32.partialorder %v1668_v48, 0.0 }
 0x48a   : > { %1179 = vst [vmem:[%s2049_s3 + $0xa8] sm:$0xff] %v1147_v16  ;;  %vm1113_vm3 = vmand %vm1049_vm14, %vm1081_vm1  ;;  %v1144_v17 = vsel %vm1112_vm2, %v1632_v30, 0.0  ;;  %vm1038_vm5 = vcmp.ge.f32.partialorder %v1666_v47, %v996_v31  ;;  %vm1039_vm6 = vcmp.ge.f32.partialorder %v1670_v49, %v996_v31  ;;  %v993_v36 = vpop.xlane.xlu1 %992 }
 0x48b   : > { %v1145_v38 = vsel %vm1113_vm3, %v1636_v32, 0.0  ;;  %1176 = vst [vmem:[%s2049_s3 + $0x90] sm:$0xff] %v1144_v17  ;;  %vm1102_vm8 = vmand %vm1038_vm5, %vm1070_vm4  ;;  %vm1036_vm9 = vcmp.ge.f32.partialorder %v1654_v41, %v993_v36  ;;  %vm1037_vm10 = vcmp.ge.f32.partialorder %v1660_v44, %v993_v36  ;;  %vm1087_vm3 = vcmp.gt.f32.partialorder %v1672_v50, 0.0 }
 0x48c   : > { %1177 = vst [vmem:[%s2049_s3 + $0x98] sm:$0xff] %v1145_v38  ;;  %vm1103_vm11 = vmand %vm1039_vm6, %vm1071_vm7  ;;  %v1134_v30 = vsel %vm1102_vm8, %v1666_v47, 0.0  ;;  %vm1084_vm8 = vcmp.gt.f32.partialorder %v1656_v42, 0.0 }
 0x48d   : > { %v1135_v18 = vsel %vm1103_vm11, %v1670_v49, 0.0  ;;  %1166 = vst [vmem:[%s2049_s3 + $0x40] sm:$0xff] %v1134_v30  ;;  %vm1100_vm14 = vmand %vm1036_vm9, %vm1068_vm12  ;;  %v1020_v32 = vpop.xlane.xlu0 %1019  ;;  %vm1085_vm9 = vcmp.gt.f32.partialorder %v1662_v45, 0.0  ;;  %vm1074_vm12 = vcmp.gt.f32.partialorder %v1690_v59, 0.0 }
 0x48e   : > { %1167 = vst [vmem:[%s2049_s3 + $0x48] sm:$0xff] %v1135_v18  ;;  %vm1101_vm15 = vmand %vm1037_vm10, %vm1069_vm13  ;;  %v1132_v19 = vsel %vm1100_vm14, %v1654_v41, 0.0  ;;  %vm1054_vm1 = vcmp.ge.f32.partialorder %v1668_v48, %v1020_v32  ;;  %vm1055_vm2 = vcmp.ge.f32.partialorder %v1672_v50, %v1020_v32  ;;  %v1017_v47 = vpop.xlane.xlu1 %1016 }
 0x48f   : > { %v1133_v49 = vsel %vm1101_vm15, %v1660_v44, 0.0  ;;  %1164 = vst [vmem:[%s2049_s3 + $0x30] sm:$0xff] %v1132_v19  ;;  %vm1118_vm4 = vmand %vm1054_vm1, %vm1086_vm0  ;;  %vm1052_vm5 = vcmp.ge.f32.partialorder %v1656_v42, %v1017_v47  ;;  %vm1053_vm6 = vcmp.ge.f32.partialorder %v1662_v45, %v1017_v47  ;;  %vm1075_vm15 = vcmp.gt.f32.partialorder %v1694_v61, 0.0 }
 0x490   : > { %1165 = vst [vmem:[%s2049_s3 + $0x38] sm:$0xff] %v1133_v49  ;;  %vm1119_vm7 = vmand %vm1055_vm2, %vm1087_vm3  ;;  %v1150_v41 = vsel %vm1118_vm4, %v1668_v48, 0.0  ;;  %vm1072_vm4 = vcmp.gt.f32.partialorder %v1678_v53, 0.0 }
 0x491   : > { %v1151_v20 = vsel %vm1119_vm7, %v1672_v50, 0.0  ;;  %1182 = vst [vmem:[%s2049_s3 + $0xc0] sm:$0xff] %v1150_v41  ;;  %vm1116_vm10 = vmand %vm1052_vm5, %vm1084_vm8  ;;  %v1002_v44 = vpop.xlane.xlu0 %1001  ;;  %vm1073_vm5 = vcmp.gt.f32.partialorder %v1684_v56, 0.0  ;;  %vm1090_vm8 = vcmp.gt.f32.partialorder %v1692_v60, 0.0 }
 0x492   : > { %1183 = vst [vmem:[%s2049_s3 + $0xc8] sm:$0xff] %v1151_v20  ;;  %vm1117_vm11 = vmand %vm1053_vm6, %vm1085_vm9  ;;  %v1148_v21 = vsel %vm1116_vm10, %v1656_v42, 0.0  ;;  %vm1042_vm13 = vcmp.ge.f32.partialorder %v1690_v59, %v1002_v44  ;;  %vm1043_vm14 = vcmp.ge.f32.partialorder %v1694_v61, %v1002_v44  ;;  %v999_v48 = vpop.xlane.xlu1 %998 }
 0x493   : > { %v1149_v50 = vsel %vm1117_vm11, %v1662_v45, 0.0  ;;  %1180 = vst [vmem:[%s2049_s3 + $0xb0] sm:$0xff] %v1148_v21  ;;  %vm1106_vm0 = vmand %vm1042_vm13, %vm1074_vm12  ;;  %vm1040_vm1 = vcmp.ge.f32.partialorder %v1678_v53, %v999_v48  ;;  %vm1041_vm2 = vcmp.ge.f32.partialorder %v1684_v56, %v999_v48  ;;  %vm1091_vm11 = vcmp.gt.f32.partialorder %v1696_v62, 0.0 }
 0x494   : > { %1181 = vst [vmem:[%s2049_s3 + $0xb8] sm:$0xff] %v1149_v50  ;;  %vm1107_vm3 = vmand %vm1043_vm14, %vm1075_vm15  ;;  %v1138_v42 = vsel %vm1106_vm0, %v1690_v59, 0.0  ;;  %vm1088_vm0 = vcmp.gt.f32.partialorder %v1680_v54, 0.0 }
 0x495   : > { %v1139_v22 = vsel %vm1107_vm3, %v1694_v61, 0.0  ;;  %1170 = vst [vmem:[%s2049_s3 + $0x60] sm:$0xff] %v1138_v42  ;;  %vm1104_vm6 = vmand %vm1040_vm1, %vm1072_vm4  ;;  %v1026_v45 = vpop.xlane.xlu0 %1025  ;;  %vm1089_vm1 = vcmp.gt.f32.partialorder %v1686_v57, 0.0  ;;  %vm1076_vm4 = vcmp.gt.f32.partialorder %v1702_v1, 0.0 }
 0x496   : > { %1171 = vst [vmem:[%s2049_s3 + $0x68] sm:$0xff] %v1139_v22  ;;  %vm1105_vm7 = vmand %vm1041_vm2, %vm1073_vm5  ;;  %v1136_v23 = vsel %vm1104_vm6, %v1678_v53, 0.0  ;;  %vm1058_vm9 = vcmp.ge.f32.partialorder %v1692_v60, %v1026_v45  ;;  %vm1059_vm10 = vcmp.ge.f32.partialorder %v1696_v62, %v1026_v45  ;;  %v1023_v59 = vpop.xlane.xlu1 %1022 }
 0x497   : > { %v1137_v61 = vsel %vm1105_vm7, %v1684_v56, 0.0  ;;  %1168 = vst [vmem:[%s2049_s3 + $0x50] sm:$0xff] %v1136_v23  ;;  %vm1122_vm12 = vmand %vm1058_vm9, %vm1090_vm8  ;;  %vm1056_vm13 = vcmp.ge.f32.partialorder %v1680_v54, %v1023_v59  ;;  %vm1057_vm14 = vcmp.ge.f32.partialorder %v1686_v57, %v1023_v59  ;;  %vm1077_vm7 = vcmp.gt.f32.partialorder %v1708_v4, 0.0 }
 0x498   : > { %1169 = vst [vmem:[%s2049_s3 + $0x58] sm:$0xff] %v1137_v61  ;;  %vm1123_vm15 = vmand %vm1059_vm10, %vm1091_vm11  ;;  %v1154_v53 = vsel %vm1122_vm12, %v1692_v60, 0.0  ;;  %vm1092_vm10 = vcmp.gt.f32.partialorder %v1704_v2, 0.0 }
 0x499   : > { %v1155_v28 = vsel %vm1123_vm15, %v1696_v62, 0.0  ;;  %1186 = vst [vmem:[%s2049_s3 + $0xe0] sm:$0xff] %v1154_v53  ;;  %vm1120_vm2 = vmand %vm1056_vm13, %vm1088_vm0  ;;  %vm1093_vm13 = vcmp.gt.f32.partialorder %v1712_v6, 0.0 }
 0x49a   : > { %1187 = vst [vmem:[%s2049_s3 + $0xe8] sm:$0xff] %v1155_v28  ;;  %vm1121_vm3 = vmand %vm1057_vm14, %vm1089_vm1  ;;  %v1152_v56 = vsel %vm1120_vm2, %v1680_v54, 0.0  ;;  %v1005_v33 = vpop.xlane.xlu1 %1004 }
 0x49b   : > { %v1153_v34 = vsel %vm1121_vm3, %v1686_v57, 0.0  ;;  %1184 = vst [vmem:[%s2049_s3 + $0xd0] sm:$0xff] %v1152_v56  ;;  %vm1044_vm5 = vcmp.ge.f32.partialorder %v1702_v1, %v1005_v33  ;;  %vm1045_vm6 = vcmp.ge.f32.partialorder %v1708_v4, %v1005_v33 }
 0x49c   : > { %1185 = vst [vmem:[%s2049_s3 + $0xd8] sm:$0xff] %v1153_v34  ;;  %vm1108_vm8 = vmand %vm1044_vm5, %vm1076_vm4 }
 0x49d   : > { %vm1109_vm9 = vmand %vm1045_vm6, %vm1077_vm7  ;;  %v1140_v60 = vsel %vm1108_vm8, %v1702_v1, 0.0 }
 0x49e   : > { %v1141_v54 = vsel %vm1109_vm9, %v1708_v4, 0.0  ;;  %1172 = vst [vmem:[%s2049_s3 + $0x70] sm:$0xff] %v1140_v60  ;;  %v1029_v57 = vpop.xlane.xlu1 %1028 }
 0x49f   : > { %1173 = vst [vmem:[%s2049_s3 + $0x78] sm:$0xff] %v1141_v54  ;;  %vm1060_vm11 = vcmp.ge.f32.partialorder %v1704_v2, %v1029_v57  ;;  %vm1061_vm12 = vcmp.ge.f32.partialorder %v1712_v6, %v1029_v57 }
 0x4a0   : > { %vm1124_vm14 = vmand %vm1060_vm11, %vm1092_vm10 }
 0x4a1   : > { %vm1125_vm15 = vmand %vm1061_vm12, %vm1093_vm13  ;;  %v1156_v62 = vsel %vm1124_vm14, %v1704_v2, 0.0 }
 0x4a2   : > { %v1157_v1 = vsel %vm1125_vm15, %v1712_v6, 0.0  ;;  %1188 = vst [vmem:[%s2049_s3 + $0xf0] sm:$0xff] %v1156_v62 }
 0x4a3   : > { %1189 = vst [vmem:[%s2049_s3 + $0xf8] sm:$0xff] %v1157_v1 }
 0x4a4   : > { %1474 = shalt.err (!%p1471_p13)
}
 0x4a5   : > { %s1475_s22 = scalar_lea.hbm %s2174_s13, 4096  ;;  %s1479_s25 = scalar_lea.hbm %s2225_s1, 8192 }
 0x4a6   : > { %p1476_p0 = scmp.ne.s32.totalorder %s2174_s13, %s1475_s22  ;;  %p1480_p3 = scmp.lt.s32.totalorder %s2174_s13, %s2225_s1 }
 0x4a7   : > { %p1481_p4 = scmp.lt.s32.totalorder %s1479_s25, %s1475_s22 }
 0x4a8   : > { %p1477_p1 = pnand %p1476_p0, %p1581_p5 }
 0x4a9   : > { %p1482_p7 = por %p1481_p4, %p1480_p3 }
 0x4aa   : > { %p1478_p2 = pneg %p1477_p1 }
 0x4ac   : > { %p1483_p6 = pnand %p1482_p7, %p1478_p2 }
 0x4ae   : > { %1486 = shalt.err (!%p1483_p6)
}
 0x4af   : > { %s1531_s28 = smov 256   ;;  %s1532_s29 = smov 16  }
 0x4b0   : > { %1361 = dma.vmem_to_hbm [thread:$0]  (%p1581_p5), %s2176_s5, 4096, %s2174_s13, %s2184_s14, %s1531_s28, %s1531_s28, %s1532_s29  }
 0x4b1 PF: > { %p1373_p8 = scmp.ge.s32.totalorder %s1525_s9, 2  ;;  %s1220_s30 = sand.u32 1, %s1513_s6  }
 0x4b2   : > { %p2229_p9 = scmp.ne.s32.totalorder %s2227_s17, 0  ;;  %s1221_s2 = scalar_lea.sflag [#allocation4], %s1220_s30 }
 0x4b4   : > { %p1368_p10 = pnand %p1373_p8, %p2229_p9 }
 0x4b6   : > { %p1369_p11 = pneg %p1368_p10 }
 0x4b8   : > { %1508 = dma.done.wait (%p1369_p11), %s1221_s2, 4096  }
 0x4b9   : > { %1510 = vsyncadd (%p1369_p11), %s1221_s2, 4294963200  ;;  %p12_p12 = scmp.ge.s32.totalorder %s1568_s12, 4   ;;  %s2230_s6 = smov %s1517_s7 }
 0x4ba   : > { %s2231_s7 = smov %s1521_s8  ;;  %s2232_s8 = smov %s1579_s15 }
 0x4bb   : > { %s2233_s9 = smov %s1568_s12  ;;  %14 = sbr.rel (!%p12_p12) target bundleno = 4 (0x4), region = 62 }
 0x4c0   :  { %1226 = vsyncpa [#allocation3], 1 }
 0x4c1   :  { %1228 = vsyncpa [#allocation3 + $0x1], 1 }
 0x4c2   :  { %1229 = vsyncpa [#allocation4], 1 }
 0x4c3   :  { %1231 = vsyncpa [#allocation4 + $0x1], 1 }

// kernel: tpu_custom_call.1
= control target key start
LH: loop header
LB: loop body
LE: loop exit
PB: predicated region body
PF: predicated region fallthrough
CT: control target
= control target key end

     0   :  { %6 = vsyncpa [#allocation3], 0  ;;  %s2224_s0 = inlined_call_operand.hbm [shape: bf16[256,128], index: 0, kind: input, shape index: {}]   ;;  %s2225_s1 = inlined_call_operand.hbm [shape: f32[256,256], index: 1, kind: output, shape index: {}]  }
   0x1   :  { %7 = vsyncpa [#allocation4], 0 }
   0x2   :  { %9 = vsyncpa [#allocation4 + $0x1], 0  ;;  %s1543_s6 = smov 0   ;;  %s1545_s7 = smov 0  }
   0x3   :  { %s1547_s8 = smov 0   ;;  %s1549_s9 = smov 0  }
   0x4 LB: > { %s1564_s10 = sadd.s32 4294967295, %s1525_s9   ;;  %s1269_s11 = sadd.s32 4294967294, %s1525_s9   ;;  %s1525_s9 = sphi %s1549_s9, %s2233_s9   ;;  %s1521_s8 = sphi %s1547_s8, %s2232_s8   ;;  %s1517_s7 = sphi %s1545_s7, %s2231_s7   ;;  %s1513_s6 = sphi %s1543_s6, %s2230_s6  }
   0x5   : > { %s1568_s12 = sadd.s32 1, %s1525_s9   ;;  %s43_s13 = sadd.s32 1, %s1521_s8 }
   0x6   : > { %s40_s14 = ssub.s32 %s1525_s9, %s1568_s12  ;;  %p53_p0 = scmp.ne.s32.totalorder %s1521_s8, %s1517_s7 }
   0x7   : > { %p41_p1 = scmp.eq.s32.totalorder %s40_s14, 0  ;;  %p54_p2 = scmp.eq.s32.totalorder %s1564_s10, 1 }
   0x8   : > { %p59_p3 = scmp.ne.s32.totalorder %s1517_s7, %s1513_s6  ;;  %p60_p4 = scmp.eq.s32.totalorder %s1269_s11, 1 }
   0x9   : > { %s1579_s15 = scalar_select %p41_p1, %s1521_s8, %s43_s13  }
   0xa   : > { %p1581_p5 = por %p54_p2, %p53_p0  ;;  %p1585_p6 = por %p60_p4, %p59_p3 }
   0xb   : > { %p1270_p7 = scmp.ge.s32.totalorder %s1525_s9, 1  ;;  %p67_p8 = scmp.lt.s32.totalorder %s1525_s9, 3 }
   0xc   : > { %s2227_s17 = scalar_select %p1585_p6, 1, 0 }
   0xd   : > { %p1371_p9 = scmp.eq.s32.totalorder %s1564_s10, 0  ;;  %p1592_p10 = pnand %p1270_p7, %p67_p8 }
   0xe   : > { %s1527_s19 = smov [#allocation2]  }
   0xf   : > { %s79_s20 = sshll.u32 %s1527_s19, 4  ;;  %p1363_p11 = pneg %p1592_p10  ;;  %s80_s20 = int_to_ptr.vmem [resolvable:$true] %s79_s20 }
  0x10   : > { %s1446_s21 = scalar_lea.vmem %s80_s20, 2048  ;;  %p1454_p3 = scmp.lt.s32.totalorder %s80_s20, %s80_s20 }
  0x11   : > { %p1364_p12 = pnand %p1371_p9, %p1363_p11  ;;  %p1447_p0 = scmp.ne.s32.totalorder %s80_s20, %s1446_s21 }
  0x12   : > { %p1455_p4 = scmp.lt.s32.totalorder %s1446_s21, %s1446_s21 }
  0x13   : > { %p1437_p13 = pneg %p1364_p12 }
  0x14   : > { %p1456_p6 = por %p1455_p4, %p1454_p3 }
  0x15   : > { %p1449_p1 = pnand %p1447_p0, %p1437_p13 }
  0x17   : > { %p1450_p2 = pneg %p1449_p1 }
  0x19   : > { %p1457_p7 = pnand %p1456_p6, %p1450_p2 }
  0x1b   : > { %1460 = shalt.err (!%p1457_p7)
}
  0x1c   : > { %s1528_s22 = smov 64   ;;  %s1529_s23 = smov 4  }
  0x1d   : > { %1366 = dma.hbm_to_vmem [thread:$0]  (!%p1364_p12), %s2224_s0, 2048, %s80_s20, [#allocation3], %s1528_s22, %s1528_s22, %s1529_s23  }
  0x1e   : > { %95 = sbr.rel (%p1592_p10) target bundleno = 1201 (0x4b1), region = 24 }
  0x23   : > { %1504 = dma.done.wait (%p1371_p9), [#allocation3], 2048  }
  0x24   : > { %1506 = vsyncadd (%p1371_p9), [#allocation3], 4294965248  ;;  %v1411_v0 = vld [vmem:[#allocation2 + $0x78] sm:$0xff]   ;;  %v1413_v2 = vld [vmem:[#allocation2 + $0x70] sm:$0xff]   ;;  %s1275_s26 = sshll.u32 %s1564_s10, 7  ;;  %s107_s30 = sand.u32 1, %s1517_s7  }
  0x25   : > { %v1412_v1 = vld [vmem:[#allocation2 + $0x38] sm:$0xff]   ;;  %1309 = vmatprep.subr.bf16.mxu0 %v1411_v0  ;;  %1341 = vmatprep.subr.bf16.mxu1 %v1411_v0  ;;  %v1414_v3 = vld [vmem:[#allocation2 + $0x30] sm:$0xff]   ;;  %s113_s27 = sshra.s32 %s1275_s26, 3  ;;  %v1415_v4 = vld [vmem:[#allocation2 + $0x68] sm:$0xff]   ;;  %s1274_s2 = sshll.u32 %s107_s30, 8 }
  0x26   : > { %1310 = vmatpush3.bf16.xpose.msra.mxu0 %v1412_v1  ;;  %1349 = vmatpush3.bf16.xpose.msra.mxu1 %v1412_v1  ;;  %s1276_s28 = sshll.u32 %s113_s27, 2  ;;  %v1416_v5 = vld [vmem:[#allocation2 + $0x28] sm:$0xff]   ;;  %v1417_v6 = vld [vmem:[#allocation2 + $0x60] sm:$0xff]   ;;  %v1419_v10 = vld [vmem:[#allocation2 + $0x58] sm:$0xff]   ;;  %s2049_s3 = scalar_lea.vmem [#allocation5], %s1274_s2 }
  0x27   : > { %1311 = vmatprep.subr.bf16.mxu0 %v1413_v2  ;;  %1342 = vmatprep.subr.bf16.mxu1 %v1413_v2  ;;  %s1610_s29 = scalar_lea.vmem [#allocation2], %s1276_s28  ;;  %v1418_v9 = vld [vmem:[#allocation2 + $0x20] sm:$0xff]   ;;  %v1420_v11 = vld [vmem:[#allocation2 + $0x18] sm:$0xff]   ;;  %v1421_v12 = vld [vmem:[#allocation2 + $0x50] sm:$0xff]   ;;  %s1308_s4 = sshll.u32 %s1564_s10, 12 }
  0x28   : > { %v1427_v7 = vld [vmem:[%s1610_s29] sm:$0xff]   ;;  %v1422_v13 = vld [vmem:[#allocation2 + $0x10] sm:$0xff]   ;;  %v1423_v14 = vld [vmem:[#allocation2 + $0x48] sm:$0xff]   ;;  %s1205_s5 = sshll.u32 %s2049_s3, 4  ;;  %s2174_s13 = scalar_lea.hbm %s2225_s1, %s1308_s4  ;;  %s2176_s5 = int_to_ptr.vmem [resolvable:$true] %s1205_s5 }
  0x29   : > { %v1428_v8 = vld [vmem:[%s1610_s29 + $0x20] sm:$0xff]   ;;  %1325 = vmatprep.mubr.bf16.mxu0 %v1427_v7  ;;  %v1424_v15 = vld [vmem:[#allocation2 + $0x8] sm:$0xff]   ;;  %v1431_v20 = vld [vmem:[%s1610_s29 + $0x10] sm:$0xff]   ;;  %s2184_s14 = scalar_lea.sflag [#allocation4], %s107_s30  ;;  %s1461_s18 = scalar_lea.vmem %s2176_s5, 4096 }
  0x2a   : > { %1333 = vmatprep.mubr.bf16.mxu1 %v1428_v8  ;;  %v1425_v16 = vld [vmem:[#allocation2 + $0x40] sm:$0xff]   ;;  %v1429_v18 = vld [vmem:[%s1610_s29 + $0x8] sm:$0xff]   ;;  %v1432_v21 = vld [vmem:[%s1610_s29 + $0x30] sm:$0xff]   ;;  %p1462_p6 = scmp.ne.s32.totalorder %s2176_s5, %s1461_s18  ;;  %s1530_s19 = smov [#allocation5]  }
  0x2b   : > { %v1426_v17 = vld [vmem:[#allocation2] sm:$0xff]   ;;  %v1430_v19 = vld [vmem:[%s1610_s29 + $0x28] sm:$0xff]   ;;  %v1433_v22 = vld [vmem:[%s1610_s29 + $0x18] sm:$0xff]   ;;  %s1465_s20 = sshll.u32 %s1530_s19, 4  ;;  %s1466_s20 = int_to_ptr.vmem [resolvable:$false] %s1465_s20 }
  0x2c   : > { %v1434_v23 = vld [vmem:[%s1610_s29 + $0x38] sm:$0xff]   ;;  %p1463_p8 = pnand %p1462_p6, %p1581_p5  ;;  %s1467_s21 = scalar_lea.vmem %s1466_s20, 8192 }
  0x2d   : > { %p1468_p10 = scmp.lt.s32.totalorder %s2176_s5, %s1466_s20  ;;  %p1469_p11 = scmp.lt.s32.totalorder %s1467_s21, %s1461_s18 }
  0x2e   : > { %1312 = vmatpush3.bf16.xpose.msra.mxu0 %v1414_v3  ;;  %1350 = vmatpush3.bf16.xpose.msra.mxu1 %v1414_v3  ;;  %p1464_p9 = pneg %p1463_p8 }
  0x2f   : > { %1313 = vmatprep.subr.bf16.mxu0 %v1415_v4  ;;  %1343 = vmatprep.subr.bf16.mxu1 %v1415_v4  ;;  %p1470_p12 = por %p1469_p11, %p1468_p10 }
  0x31   : > { %p1471_p13 = pnand %p1470_p12, %p1464_p9 }
  0x36   : > { %1314 = vmatpush3.bf16.xpose.msra.mxu0 %v1416_v5  ;;  %1351 = vmatpush3.bf16.xpose.msra.mxu1 %v1416_v5 }
  0x37   : > { %1315 = vmatprep.subr.bf16.mxu0 %v1417_v6  ;;  %1344 = vmatprep.subr.bf16.mxu1 %v1417_v6 }
  0x3e   : > { %1316 = vmatpush3.bf16.xpose.msra.mxu0 %v1418_v9  ;;  %1352 = vmatpush3.bf16.xpose.msra.mxu1 %v1418_v9 }
  0x3f   : > { %1317 = vmatprep.subr.bf16.mxu0 %v1419_v10  ;;  %1345 = vmatprep.subr.bf16.mxu1 %v1419_v10 }
  0x46   : > { %1318 = vmatpush3.bf16.xpose.msra.mxu0 %v1420_v11  ;;  %1353 = vmatpush3.bf16.xpose.msra.mxu1 %v1420_v11 }
  0x47   : > { %1319 = vmatprep.subr.bf16.mxu0 %v1421_v12  ;;  %1346 = vmatprep.subr.bf16.mxu1 %v1421_v12 }
  0x4e   : > { %1320 = vmatpush3.bf16.xpose.msra.mxu0 %v1422_v13  ;;  %1354 = vmatpush3.bf16.xpose.msra.mxu1 %v1422_v13 }
  0x4f   : > { %1321 = vmatprep.subr.bf16.mxu0 %v1423_v14  ;;  %1347 = vmatprep.subr.bf16.mxu1 %v1423_v14 }
  0x56   : > { %1322 = vmatpush3.bf16.xpose.msra.mxu0 %v1424_v15  ;;  %1355 = vmatpush3.bf16.xpose.msra.mxu1 %v1424_v15 }
  0x57   : > { %1323 = vmatprep.subr.bf16.mxu0 %v1425_v16  ;;  %1348 = vmatprep.subr.bf16.mxu1 %v1425_v16 }
  0x5e   : > { %1324 = vmatpush3.bf16.xpose.msra.mxu0 %v1426_v17  ;;  %1356 = vmatpush3.bf16.xpose.msra.mxu1 %v1426_v17 }
  0x65   : > { %1326 = vmatmul.mubr.bf16.vlgmr.msra.gmra.mxu0 %v1427_v7  ;;  %1334 = vmatmul.mubr.bf16.vlgmr.msra.gmra.mxu1 %v1428_v8 }
  0x66   : > { %1327 = vmatprep.mubr.bf16.mxu0 %v1429_v18  ;;  %1335 = vmatprep.mubr.bf16.mxu1 %v1430_v19 }
  0x6d   : > { %1328 = vmatmul.mubr.bf16.gmra.mxu0 %v1429_v18  ;;  %1336 = vmatmul.mubr.bf16.gmra.mxu1 %v1430_v19 }
  0x6e   : > { %1329 = vmatprep.mubr.bf16.mxu0 %v1431_v20  ;;  %1337 = vmatprep.mubr.bf16.mxu1 %v1432_v21 }
  0x75   : > { %1330 = vmatmul.mubr.bf16.gmra.mxu0 %v1431_v20  ;;  %1338 = vmatmul.mubr.bf16.gmra.mxu1 %v1432_v21 }
  0x76   : > { %1331 = vmatprep.mubr.bf16.mxu0 %v1433_v22  ;;  %1339 = vmatprep.mubr.bf16.mxu1 %v1434_v23 }
  0x7d   : > { %1332 = vmatmul.mubr.bf16.gmra.mxu0 %v1433_v22  ;;  %1340 = vmatmul.mubr.bf16.gmra.mxu1 %v1434_v23 }
 0x125   : > { %v1620_v24 = vpop.f32.mrf.mxu0  ;;  %v1622_v25 = vpop.f32.mrf.mxu1 }
 0x127   : > { %v1624_v26 = vpop.f32.mrf.mxu0  ;;  %v1626_v27 = vpop.f32.mrf.mxu1 }
 0x128   : > { %v422_v28 = vmax.f32 %v1620_v24, %v1624_v26  ;;  %v446_v34 = vmax.f32 %v1622_v25, %v1626_v27 }
 0x129   : > { %v1630_v29 = vpop.f32.mrf.mxu0  ;;  %v1632_v30 = vpop.f32.mrf.mxu1 }
 0x12a   : > { %423 = vmax.xlane.f32.xlu0 %v422_v28 }
 0x12b   : > { %v1634_v31 = vpop.f32.mrf.mxu0  ;;  %v1636_v32 = vpop.f32.mrf.mxu1 }
 0x12c   : > { %v449_v33 = vmax.f32 %v1632_v30, %v1636_v32  ;;  %v425_v39 = vmax.f32 %v1630_v29, %v1634_v31 }
 0x12d   : > { %v1642_v35 = vpop.f32.mrf.mxu0  ;;  %v1644_v36 = vpop.f32.mrf.mxu1 }
 0x12e   : > { %450 = vmax.xlane.f32.xlu1 %v449_v33  ;;  %447 = vmax.xlane.f32.xlu0 %v446_v34 }
 0x12f   : > { %v1646_v37 = vpop.f32.mrf.mxu0  ;;  %v1648_v38 = vpop.f32.mrf.mxu1 }
 0x130   : > { %v428_v40 = vmax.f32 %v1642_v35, %v1646_v37  ;;  %v452_v43 = vmax.f32 %v1644_v36, %v1648_v38 }
 0x131   : > { %v1654_v41 = vpop.f32.mrf.mxu0  ;;  %v1656_v42 = vpop.f32.mrf.mxu1 }
 0x132   : > { %426 = vmax.xlane.f32.xlu0 %v425_v39  ;;  %429 = vmax.xlane.f32.xlu1 %v428_v40 }
 0x133   : > { %v1660_v44 = vpop.f32.mrf.mxu0  ;;  %v1662_v45 = vpop.f32.mrf.mxu1 }
 0x134   : > { %v431_v46 = vmax.f32 %v1654_v41, %v1660_v44  ;;  %v455_v51 = vmax.f32 %v1656_v42, %v1662_v45 }
 0x135   : > { %v1666_v47 = vpop.f32.mrf.mxu0  ;;  %v1668_v48 = vpop.f32.mrf.mxu1 }
 0x136   : > { %453 = vmax.xlane.f32.xlu0 %v452_v43  ;;  %432 = vmax.xlane.f32.xlu1 %v431_v46 }
 0x137   : > { %v1670_v49 = vpop.f32.mrf.mxu0  ;;  %v1672_v50 = vpop.f32.mrf.mxu1 }
 0x138   : > { %v434_v52 = vmax.f32 %v1666_v47, %v1670_v49  ;;  %v458_v55 = vmax.f32 %v1668_v48, %v1672_v50 }
 0x139   : > { %v1678_v53 = vpop.f32.mrf.mxu0  ;;  %v1680_v54 = vpop.f32.mrf.mxu1 }
 0x13a   : > { %456 = vmax.xlane.f32.xlu1 %v455_v51  ;;  %435 = vmax.xlane.f32.xlu0 %v434_v52 }
 0x13b   : > { %v1684_v56 = vpop.f32.mrf.mxu0  ;;  %v1686_v57 = vpop.f32.mrf.mxu1 }
 0x13c   : > { %v437_v58 = vmax.f32 %v1678_v53, %v1684_v56  ;;  %v461_v63 = vmax.f32 %v1680_v54, %v1686_v57 }
 0x13d   : > { %v1690_v59 = vpop.f32.mrf.mxu0  ;;  %v1692_v60 = vpop.f32.mrf.mxu1 }
 0x13e   : > { %459 = vmax.xlane.f32.xlu0 %v458_v55  ;;  %438 = vmax.xlane.f32.xlu1 %v437_v58 }
 0x13f   : > { %v1694_v61 = vpop.f32.mrf.mxu0  ;;  %v1696_v62 = vpop.f32.mrf.mxu1 }
 0x140   : > { %v440_v0 = vmax.f32 %v1690_v59, %v1694_v61  ;;  %v464_v3 = vmax.f32 %v1692_v60, %v1696_v62 }
 0x141   : > { %v1702_v1 = vpop.f32.mrf.mxu0  ;;  %v1704_v2 = vpop.f32.mrf.mxu1 }
 0x142   : > { %462 = vmax.xlane.f32.xlu1 %v461_v63  ;;  %441 = vmax.xlane.f32.xlu0 %v440_v0 }
 0x143   : > { %v1708_v4 = vpop.f32.mrf.mxu0  ;;  %v1712_v6 = vpop.f32.mrf.mxu1 }
 0x144   : > { %v443_v5 = vmax.f32 %v1702_v1, %v1708_v4  ;;  %v467_v7 = vmax.f32 %v1704_v2, %v1712_v6 }
 0x146   : > { %465 = vmax.xlane.f32.xlu0 %v464_v3  ;;  %444 = vmax.xlane.f32.xlu1 %v443_v5 }
 0x14a   : > { %468 = vmax.xlane.f32.xlu1 %v467_v7 }
 0x1b3   : > { %v424_v8 = vpop.xlane.xlu0 %423 }
 0x1b4   : > { %vm470_vm0 = vcmp.lt.f32.partialorder %v1620_v24, %v424_v8  ;;  %vm471_vm1 = vcmp.lt.f32.partialorder %v1624_v26, %v424_v8 }
 0x1b5   : > { %v502_v9 = vsel %vm470_vm0, %v1620_v24, -inf  ;;  %v503_v10 = vsel %vm471_vm1, %v1624_v26, -inf }
 0x1b6   : > { %v534_v11 = vmax.f32 %v502_v9, %v503_v10 }
 0x1b7   : > { %v451_v12 = vpop.xlane.xlu1 %450  ;;  %v448_v13 = vpop.xlane.xlu0 %447 }
 0x1b8   : > { %vm486_vm2 = vcmp.lt.f32.partialorder %v1622_v25, %v448_v13  ;;  %vm487_vm3 = vcmp.lt.f32.partialorder %v1626_v27, %v448_v13  ;;  %535 = vmax.xlane.f32.xlu0 %v534_v11  ;;  %vm488_vm4 = vcmp.lt.f32.partialorder %v1632_v30, %v451_v12  ;;  %vm489_vm5 = vcmp.lt.f32.partialorder %v1636_v32, %v451_v12 }
 0x1b9   : > { %v518_v14 = vsel %vm486_vm2, %v1622_v25, -inf  ;;  %v519_v15 = vsel %vm487_vm3, %v1626_v27, -inf  ;;  %v520_v39 = vsel %vm488_vm4, %v1632_v30, -inf  ;;  %v521_v40 = vsel %vm489_vm5, %v1636_v32, -inf }
 0x1ba   : > { %v558_v16 = vmax.f32 %v518_v14, %v519_v15  ;;  %v561_v58 = vmax.f32 %v520_v39, %v521_v40 }
 0x1bb   : > { %v427_v17 = vpop.xlane.xlu0 %426  ;;  %v430_v18 = vpop.xlane.xlu1 %429 }
 0x1bc   : > { %vm472_vm6 = vcmp.lt.f32.partialorder %v1630_v29, %v427_v17  ;;  %vm473_vm7 = vcmp.lt.f32.partialorder %v1634_v31, %v427_v17  ;;  %vm474_vm8 = vcmp.lt.f32.partialorder %v1642_v35, %v430_v18  ;;  %vm475_vm9 = vcmp.lt.f32.partialorder %v1646_v37, %v430_v18  ;;  %559 = vmax.xlane.f32.xlu0 %v558_v16 }
 0x1bd   : > { %v506_v19 = vsel %vm474_vm8, %v1642_v35, -inf  ;;  %v507_v20 = vsel %vm475_vm9, %v1646_v37, -inf  ;;  %v504_v21 = vsel %vm472_vm6, %v1630_v29, -inf  ;;  %v505_v22 = vsel %vm473_vm7, %v1634_v31, -inf }
 0x1be   : > { %v540_v23 = vmax.f32 %v506_v19, %v507_v20  ;;  %v537_v28 = vmax.f32 %v504_v21, %v505_v22 }
 0x1bf   : > { %v454_v33 = vpop.xlane.xlu0 %453  ;;  %v433_v34 = vpop.xlane.xlu1 %432 }
 0x1c0   : > { %vm490_vm10 = vcmp.lt.f32.partialorder %v1644_v36, %v454_v33  ;;  %vm491_vm11 = vcmp.lt.f32.partialorder %v1648_v38, %v454_v33  ;;  %541 = vmax.xlane.f32.xlu0 %v540_v23  ;;  %vm476_vm12 = vcmp.lt.f32.partialorder %v1654_v41, %v433_v34  ;;  %vm477_vm13 = vcmp.lt.f32.partialorder %v1660_v44, %v433_v34 }
 0x1c1   : > { %538 = vmax.xlane.f32.xlu1 %v537_v28  ;;  %v522_v43 = vsel %vm490_vm10, %v1644_v36, -inf  ;;  %v523_v46 = vsel %vm491_vm11, %v1648_v38, -inf  ;;  %v508_v63 = vsel %vm476_vm12, %v1654_v41, -inf  ;;  %v509_v0 = vsel %vm477_vm13, %v1660_v44, -inf }
 0x1c2   : > { %v564_v51 = vmax.f32 %v522_v43, %v523_v46  ;;  %v543_v10 = vmax.f32 %v508_v63, %v509_v0 }
 0x1c3   : > { %v457_v52 = vpop.xlane.xlu1 %456  ;;  %v436_v55 = vpop.xlane.xlu0 %435 }
 0x1c4   : > { %vm478_vm14 = vcmp.lt.f32.partialorder %v1666_v47, %v436_v55  ;;  %vm479_vm15 = vcmp.lt.f32.partialorder %v1670_v49, %v436_v55  ;;  %565 = vmax.xlane.f32.xlu0 %v564_v51  ;;  %vm492_vm0 = vcmp.lt.f32.partialorder %v1656_v42, %v457_v52  ;;  %vm493_vm1 = vcmp.lt.f32.partialorder %v1662_v45, %v457_v52 }
 0x1c5   : > { %562 = vmax.xlane.f32.xlu1 %v561_v58  ;;  %v510_v3 = vsel %vm478_vm14, %v1666_v47, -inf  ;;  %v511_v5 = vsel %vm479_vm15, %v1670_v49, -inf  ;;  %v524_v11 = vsel %vm492_vm0, %v1656_v42, -inf  ;;  %v525_v12 = vsel %vm493_vm1, %v1662_v45, -inf }
 0x1c6   : > { %v546_v7 = vmax.f32 %v510_v3, %v511_v5  ;;  %v567_v18 = vmax.f32 %v524_v11, %v525_v12 }
 0x1c7   : > { %v460_v8 = vpop.xlane.xlu0 %459  ;;  %v439_v9 = vpop.xlane.xlu1 %438 }
 0x1c8   : > { %vm494_vm2 = vcmp.lt.f32.partialorder %v1668_v48, %v460_v8  ;;  %vm495_vm3 = vcmp.lt.f32.partialorder %v1672_v50, %v460_v8  ;;  %547 = vmax.xlane.f32.xlu0 %v546_v7  ;;  %vm480_vm4 = vcmp.lt.f32.partialorder %v1678_v53, %v439_v9  ;;  %vm481_vm5 = vcmp.lt.f32.partialorder %v1684_v56, %v439_v9 }
 0x1c9   : > { %544 = vmax.xlane.f32.xlu1 %v543_v10  ;;  %v526_v13 = vsel %vm494_vm2, %v1668_v48, -inf  ;;  %v527_v14 = vsel %vm495_vm3, %v1672_v50, -inf  ;;  %v512_v19 = vsel %vm480_vm4, %v1678_v53, -inf  ;;  %v513_v20 = vsel %vm481_vm5, %v1684_v56, -inf }
 0x1ca   : > { %v570_v15 = vmax.f32 %v526_v13, %v527_v14  ;;  %v549_v34 = vmax.f32 %v512_v19, %v513_v20 }
 0x1cb   : > { %v463_v16 = vpop.xlane.xlu1 %462  ;;  %v442_v17 = vpop.xlane.xlu0 %441 }
 0x1cc   : > { %vm482_vm6 = vcmp.lt.f32.partialorder %v1690_v59, %v442_v17  ;;  %vm483_vm7 = vcmp.lt.f32.partialorder %v1694_v61, %v442_v17  ;;  %571 = vmax.xlane.f32.xlu0 %v570_v15  ;;  %vm496_vm8 = vcmp.lt.f32.partialorder %v1680_v54, %v463_v16  ;;  %vm497_vm9 = vcmp.lt.f32.partialorder %v1686_v57, %v463_v16 }
 0x1cd   : > { %568 = vmax.xlane.f32.xlu1 %v567_v18  ;;  %v514_v21 = vsel %vm482_vm6, %v1690_v59, -inf  ;;  %v515_v22 = vsel %vm483_vm7, %v1694_v61, -inf  ;;  %v528_v39 = vsel %vm496_vm8, %v1680_v54, -inf  ;;  %v529_v40 = vsel %vm497_vm9, %v1686_v57, -inf }
 0x1ce   : > { %v552_v23 = vmax.f32 %v514_v21, %v515_v22  ;;  %v573_v55 = vmax.f32 %v528_v39, %v529_v40 }
 0x1cf   : > { %v466_v28 = vpop.xlane.xlu0 %465  ;;  %v445_v33 = vpop.xlane.xlu1 %444 }
 0x1d0   : > { %vm498_vm10 = vcmp.lt.f32.partialorder %v1692_v60, %v466_v28  ;;  %vm499_vm11 = vcmp.lt.f32.partialorder %v1696_v62, %v466_v28  ;;  %553 = vmax.xlane.f32.xlu0 %v552_v23  ;;  %vm484_vm12 = vcmp.lt.f32.partialorder %v1702_v1, %v445_v33  ;;  %vm485_vm13 = vcmp.lt.f32.partialorder %v1708_v4, %v445_v33 }
 0x1d1   : > { %550 = vmax.xlane.f32.xlu1 %v549_v34  ;;  %v530_v43 = vsel %vm498_vm10, %v1692_v60, -inf  ;;  %v531_v46 = vsel %vm499_vm11, %v1696_v62, -inf  ;;  %v516_v58 = vsel %vm484_vm12, %v1702_v1, -inf  ;;  %v517_v63 = vsel %vm485_vm13, %v1708_v4, -inf }
 0x1d2   : > { %v576_v51 = vmax.f32 %v530_v43, %v531_v46  ;;  %v555_v0 = vmax.f32 %v516_v58, %v517_v63 }
 0x1d3   : > { %v469_v52 = vpop.xlane.xlu1 %468 }
 0x1d4   : > { %577 = vmax.xlane.f32.xlu0 %v576_v51  ;;  %vm500_vm14 = vcmp.lt.f32.partialorder %v1704_v2, %v469_v52  ;;  %vm501_vm15 = vcmp.lt.f32.partialorder %v1712_v6, %v469_v52 }
 0x1d5   : > { %574 = vmax.xlane.f32.xlu1 %v573_v55  ;;  %v532_v3 = vsel %vm500_vm14, %v1704_v2, -inf  ;;  %v533_v5 = vsel %vm501_vm15, %v1712_v6, -inf }
 0x1d6   : > { %v579_v7 = vmax.f32 %v532_v3, %v533_v5 }
 0x1d9   : > { %556 = vmax.xlane.f32.xlu1 %v555_v0 }
 0x1dd   : > { %580 = vmax.xlane.f32.xlu1 %v579_v7 }
 0x241   : > { %v536_v8 = vpop.xlane.xlu0 %535 }
 0x242   : > { %vm582_vm0 = vcmp.lt.f32.partialorder %v1620_v24, %v536_v8  ;;  %vm583_vm1 = vcmp.lt.f32.partialorder %v1624_v26, %v536_v8 }
 0x243   : > { %v614_v9 = vsel %vm582_vm0, %v1620_v24, -inf  ;;  %v615_v10 = vsel %vm583_vm1, %v1624_v26, -inf }
 0x244   : > { %v646_v11 = vmax.f32 %v614_v9, %v615_v10 }
 0x245   : > { %v560_v12 = vpop.xlane.xlu0 %559 }
 0x246   : > { %vm598_vm2 = vcmp.lt.f32.partialorder %v1622_v25, %v560_v12  ;;  %vm599_vm3 = vcmp.lt.f32.partialorder %v1626_v27, %v560_v12  ;;  %647 = vmax.xlane.f32.xlu0 %v646_v11 }
 0x247   : > { %v630_v13 = vsel %vm598_vm2, %v1622_v25, -inf  ;;  %v631_v14 = vsel %vm599_vm3, %v1626_v27, -inf }
 0x248   : > { %v670_v15 = vmax.f32 %v630_v13, %v631_v14 }
 0x249   : > { %v542_v16 = vpop.xlane.xlu0 %541 }
 0x24a   : > { %vm586_vm4 = vcmp.lt.f32.partialorder %v1642_v35, %v542_v16  ;;  %vm587_vm5 = vcmp.lt.f32.partialorder %v1646_v37, %v542_v16  ;;  %v539_v17 = vpop.xlane.xlu1 %538  ;;  %671 = vmax.xlane.f32.xlu0 %v670_v15 }
 0x24b   : > { %vm584_vm6 = vcmp.lt.f32.partialorder %v1630_v29, %v539_v17  ;;  %vm585_vm7 = vcmp.lt.f32.partialorder %v1634_v31, %v539_v17  ;;  %v618_v18 = vsel %vm586_vm4, %v1642_v35, -inf  ;;  %v619_v19 = vsel %vm587_vm5, %v1646_v37, -inf }
 0x24c   : > { %v652_v20 = vmax.f32 %v618_v18, %v619_v19  ;;  %v616_v21 = vsel %vm584_vm6, %v1630_v29, -inf  ;;  %v617_v22 = vsel %vm585_vm7, %v1634_v31, -inf }
 0x24d   : > { %v566_v23 = vpop.xlane.xlu0 %565  ;;  %v649_v28 = vmax.f32 %v616_v21, %v617_v22 }
 0x24e   : > { %vm602_vm8 = vcmp.lt.f32.partialorder %v1644_v36, %v566_v23  ;;  %vm603_vm9 = vcmp.lt.f32.partialorder %v1648_v38, %v566_v23  ;;  %v563_v33 = vpop.xlane.xlu1 %562  ;;  %653 = vmax.xlane.f32.xlu0 %v652_v20 }
 0x24f   : > { %vm600_vm10 = vcmp.lt.f32.partialorder %v1632_v30, %v563_v33  ;;  %vm601_vm11 = vcmp.lt.f32.partialorder %v1636_v32, %v563_v33  ;;  %650 = vmax.xlane.f32.xlu1 %v649_v28  ;;  %v634_v34 = vsel %vm602_vm8, %v1644_v36, -inf  ;;  %v635_v39 = vsel %vm603_vm9, %v1648_v38, -inf }
 0x250   : > { %v676_v40 = vmax.f32 %v634_v34, %v635_v39  ;;  %v632_v43 = vsel %vm600_vm10, %v1632_v30, -inf  ;;  %v633_v46 = vsel %vm601_vm11, %v1636_v32, -inf }
 0x251   : > { %v548_v51 = vpop.xlane.xlu0 %547  ;;  %v673_v52 = vmax.f32 %v632_v43, %v633_v46 }
 0x252   : > { %vm590_vm12 = vcmp.lt.f32.partialorder %v1666_v47, %v548_v51  ;;  %vm591_vm13 = vcmp.lt.f32.partialorder %v1670_v49, %v548_v51  ;;  %v545_v55 = vpop.xlane.xlu1 %544  ;;  %677 = vmax.xlane.f32.xlu0 %v676_v40 }
 0x253   : > { %vm588_vm14 = vcmp.lt.f32.partialorder %v1654_v41, %v545_v55  ;;  %vm589_vm15 = vcmp.lt.f32.partialorder %v1660_v44, %v545_v55  ;;  %674 = vmax.xlane.f32.xlu1 %v673_v52  ;;  %v622_v58 = vsel %vm590_vm12, %v1666_v47, -inf  ;;  %v623_v63 = vsel %vm591_vm13, %v1670_v49, -inf }
 0x254   : > { %v658_v0 = vmax.f32 %v622_v58, %v623_v63  ;;  %v620_v3 = vsel %vm588_vm14, %v1654_v41, -inf  ;;  %v621_v5 = vsel %vm589_vm15, %v1660_v44, -inf }
 0x255   : > { %v572_v7 = vpop.xlane.xlu0 %571  ;;  %v655_v8 = vmax.f32 %v620_v3, %v621_v5 }
 0x256   : > { %vm606_vm0 = vcmp.lt.f32.partialorder %v1668_v48, %v572_v7  ;;  %vm607_vm1 = vcmp.lt.f32.partialorder %v1672_v50, %v572_v7  ;;  %v569_v9 = vpop.xlane.xlu1 %568  ;;  %659 = vmax.xlane.f32.xlu0 %v658_v0 }
 0x257   : > { %vm604_vm2 = vcmp.lt.f32.partialorder %v1656_v42, %v569_v9  ;;  %vm605_vm3 = vcmp.lt.f32.partialorder %v1662_v45, %v569_v9  ;;  %656 = vmax.xlane.f32.xlu1 %v655_v8  ;;  %v638_v10 = vsel %vm606_vm0, %v1668_v48, -inf  ;;  %v639_v11 = vsel %vm607_vm1, %v1672_v50, -inf }
 0x258   : > { %v682_v12 = vmax.f32 %v638_v10, %v639_v11  ;;  %v636_v13 = vsel %vm604_vm2, %v1656_v42, -inf  ;;  %v637_v14 = vsel %vm605_vm3, %v1662_v45, -inf }
 0x259   : > { %v554_v15 = vpop.xlane.xlu0 %553  ;;  %v679_v16 = vmax.f32 %v636_v13, %v637_v14 }
 0x25a   : > { %vm594_vm4 = vcmp.lt.f32.partialorder %v1690_v59, %v554_v15  ;;  %vm595_vm5 = vcmp.lt.f32.partialorder %v1694_v61, %v554_v15  ;;  %v551_v17 = vpop.xlane.xlu1 %550  ;;  %683 = vmax.xlane.f32.xlu0 %v682_v12 }
 0x25b   : > { %vm592_vm6 = vcmp.lt.f32.partialorder %v1678_v53, %v551_v17  ;;  %vm593_vm7 = vcmp.lt.f32.partialorder %v1684_v56, %v551_v17  ;;  %680 = vmax.xlane.f32.xlu1 %v679_v16  ;;  %v626_v18 = vsel %vm594_vm4, %v1690_v59, -inf  ;;  %v627_v19 = vsel %vm595_vm5, %v1694_v61, -inf }
 0x25c   : > { %v664_v20 = vmax.f32 %v626_v18, %v627_v19  ;;  %v624_v21 = vsel %vm592_vm6, %v1678_v53, -inf  ;;  %v625_v22 = vsel %vm593_vm7, %v1684_v56, -inf }
 0x25d   : > { %v578_v23 = vpop.xlane.xlu0 %577  ;;  %v661_v28 = vmax.f32 %v624_v21, %v625_v22 }
 0x25e   : > { %vm610_vm8 = vcmp.lt.f32.partialorder %v1692_v60, %v578_v23  ;;  %vm611_vm9 = vcmp.lt.f32.partialorder %v1696_v62, %v578_v23  ;;  %v575_v33 = vpop.xlane.xlu1 %574  ;;  %665 = vmax.xlane.f32.xlu0 %v664_v20 }
 0x25f   : > { %vm608_vm10 = vcmp.lt.f32.partialorder %v1680_v54, %v575_v33  ;;  %vm609_vm11 = vcmp.lt.f32.partialorder %v1686_v57, %v575_v33  ;;  %662 = vmax.xlane.f32.xlu1 %v661_v28  ;;  %v642_v34 = vsel %vm610_vm8, %v1692_v60, -inf  ;;  %v643_v39 = vsel %vm611_vm9, %v1696_v62, -inf }
 0x260   : > { %v688_v40 = vmax.f32 %v642_v34, %v643_v39  ;;  %v640_v43 = vsel %vm608_vm10, %v1680_v54, -inf  ;;  %v641_v46 = vsel %vm609_vm11, %v1686_v57, -inf }
 0x261   : > { %v685_v51 = vmax.f32 %v640_v43, %v641_v46 }
 0x262   : > { %v557_v52 = vpop.xlane.xlu1 %556  ;;  %689 = vmax.xlane.f32.xlu0 %v688_v40 }
 0x263   : > { %vm596_vm12 = vcmp.lt.f32.partialorder %v1702_v1, %v557_v52  ;;  %vm597_vm13 = vcmp.lt.f32.partialorder %v1708_v4, %v557_v52  ;;  %686 = vmax.xlane.f32.xlu1 %v685_v51 }
 0x264   : > { %v628_v55 = vsel %vm596_vm12, %v1702_v1, -inf  ;;  %v629_v58 = vsel %vm597_vm13, %v1708_v4, -inf }
 0x265   : > { %v667_v63 = vmax.f32 %v628_v55, %v629_v58 }
 0x266   : > { %v581_v0 = vpop.xlane.xlu1 %580 }
 0x267   : > { %vm612_vm14 = vcmp.lt.f32.partialorder %v1704_v2, %v581_v0  ;;  %vm613_vm15 = vcmp.lt.f32.partialorder %v1712_v6, %v581_v0  ;;  %668 = vmax.xlane.f32.xlu1 %v667_v63 }
 0x268   : > { %v644_v3 = vsel %vm612_vm14, %v1704_v2, -inf  ;;  %v645_v5 = vsel %vm613_vm15, %v1712_v6, -inf }
 0x269   : > { %v691_v7 = vmax.f32 %v644_v3, %v645_v5 }
 0x26b   : > { %692 = vmax.xlane.f32.xlu1 %v691_v7 }
 0x2cf   : > { %v648_v8 = vpop.xlane.xlu0 %647 }
 0x2d0   : > { %vm694_vm0 = vcmp.lt.f32.partialorder %v1620_v24, %v648_v8  ;;  %vm695_vm1 = vcmp.lt.f32.partialorder %v1624_v26, %v648_v8 }
 0x2d1   : > { %v726_v9 = vsel %vm694_vm0, %v1620_v24, -inf  ;;  %v727_v10 = vsel %vm695_vm1, %v1624_v26, -inf }
 0x2d2   : > { %v758_v11 = vmax.f32 %v726_v9, %v727_v10 }
 0x2d3   : > { %v672_v12 = vpop.xlane.xlu0 %671 }
 0x2d4   : > { %vm710_vm2 = vcmp.lt.f32.partialorder %v1622_v25, %v672_v12  ;;  %vm711_vm3 = vcmp.lt.f32.partialorder %v1626_v27, %v672_v12  ;;  %759 = vmax.xlane.f32.xlu0 %v758_v11 }
 0x2d5   : > { %v742_v13 = vsel %vm710_vm2, %v1622_v25, -inf  ;;  %v743_v14 = vsel %vm711_vm3, %v1626_v27, -inf }
 0x2d6   : > { %v782_v15 = vmax.f32 %v742_v13, %v743_v14 }
 0x2d7   : > { %v654_v16 = vpop.xlane.xlu0 %653 }
 0x2d8   : > { %vm698_vm4 = vcmp.lt.f32.partialorder %v1642_v35, %v654_v16  ;;  %vm699_vm5 = vcmp.lt.f32.partialorder %v1646_v37, %v654_v16  ;;  %v651_v17 = vpop.xlane.xlu1 %650  ;;  %783 = vmax.xlane.f32.xlu0 %v782_v15 }
 0x2d9   : > { %vm696_vm6 = vcmp.lt.f32.partialorder %v1630_v29, %v651_v17  ;;  %vm697_vm7 = vcmp.lt.f32.partialorder %v1634_v31, %v651_v17  ;;  %v730_v18 = vsel %vm698_vm4, %v1642_v35, -inf  ;;  %v731_v19 = vsel %vm699_vm5, %v1646_v37, -inf }
 0x2da   : > { %v764_v20 = vmax.f32 %v730_v18, %v731_v19  ;;  %v728_v21 = vsel %vm696_vm6, %v1630_v29, -inf  ;;  %v729_v22 = vsel %vm697_vm7, %v1634_v31, -inf }
 0x2db   : > { %v678_v23 = vpop.xlane.xlu0 %677  ;;  %v761_v28 = vmax.f32 %v728_v21, %v729_v22 }
 0x2dc   : > { %vm714_vm8 = vcmp.lt.f32.partialorder %v1644_v36, %v678_v23  ;;  %vm715_vm9 = vcmp.lt.f32.partialorder %v1648_v38, %v678_v23  ;;  %v675_v33 = vpop.xlane.xlu1 %674  ;;  %765 = vmax.xlane.f32.xlu0 %v764_v20 }
 0x2dd   : > { %vm712_vm10 = vcmp.lt.f32.partialorder %v1632_v30, %v675_v33  ;;  %vm713_vm11 = vcmp.lt.f32.partialorder %v1636_v32, %v675_v33  ;;  %762 = vmax.xlane.f32.xlu1 %v761_v28  ;;  %v746_v34 = vsel %vm714_vm8, %v1644_v36, -inf  ;;  %v747_v39 = vsel %vm715_vm9, %v1648_v38, -inf }
 0x2de   : > { %v788_v40 = vmax.f32 %v746_v34, %v747_v39  ;;  %v744_v43 = vsel %vm712_vm10, %v1632_v30, -inf  ;;  %v745_v46 = vsel %vm713_vm11, %v1636_v32, -inf }
 0x2df   : > { %v660_v51 = vpop.xlane.xlu0 %659  ;;  %v785_v52 = vmax.f32 %v744_v43, %v745_v46 }
 0x2e0   : > { %vm702_vm12 = vcmp.lt.f32.partialorder %v1666_v47, %v660_v51  ;;  %vm703_vm13 = vcmp.lt.f32.partialorder %v1670_v49, %v660_v51  ;;  %v657_v55 = vpop.xlane.xlu1 %656  ;;  %789 = vmax.xlane.f32.xlu0 %v788_v40 }
 0x2e1   : > { %vm700_vm14 = vcmp.lt.f32.partialorder %v1654_v41, %v657_v55  ;;  %vm701_vm15 = vcmp.lt.f32.partialorder %v1660_v44, %v657_v55  ;;  %786 = vmax.xlane.f32.xlu1 %v785_v52  ;;  %v734_v58 = vsel %vm702_vm12, %v1666_v47, -inf  ;;  %v735_v63 = vsel %vm703_vm13, %v1670_v49, -inf }
 0x2e2   : > { %v770_v0 = vmax.f32 %v734_v58, %v735_v63  ;;  %v732_v3 = vsel %vm700_vm14, %v1654_v41, -inf  ;;  %v733_v5 = vsel %vm701_vm15, %v1660_v44, -inf }
 0x2e3   : > { %v684_v7 = vpop.xlane.xlu0 %683  ;;  %v767_v8 = vmax.f32 %v732_v3, %v733_v5 }
 0x2e4   : > { %vm718_vm0 = vcmp.lt.f32.partialorder %v1668_v48, %v684_v7  ;;  %vm719_vm1 = vcmp.lt.f32.partialorder %v1672_v50, %v684_v7  ;;  %v681_v9 = vpop.xlane.xlu1 %680  ;;  %771 = vmax.xlane.f32.xlu0 %v770_v0 }
 0x2e5   : > { %vm716_vm2 = vcmp.lt.f32.partialorder %v1656_v42, %v681_v9  ;;  %vm717_vm3 = vcmp.lt.f32.partialorder %v1662_v45, %v681_v9  ;;  %768 = vmax.xlane.f32.xlu1 %v767_v8  ;;  %v750_v10 = vsel %vm718_vm0, %v1668_v48, -inf  ;;  %v751_v11 = vsel %vm719_vm1, %v1672_v50, -inf }
 0x2e6   : > { %v794_v12 = vmax.f32 %v750_v10, %v751_v11  ;;  %v748_v13 = vsel %vm716_vm2, %v1656_v42, -inf  ;;  %v749_v14 = vsel %vm717_vm3, %v1662_v45, -inf }
 0x2e7   : > { %v666_v15 = vpop.xlane.xlu0 %665  ;;  %v791_v16 = vmax.f32 %v748_v13, %v749_v14 }
 0x2e8   : > { %vm706_vm4 = vcmp.lt.f32.partialorder %v1690_v59, %v666_v15  ;;  %vm707_vm5 = vcmp.lt.f32.partialorder %v1694_v61, %v666_v15  ;;  %v663_v17 = vpop.xlane.xlu1 %662  ;;  %795 = vmax.xlane.f32.xlu0 %v794_v12 }
 0x2e9   : > { %vm704_vm6 = vcmp.lt.f32.partialorder %v1678_v53, %v663_v17  ;;  %vm705_vm7 = vcmp.lt.f32.partialorder %v1684_v56, %v663_v17  ;;  %792 = vmax.xlane.f32.xlu1 %v791_v16  ;;  %v738_v18 = vsel %vm706_vm4, %v1690_v59, -inf  ;;  %v739_v19 = vsel %vm707_vm5, %v1694_v61, -inf }
 0x2ea   : > { %v776_v20 = vmax.f32 %v738_v18, %v739_v19  ;;  %v736_v21 = vsel %vm704_vm6, %v1678_v53, -inf  ;;  %v737_v22 = vsel %vm705_vm7, %v1684_v56, -inf }
 0x2eb   : > { %v690_v23 = vpop.xlane.xlu0 %689  ;;  %v773_v28 = vmax.f32 %v736_v21, %v737_v22 }
 0x2ec   : > { %vm722_vm8 = vcmp.lt.f32.partialorder %v1692_v60, %v690_v23  ;;  %vm723_vm9 = vcmp.lt.f32.partialorder %v1696_v62, %v690_v23  ;;  %v687_v33 = vpop.xlane.xlu1 %686  ;;  %777 = vmax.xlane.f32.xlu0 %v776_v20 }
 0x2ed   : > { %vm720_vm10 = vcmp.lt.f32.partialorder %v1680_v54, %v687_v33  ;;  %vm721_vm11 = vcmp.lt.f32.partialorder %v1686_v57, %v687_v33  ;;  %774 = vmax.xlane.f32.xlu1 %v773_v28  ;;  %v754_v34 = vsel %vm722_vm8, %v1692_v60, -inf  ;;  %v755_v39 = vsel %vm723_vm9, %v1696_v62, -inf }
 0x2ee   : > { %v800_v40 = vmax.f32 %v754_v34, %v755_v39  ;;  %v752_v43 = vsel %vm720_vm10, %v1680_v54, -inf  ;;  %v753_v46 = vsel %vm721_vm11, %v1686_v57, -inf }
 0x2ef   : > { %v797_v51 = vmax.f32 %v752_v43, %v753_v46 }
 0x2f0   : > { %v669_v52 = vpop.xlane.xlu1 %668  ;;  %801 = vmax.xlane.f32.xlu0 %v800_v40 }
 0x2f1   : > { %vm708_vm12 = vcmp.lt.f32.partialorder %v1702_v1, %v669_v52  ;;  %vm709_vm13 = vcmp.lt.f32.partialorder %v1708_v4, %v669_v52  ;;  %798 = vmax.xlane.f32.xlu1 %v797_v51 }
 0x2f2   : > { %v740_v55 = vsel %vm708_vm12, %v1702_v1, -inf  ;;  %v741_v58 = vsel %vm709_vm13, %v1708_v4, -inf }
 0x2f3   : > { %v779_v63 = vmax.f32 %v740_v55, %v741_v58 }
 0x2f4   : > { %v693_v0 = vpop.xlane.xlu1 %692 }
 0x2f5   : > { %vm724_vm14 = vcmp.lt.f32.partialorder %v1704_v2, %v693_v0  ;;  %vm725_vm15 = vcmp.lt.f32.partialorder %v1712_v6, %v693_v0  ;;  %780 = vmax.xlane.f32.xlu1 %v779_v63 }
 0x2f6   : > { %v756_v3 = vsel %vm724_vm14, %v1704_v2, -inf  ;;  %v757_v5 = vsel %vm725_vm15, %v1712_v6, -inf }
 0x2f7   : > { %v803_v7 = vmax.f32 %v756_v3, %v757_v5 }
 0x2f9   : > { %804 = vmax.xlane.f32.xlu1 %v803_v7 }
 0x35d   : > { %v760_v8 = vpop.xlane.xlu0 %759 }
 0x35e   : > { %vm806_vm0 = vcmp.lt.f32.partialorder %v1620_v24, %v760_v8  ;;  %vm807_vm1 = vcmp.lt.f32.partialorder %v1624_v26, %v760_v8 }
 0x35f   : > { %v838_v9 = vsel %vm806_vm0, %v1620_v24, -inf  ;;  %v839_v10 = vsel %vm807_vm1, %v1624_v26, -inf }
 0x360   : > { %v870_v11 = vmax.f32 %v838_v9, %v839_v10 }
 0x361   : > { %v784_v12 = vpop.xlane.xlu0 %783 }
 0x362   : > { %vm822_vm2 = vcmp.lt.f32.partialorder %v1622_v25, %v784_v12  ;;  %vm823_vm3 = vcmp.lt.f32.partialorder %v1626_v27, %v784_v12  ;;  %871 = vmax.xlane.f32.xlu0 %v870_v11 }
 0x363   : > { %v854_v13 = vsel %vm822_vm2, %v1622_v25, -inf  ;;  %v855_v14 = vsel %vm823_vm3, %v1626_v27, -inf }
 0x364   : > { %v894_v15 = vmax.f32 %v854_v13, %v855_v14 }
 0x365   : > { %v766_v16 = vpop.xlane.xlu0 %765 }
 0x366   : > { %vm810_vm4 = vcmp.lt.f32.partialorder %v1642_v35, %v766_v16  ;;  %vm811_vm5 = vcmp.lt.f32.partialorder %v1646_v37, %v766_v16  ;;  %v763_v17 = vpop.xlane.xlu1 %762  ;;  %895 = vmax.xlane.f32.xlu0 %v894_v15 }
 0x367   : > { %vm808_vm6 = vcmp.lt.f32.partialorder %v1630_v29, %v763_v17  ;;  %vm809_vm7 = vcmp.lt.f32.partialorder %v1634_v31, %v763_v17  ;;  %v842_v18 = vsel %vm810_vm4, %v1642_v35, -inf  ;;  %v843_v19 = vsel %vm811_vm5, %v1646_v37, -inf }
 0x368   : > { %v876_v20 = vmax.f32 %v842_v18, %v843_v19  ;;  %v840_v21 = vsel %vm808_vm6, %v1630_v29, -inf  ;;  %v841_v22 = vsel %vm809_vm7, %v1634_v31, -inf }
 0x369   : > { %v790_v23 = vpop.xlane.xlu0 %789  ;;  %v873_v28 = vmax.f32 %v840_v21, %v841_v22 }
 0x36a   : > { %vm826_vm8 = vcmp.lt.f32.partialorder %v1644_v36, %v790_v23  ;;  %vm827_vm9 = vcmp.lt.f32.partialorder %v1648_v38, %v790_v23  ;;  %v787_v33 = vpop.xlane.xlu1 %786  ;;  %877 = vmax.xlane.f32.xlu0 %v876_v20 }
 0x36b   : > { %vm824_vm10 = vcmp.lt.f32.partialorder %v1632_v30, %v787_v33  ;;  %vm825_vm11 = vcmp.lt.f32.partialorder %v1636_v32, %v787_v33  ;;  %874 = vmax.xlane.f32.xlu1 %v873_v28  ;;  %v858_v34 = vsel %vm826_vm8, %v1644_v36, -inf  ;;  %v859_v39 = vsel %vm827_vm9, %v1648_v38, -inf }
 0x36c   : > { %v900_v40 = vmax.f32 %v858_v34, %v859_v39  ;;  %v856_v43 = vsel %vm824_vm10, %v1632_v30, -inf  ;;  %v857_v46 = vsel %vm825_vm11, %v1636_v32, -inf }
 0x36d   : > { %v772_v51 = vpop.xlane.xlu0 %771  ;;  %v897_v52 = vmax.f32 %v856_v43, %v857_v46 }
 0x36e   : > { %vm814_vm12 = vcmp.lt.f32.partialorder %v1666_v47, %v772_v51  ;;  %vm815_vm13 = vcmp.lt.f32.partialorder %v1670_v49, %v772_v51  ;;  %v769_v55 = vpop.xlane.xlu1 %768  ;;  %901 = vmax.xlane.f32.xlu0 %v900_v40 }
 0x36f   : > { %vm812_vm14 = vcmp.lt.f32.partialorder %v1654_v41, %v769_v55  ;;  %vm813_vm15 = vcmp.lt.f32.partialorder %v1660_v44, %v769_v55  ;;  %898 = vmax.xlane.f32.xlu1 %v897_v52  ;;  %v846_v58 = vsel %vm814_vm12, %v1666_v47, -inf  ;;  %v847_v63 = vsel %vm815_vm13, %v1670_v49, -inf }
 0x370   : > { %v882_v0 = vmax.f32 %v846_v58, %v847_v63  ;;  %v844_v3 = vsel %vm812_vm14, %v1654_v41, -inf  ;;  %v845_v5 = vsel %vm813_vm15, %v1660_v44, -inf }
 0x371   : > { %v796_v7 = vpop.xlane.xlu0 %795  ;;  %v879_v8 = vmax.f32 %v844_v3, %v845_v5 }
 0x372   : > { %vm830_vm0 = vcmp.lt.f32.partialorder %v1668_v48, %v796_v7  ;;  %vm831_vm1 = vcmp.lt.f32.partialorder %v1672_v50, %v796_v7  ;;  %v793_v9 = vpop.xlane.xlu1 %792  ;;  %883 = vmax.xlane.f32.xlu0 %v882_v0 }
 0x373   : > { %vm828_vm2 = vcmp.lt.f32.partialorder %v1656_v42, %v793_v9  ;;  %vm829_vm3 = vcmp.lt.f32.partialorder %v1662_v45, %v793_v9  ;;  %880 = vmax.xlane.f32.xlu1 %v879_v8  ;;  %v862_v10 = vsel %vm830_vm0, %v1668_v48, -inf  ;;  %v863_v11 = vsel %vm831_vm1, %v1672_v50, -inf }
 0x374   : > { %v906_v12 = vmax.f32 %v862_v10, %v863_v11  ;;  %v860_v13 = vsel %vm828_vm2, %v1656_v42, -inf  ;;  %v861_v14 = vsel %vm829_vm3, %v1662_v45, -inf }
 0x375   : > { %v778_v15 = vpop.xlane.xlu0 %777  ;;  %v903_v16 = vmax.f32 %v860_v13, %v861_v14 }
 0x376   : > { %vm818_vm4 = vcmp.lt.f32.partialorder %v1690_v59, %v778_v15  ;;  %vm819_vm5 = vcmp.lt.f32.partialorder %v1694_v61, %v778_v15  ;;  %v775_v17 = vpop.xlane.xlu1 %774  ;;  %907 = vmax.xlane.f32.xlu0 %v906_v12 }
 0x377   : > { %vm816_vm6 = vcmp.lt.f32.partialorder %v1678_v53, %v775_v17  ;;  %vm817_vm7 = vcmp.lt.f32.partialorder %v1684_v56, %v775_v17  ;;  %904 = vmax.xlane.f32.xlu1 %v903_v16  ;;  %v850_v18 = vsel %vm818_vm4, %v1690_v59, -inf  ;;  %v851_v19 = vsel %vm819_vm5, %v1694_v61, -inf }
 0x378   : > { %v888_v20 = vmax.f32 %v850_v18, %v851_v19  ;;  %v848_v21 = vsel %vm816_vm6, %v1678_v53, -inf  ;;  %v849_v22 = vsel %vm817_vm7, %v1684_v56, -inf }
 0x379   : > { %v802_v23 = vpop.xlane.xlu0 %801  ;;  %v885_v28 = vmax.f32 %v848_v21, %v849_v22 }
 0x37a   : > { %vm834_vm8 = vcmp.lt.f32.partialorder %v1692_v60, %v802_v23  ;;  %vm835_vm9 = vcmp.lt.f32.partialorder %v1696_v62, %v802_v23  ;;  %v799_v33 = vpop.xlane.xlu1 %798  ;;  %889 = vmax.xlane.f32.xlu0 %v888_v20 }
 0x37b   : > { %vm832_vm10 = vcmp.lt.f32.partialorder %v1680_v54, %v799_v33  ;;  %vm833_vm11 = vcmp.lt.f32.partialorder %v1686_v57, %v799_v33  ;;  %886 = vmax.xlane.f32.xlu1 %v885_v28  ;;  %v866_v34 = vsel %vm834_vm8, %v1692_v60, -inf  ;;  %v867_v39 = vsel %vm835_vm9, %v1696_v62, -inf }
 0x37c   : > { %v912_v40 = vmax.f32 %v866_v34, %v867_v39  ;;  %v864_v43 = vsel %vm832_vm10, %v1680_v54, -inf  ;;  %v865_v46 = vsel %vm833_vm11, %v1686_v57, -inf }
 0x37d   : > { %v909_v51 = vmax.f32 %v864_v43, %v865_v46 }
 0x37e   : > { %v781_v52 = vpop.xlane.xlu1 %780  ;;  %913 = vmax.xlane.f32.xlu0 %v912_v40 }
 0x37f   : > { %vm820_vm12 = vcmp.lt.f32.partialorder %v1702_v1, %v781_v52  ;;  %vm821_vm13 = vcmp.lt.f32.partialorder %v1708_v4, %v781_v52  ;;  %910 = vmax.xlane.f32.xlu1 %v909_v51 }
 0x380   : > { %v852_v55 = vsel %vm820_vm12, %v1702_v1, -inf  ;;  %v853_v58 = vsel %vm821_vm13, %v1708_v4, -inf }
 0x381   : > { %v891_v63 = vmax.f32 %v852_v55, %v853_v58 }
 0x382   : > { %v805_v0 = vpop.xlane.xlu1 %804 }
 0x383   : > { %vm836_vm14 = vcmp.lt.f32.partialorder %v1704_v2, %v805_v0  ;;  %vm837_vm15 = vcmp.lt.f32.partialorder %v1712_v6, %v805_v0  ;;  %892 = vmax.xlane.f32.xlu1 %v891_v63 }
 0x384   : > { %v868_v3 = vsel %vm836_vm14, %v1704_v2, -inf  ;;  %v869_v5 = vsel %vm837_vm15, %v1712_v6, -inf }
 0x385   : > { %v915_v7 = vmax.f32 %v868_v3, %v869_v5 }
 0x387   : > { %916 = vmax.xlane.f32.xlu1 %v915_v7 }
 0x3eb   : > { %v872_v8 = vpop.xlane.xlu0 %871 }
 0x3ec   : > { %vm918_vm0 = vcmp.lt.f32.partialorder %v1620_v24, %v872_v8  ;;  %vm919_vm1 = vcmp.lt.f32.partialorder %v1624_v26, %v872_v8 }
 0x3ed   : > { %v950_v9 = vsel %vm918_vm0, %v1620_v24, -inf  ;;  %v951_v10 = vsel %vm919_vm1, %v1624_v26, -inf }
 0x3ee   : > { %v982_v11 = vmax.f32 %v950_v9, %v951_v10 }
 0x3ef   : > { %v896_v12 = vpop.xlane.xlu0 %895 }
 0x3f0   : > { %vm934_vm2 = vcmp.lt.f32.partialorder %v1622_v25, %v896_v12  ;;  %vm935_vm3 = vcmp.lt.f32.partialorder %v1626_v27, %v896_v12  ;;  %983 = vmax.xlane.f32.xlu0 %v982_v11 }
 0x3f1   : > { %v966_v13 = vsel %vm934_vm2, %v1622_v25, -inf  ;;  %v967_v14 = vsel %vm935_vm3, %v1626_v27, -inf }
 0x3f2   : > { %v1006_v15 = vmax.f32 %v966_v13, %v967_v14 }
 0x3f3   : > { %v878_v16 = vpop.xlane.xlu0 %877 }
 0x3f4   : > { %vm922_vm4 = vcmp.lt.f32.partialorder %v1642_v35, %v878_v16  ;;  %vm923_vm5 = vcmp.lt.f32.partialorder %v1646_v37, %v878_v16  ;;  %v875_v17 = vpop.xlane.xlu1 %874  ;;  %1007 = vmax.xlane.f32.xlu0 %v1006_v15 }
 0x3f5   : > { %vm920_vm6 = vcmp.lt.f32.partialorder %v1630_v29, %v875_v17  ;;  %vm921_vm7 = vcmp.lt.f32.partialorder %v1634_v31, %v875_v17  ;;  %v954_v18 = vsel %vm922_vm4, %v1642_v35, -inf  ;;  %v955_v19 = vsel %vm923_vm5, %v1646_v37, -inf }
 0x3f6   : > { %v988_v20 = vmax.f32 %v954_v18, %v955_v19  ;;  %v952_v21 = vsel %vm920_vm6, %v1630_v29, -inf  ;;  %v953_v22 = vsel %vm921_vm7, %v1634_v31, -inf }
 0x3f7   : > { %v902_v23 = vpop.xlane.xlu0 %901  ;;  %v985_v28 = vmax.f32 %v952_v21, %v953_v22 }
 0x3f8   : > { %vm938_vm8 = vcmp.lt.f32.partialorder %v1644_v36, %v902_v23  ;;  %vm939_vm9 = vcmp.lt.f32.partialorder %v1648_v38, %v902_v23  ;;  %v899_v33 = vpop.xlane.xlu1 %898  ;;  %989 = vmax.xlane.f32.xlu0 %v988_v20 }
 0x3f9   : > { %vm936_vm10 = vcmp.lt.f32.partialorder %v1632_v30, %v899_v33  ;;  %vm937_vm11 = vcmp.lt.f32.partialorder %v1636_v32, %v899_v33  ;;  %986 = vmax.xlane.f32.xlu1 %v985_v28  ;;  %v970_v34 = vsel %vm938_vm8, %v1644_v36, -inf  ;;  %v971_v39 = vsel %vm939_vm9, %v1648_v38, -inf }
 0x3fa   : > { %v1012_v40 = vmax.f32 %v970_v34, %v971_v39  ;;  %v968_v43 = vsel %vm936_vm10, %v1632_v30, -inf  ;;  %v969_v46 = vsel %vm937_vm11, %v1636_v32, -inf }
 0x3fb   : > { %v884_v51 = vpop.xlane.xlu0 %883  ;;  %v1009_v52 = vmax.f32 %v968_v43, %v969_v46 }
 0x3fc   : > { %vm926_vm12 = vcmp.lt.f32.partialorder %v1666_v47, %v884_v51  ;;  %vm927_vm13 = vcmp.lt.f32.partialorder %v1670_v49, %v884_v51  ;;  %v881_v55 = vpop.xlane.xlu1 %880  ;;  %1013 = vmax.xlane.f32.xlu0 %v1012_v40 }
 0x3fd   : > { %vm924_vm14 = vcmp.lt.f32.partialorder %v1654_v41, %v881_v55  ;;  %vm925_vm15 = vcmp.lt.f32.partialorder %v1660_v44, %v881_v55  ;;  %1010 = vmax.xlane.f32.xlu1 %v1009_v52  ;;  %v958_v58 = vsel %vm926_vm12, %v1666_v47, -inf  ;;  %v959_v63 = vsel %vm927_vm13, %v1670_v49, -inf }
 0x3fe   : > { %v994_v0 = vmax.f32 %v958_v58, %v959_v63  ;;  %v956_v3 = vsel %vm924_vm14, %v1654_v41, -inf  ;;  %v957_v5 = vsel %vm925_vm15, %v1660_v44, -inf }
 0x3ff   : > { %v908_v7 = vpop.xlane.xlu0 %907  ;;  %v991_v8 = vmax.f32 %v956_v3, %v957_v5 }
 0x400   : > { %vm942_vm0 = vcmp.lt.f32.partialorder %v1668_v48, %v908_v7  ;;  %vm943_vm1 = vcmp.lt.f32.partialorder %v1672_v50, %v908_v7  ;;  %v905_v9 = vpop.xlane.xlu1 %904  ;;  %995 = vmax.xlane.f32.xlu0 %v994_v0 }
 0x401   : > { %vm940_vm2 = vcmp.lt.f32.partialorder %v1656_v42, %v905_v9  ;;  %vm941_vm3 = vcmp.lt.f32.partialorder %v1662_v45, %v905_v9  ;;  %992 = vmax.xlane.f32.xlu1 %v991_v8  ;;  %v974_v10 = vsel %vm942_vm0, %v1668_v48, -inf  ;;  %v975_v11 = vsel %vm943_vm1, %v1672_v50, -inf }
 0x402   : > { %v1018_v12 = vmax.f32 %v974_v10, %v975_v11  ;;  %v972_v13 = vsel %vm940_vm2, %v1656_v42, -inf  ;;  %v973_v14 = vsel %vm941_vm3, %v1662_v45, -inf  ;;  %vm1062_vm0 = vcmp.gt.f32.partialorder %v1620_v24, 0.0 }
 0x403   : > { %v890_v15 = vpop.xlane.xlu0 %889  ;;  %v1015_v16 = vmax.f32 %v972_v13, %v973_v14  ;;  %vm1063_vm3 = vcmp.gt.f32.partialorder %v1624_v26, 0.0 }
 0x404   : > { %vm930_vm4 = vcmp.lt.f32.partialorder %v1690_v59, %v890_v15  ;;  %vm931_vm5 = vcmp.lt.f32.partialorder %v1694_v61, %v890_v15  ;;  %v887_v17 = vpop.xlane.xlu1 %886  ;;  %1019 = vmax.xlane.f32.xlu0 %v1018_v12 }
 0x405   : > { %vm928_vm6 = vcmp.lt.f32.partialorder %v1678_v53, %v887_v17  ;;  %vm929_vm7 = vcmp.lt.f32.partialorder %v1684_v56, %v887_v17  ;;  %1016 = vmax.xlane.f32.xlu1 %v1015_v16  ;;  %v962_v18 = vsel %vm930_vm4, %v1690_v59, -inf  ;;  %v963_v19 = vsel %vm931_vm5, %v1694_v61, -inf }
 0x406   : > { %v1000_v20 = vmax.f32 %v962_v18, %v963_v19  ;;  %v960_v21 = vsel %vm928_vm6, %v1678_v53, -inf  ;;  %v961_v22 = vsel %vm929_vm7, %v1684_v56, -inf  ;;  %vm1078_vm6 = vcmp.gt.f32.partialorder %v1622_v25, 0.0 }
 0x407   : > { %v914_v23 = vpop.xlane.xlu0 %913  ;;  %v997_v28 = vmax.f32 %v960_v21, %v961_v22 }
 0x408   : > { %vm946_vm8 = vcmp.lt.f32.partialorder %v1692_v60, %v914_v23  ;;  %vm947_vm9 = vcmp.lt.f32.partialorder %v1696_v62, %v914_v23  ;;  %v911_v33 = vpop.xlane.xlu1 %910  ;;  %1001 = vmax.xlane.f32.xlu0 %v1000_v20 }
 0x409   : > { %vm944_vm10 = vcmp.lt.f32.partialorder %v1680_v54, %v911_v33  ;;  %vm945_vm11 = vcmp.lt.f32.partialorder %v1686_v57, %v911_v33  ;;  %998 = vmax.xlane.f32.xlu1 %v997_v28  ;;  %v978_v34 = vsel %vm946_vm8, %v1692_v60, -inf  ;;  %v979_v39 = vsel %vm947_vm9, %v1696_v62, -inf }
 0x40a   : > { %v1024_v40 = vmax.f32 %v978_v34, %v979_v39  ;;  %v976_v43 = vsel %vm944_vm10, %v1680_v54, -inf  ;;  %v977_v46 = vsel %vm945_vm11, %v1686_v57, -inf  ;;  %vm1079_vm9 = vcmp.gt.f32.partialorder %v1626_v27, 0.0 }
 0x40b   : > { %v1021_v51 = vmax.f32 %v976_v43, %v977_v46 }
 0x40c   : > { %v893_v52 = vpop.xlane.xlu1 %892  ;;  %1025 = vmax.xlane.f32.xlu0 %v1024_v40 }
 0x40d   : > { %vm932_vm12 = vcmp.lt.f32.partialorder %v1702_v1, %v893_v52  ;;  %vm933_vm13 = vcmp.lt.f32.partialorder %v1708_v4, %v893_v52  ;;  %1022 = vmax.xlane.f32.xlu1 %v1021_v51 }
 0x40e   : > { %v964_v55 = vsel %vm932_vm12, %v1702_v1, -inf  ;;  %v965_v58 = vsel %vm933_vm13, %v1708_v4, -inf  ;;  %vm1066_vm12 = vcmp.gt.f32.partialorder %v1642_v35, 0.0 }
 0x40f   : > { %v1003_v63 = vmax.f32 %v964_v55, %v965_v58 }
 0x410   : > { %v917_v0 = vpop.xlane.xlu1 %916 }
 0x411   : > { %vm948_vm14 = vcmp.lt.f32.partialorder %v1704_v2, %v917_v0  ;;  %vm949_vm15 = vcmp.lt.f32.partialorder %v1712_v6, %v917_v0  ;;  %1004 = vmax.xlane.f32.xlu1 %v1003_v63 }
 0x412   : > { %v980_v3 = vsel %vm948_vm14, %v1704_v2, -inf  ;;  %v981_v5 = vsel %vm949_vm15, %v1712_v6, -inf  ;;  %vm1067_vm15 = vcmp.gt.f32.partialorder %v1646_v37, 0.0 }
 0x413   : > { %v1027_v7 = vmax.f32 %v980_v3, %v981_v5 }
 0x415   : > { %1028 = vmax.xlane.f32.xlu1 %v1027_v7 }
 0x479   : > { %v984_v8 = vpop.xlane.xlu0 %983 }
 0x47a   : > { %vm1030_vm1 = vcmp.ge.f32.partialorder %v1620_v24, %v984_v8  ;;  %vm1031_vm2 = vcmp.ge.f32.partialorder %v1624_v26, %v984_v8 }
 0x47b   : > { %vm1094_vm4 = vmand %vm1030_vm1, %vm1062_vm0 }
 0x47c   : > { %vm1095_vm5 = vmand %vm1031_vm2, %vm1063_vm3  ;;  %v1126_v9 = vsel %vm1094_vm4, %v1620_v24, 0.0  ;;  %vm1064_vm4 = vcmp.gt.f32.partialorder %v1630_v29, 0.0 }
 0x47d   : > { %v1127_v10 = vsel %vm1095_vm5, %v1624_v26, 0.0  ;;  %1158 = vst [vmem:[%s2049_s3] sm:$0xff] %v1126_v9  ;;  %v1008_v11 = vpop.xlane.xlu0 %1007  ;;  %vm1065_vm5 = vcmp.gt.f32.partialorder %v1634_v31, 0.0 }
 0x47e   : > { %1159 = vst [vmem:[%s2049_s3 + $0x8] sm:$0xff] %v1127_v10  ;;  %vm1046_vm7 = vcmp.ge.f32.partialorder %v1622_v25, %v1008_v11  ;;  %vm1047_vm8 = vcmp.ge.f32.partialorder %v1626_v27, %v1008_v11 }
 0x47f   : > { %vm1110_vm10 = vmand %vm1046_vm7, %vm1078_vm6 }
 0x480   : > { %vm1111_vm11 = vmand %vm1047_vm8, %vm1079_vm9  ;;  %v1142_v24 = vsel %vm1110_vm10, %v1622_v25, 0.0  ;;  %vm1082_vm8 = vcmp.gt.f32.partialorder %v1644_v36, 0.0 }
 0x481   : > { %v1143_v26 = vsel %vm1111_vm11, %v1626_v27, 0.0  ;;  %1174 = vst [vmem:[%s2049_s3 + $0x80] sm:$0xff] %v1142_v24  ;;  %v990_v12 = vpop.xlane.xlu0 %989  ;;  %vm1083_vm11 = vcmp.gt.f32.partialorder %v1648_v38, 0.0 }
 0x482   : > { %1175 = vst [vmem:[%s2049_s3 + $0x88] sm:$0xff] %v1143_v26  ;;  %vm1034_vm13 = vcmp.ge.f32.partialorder %v1642_v35, %v990_v12  ;;  %vm1035_vm14 = vcmp.ge.f32.partialorder %v1646_v37, %v990_v12  ;;  %v987_v13 = vpop.xlane.xlu1 %986 }
 0x483   : > { %vm1098_vm0 = vmand %vm1034_vm13, %vm1066_vm12  ;;  %vm1032_vm1 = vcmp.ge.f32.partialorder %v1630_v29, %v987_v13  ;;  %vm1033_vm2 = vcmp.ge.f32.partialorder %v1634_v31, %v987_v13 }
 0x484   : > { %vm1099_vm3 = vmand %vm1035_vm14, %vm1067_vm15  ;;  %v1130_v25 = vsel %vm1098_vm0, %v1642_v35, 0.0  ;;  %vm1080_vm0 = vcmp.gt.f32.partialorder %v1632_v30, 0.0 }
 0x485   : > { %v1131_v27 = vsel %vm1099_vm3, %v1646_v37, 0.0  ;;  %1162 = vst [vmem:[%s2049_s3 + $0x20] sm:$0xff] %v1130_v25  ;;  %vm1096_vm6 = vmand %vm1032_vm1, %vm1064_vm4  ;;  %v1014_v14 = vpop.xlane.xlu0 %1013  ;;  %vm1081_vm1 = vcmp.gt.f32.partialorder %v1636_v32, 0.0  ;;  %vm1070_vm4 = vcmp.gt.f32.partialorder %v1666_v47, 0.0 }
 0x486   : > { %1163 = vst [vmem:[%s2049_s3 + $0x28] sm:$0xff] %v1131_v27  ;;  %vm1097_vm7 = vmand %vm1033_vm2, %vm1065_vm5  ;;  %v1128_v15 = vsel %vm1096_vm6, %v1630_v29, 0.0  ;;  %vm1050_vm9 = vcmp.ge.f32.partialorder %v1644_v36, %v1014_v14  ;;  %vm1051_vm10 = vcmp.ge.f32.partialorder %v1648_v38, %v1014_v14  ;;  %v1011_v35 = vpop.xlane.xlu1 %1010 }
 0x487   : > { %v1129_v37 = vsel %vm1097_vm7, %v1634_v31, 0.0  ;;  %1160 = vst [vmem:[%s2049_s3 + $0x10] sm:$0xff] %v1128_v15  ;;  %vm1114_vm12 = vmand %vm1050_vm9, %vm1082_vm8  ;;  %vm1048_vm13 = vcmp.ge.f32.partialorder %v1632_v30, %v1011_v35  ;;  %vm1049_vm14 = vcmp.ge.f32.partialorder %v1636_v32, %v1011_v35  ;;  %vm1071_vm7 = vcmp.gt.f32.partialorder %v1670_v49, 0.0 }
 0x488   : > { %1161 = vst [vmem:[%s2049_s3 + $0x18] sm:$0xff] %v1129_v37  ;;  %vm1115_vm15 = vmand %vm1051_vm10, %vm1083_vm11  ;;  %v1146_v29 = vsel %vm1114_vm12, %v1644_v36, 0.0  ;;  %vm1068_vm12 = vcmp.gt.f32.partialorder %v1654_v41, 0.0 }
 0x489   : > { %v1147_v16 = vsel %vm1115_vm15, %v1648_v38, 0.0  ;;  %1178 = vst [vmem:[%s2049_s3 + $0xa0] sm:$0xff] %v1146_v29  ;;  %vm1112_vm2 = vmand %vm1048_vm13, %vm1080_vm0  ;;  %v996_v31 = vpop.xlane.xlu0 %995  ;;  %vm1069_vm13 = vcmp.gt.f32.partialorder %v1660_v44, 0.0  ;;  %vm1086_vm0 = vcmp.gt.f32.partialorder %v1668_v48, 0.0 }
 0x48a   : > { %1179 = vst [vmem:[%s2049_s3 + $0xa8] sm:$0xff] %v1147_v16  ;;  %vm1113_vm3 = vmand %vm1049_vm14, %vm1081_vm1  ;;  %v1144_v17 = vsel %vm1112_vm2, %v1632_v30, 0.0  ;;  %vm1038_vm5 = vcmp.ge.f32.partialorder %v1666_v47, %v996_v31  ;;  %vm1039_vm6 = vcmp.ge.f32.partialorder %v1670_v49, %v996_v31  ;;  %v993_v36 = vpop.xlane.xlu1 %992 }
 0x48b   : > { %v1145_v38 = vsel %vm1113_vm3, %v1636_v32, 0.0  ;;  %1176 = vst [vmem:[%s2049_s3 + $0x90] sm:$0xff] %v1144_v17  ;;  %vm1102_vm8 = vmand %vm1038_vm5, %vm1070_vm4  ;;  %vm1036_vm9 = vcmp.ge.f32.partialorder %v1654_v41, %v993_v36  ;;  %vm1037_vm10 = vcmp.ge.f32.partialorder %v1660_v44, %v993_v36  ;;  %vm1087_vm3 = vcmp.gt.f32.partialorder %v1672_v50, 0.0 }
 0x48c   : > { %1177 = vst [vmem:[%s2049_s3 + $0x98] sm:$0xff] %v1145_v38  ;;  %vm1103_vm11 = vmand %vm1039_vm6, %vm1071_vm7  ;;  %v1134_v30 = vsel %vm1102_vm8, %v1666_v47, 0.0  ;;  %vm1084_vm8 = vcmp.gt.f32.partialorder %v1656_v42, 0.0 }
 0x48d   : > { %v1135_v18 = vsel %vm1103_vm11, %v1670_v49, 0.0  ;;  %1166 = vst [vmem:[%s2049_s3 + $0x40] sm:$0xff] %v1134_v30  ;;  %vm1100_vm14 = vmand %vm1036_vm9, %vm1068_vm12  ;;  %v1020_v32 = vpop.xlane.xlu0 %1019  ;;  %vm1085_vm9 = vcmp.gt.f32.partialorder %v1662_v45, 0.0  ;;  %vm1074_vm12 = vcmp.gt.f32.partialorder %v1690_v59, 0.0 }
 0x48e   : > { %1167 = vst [vmem:[%s2049_s3 + $0x48] sm:$0xff] %v1135_v18  ;;  %vm1101_vm15 = vmand %vm1037_vm10, %vm1069_vm13  ;;  %v1132_v19 = vsel %vm1100_vm14, %v1654_v41, 0.0  ;;  %vm1054_vm1 = vcmp.ge.f32.partialorder %v1668_v48, %v1020_v32  ;;  %vm1055_vm2 = vcmp.ge.f32.partialorder %v1672_v50, %v1020_v32  ;;  %v1017_v47 = vpop.xlane.xlu1 %1016 }
 0x48f   : > { %v1133_v49 = vsel %vm1101_vm15, %v1660_v44, 0.0  ;;  %1164 = vst [vmem:[%s2049_s3 + $0x30] sm:$0xff] %v1132_v19  ;;  %vm1118_vm4 = vmand %vm1054_vm1, %vm1086_vm0  ;;  %vm1052_vm5 = vcmp.ge.f32.partialorder %v1656_v42, %v1017_v47  ;;  %vm1053_vm6 = vcmp.ge.f32.partialorder %v1662_v45, %v1017_v47  ;;  %vm1075_vm15 = vcmp.gt.f32.partialorder %v1694_v61, 0.0 }
 0x490   : > { %1165 = vst [vmem:[%s2049_s3 + $0x38] sm:$0xff] %v1133_v49  ;;  %vm1119_vm7 = vmand %vm1055_vm2, %vm1087_vm3  ;;  %v1150_v41 = vsel %vm1118_vm4, %v1668_v48, 0.0  ;;  %vm1072_vm4 = vcmp.gt.f32.partialorder %v1678_v53, 0.0 }
 0x491   : > { %v1151_v20 = vsel %vm1119_vm7, %v1672_v50, 0.0  ;;  %1182 = vst [vmem:[%s2049_s3 + $0xc0] sm:$0xff] %v1150_v41  ;;  %vm1116_vm10 = vmand %vm1052_vm5, %vm1084_vm8  ;;  %v1002_v44 = vpop.xlane.xlu0 %1001  ;;  %vm1073_vm5 = vcmp.gt.f32.partialorder %v1684_v56, 0.0  ;;  %vm1090_vm8 = vcmp.gt.f32.partialorder %v1692_v60, 0.0 }
 0x492   : > { %1183 = vst [vmem:[%s2049_s3 + $0xc8] sm:$0xff] %v1151_v20  ;;  %vm1117_vm11 = vmand %vm1053_vm6, %vm1085_vm9  ;;  %v1148_v21 = vsel %vm1116_vm10, %v1656_v42, 0.0  ;;  %vm1042_vm13 = vcmp.ge.f32.partialorder %v1690_v59, %v1002_v44  ;;  %vm1043_vm14 = vcmp.ge.f32.partialorder %v1694_v61, %v1002_v44  ;;  %v999_v48 = vpop.xlane.xlu1 %998 }
 0x493   : > { %v1149_v50 = vsel %vm1117_vm11, %v1662_v45, 0.0  ;;  %1180 = vst [vmem:[%s2049_s3 + $0xb0] sm:$0xff] %v1148_v21  ;;  %vm1106_vm0 = vmand %vm1042_vm13, %vm1074_vm12  ;;  %vm1040_vm1 = vcmp.ge.f32.partialorder %v1678_v53, %v999_v48  ;;  %vm1041_vm2 = vcmp.ge.f32.partialorder %v1684_v56, %v999_v48  ;;  %vm1091_vm11 = vcmp.gt.f32.partialorder %v1696_v62, 0.0 }
 0x494   : > { %1181 = vst [vmem:[%s2049_s3 + $0xb8] sm:$0xff] %v1149_v50  ;;  %vm1107_vm3 = vmand %vm1043_vm14, %vm1075_vm15  ;;  %v1138_v42 = vsel %vm1106_vm0, %v1690_v59, 0.0  ;;  %vm1088_vm0 = vcmp.gt.f32.partialorder %v1680_v54, 0.0 }
 0x495   : > { %v1139_v22 = vsel %vm1107_vm3, %v1694_v61, 0.0  ;;  %1170 = vst [vmem:[%s2049_s3 + $0x60] sm:$0xff] %v1138_v42  ;;  %vm1104_vm6 = vmand %vm1040_vm1, %vm1072_vm4  ;;  %v1026_v45 = vpop.xlane.xlu0 %1025  ;;  %vm1089_vm1 = vcmp.gt.f32.partialorder %v1686_v57, 0.0  ;;  %vm1076_vm4 = vcmp.gt.f32.partialorder %v1702_v1, 0.0 }
 0x496   : > { %1171 = vst [vmem:[%s2049_s3 + $0x68] sm:$0xff] %v1139_v22  ;;  %vm1105_vm7 = vmand %vm1041_vm2, %vm1073_vm5  ;;  %v1136_v23 = vsel %vm1104_vm6, %v1678_v53, 0.0  ;;  %vm1058_vm9 = vcmp.ge.f32.partialorder %v1692_v60, %v1026_v45  ;;  %vm1059_vm10 = vcmp.ge.f32.partialorder %v1696_v62, %v1026_v45  ;;  %v1023_v59 = vpop.xlane.xlu1 %1022 }
 0x497   : > { %v1137_v61 = vsel %vm1105_vm7, %v1684_v56, 0.0  ;;  %1168 = vst [vmem:[%s2049_s3 + $0x50] sm:$0xff] %v1136_v23  ;;  %vm1122_vm12 = vmand %vm1058_vm9, %vm1090_vm8  ;;  %vm1056_vm13 = vcmp.ge.f32.partialorder %v1680_v54, %v1023_v59  ;;  %vm1057_vm14 = vcmp.ge.f32.partialorder %v1686_v57, %v1023_v59  ;;  %vm1077_vm7 = vcmp.gt.f32.partialorder %v1708_v4, 0.0 }
 0x498   : > { %1169 = vst [vmem:[%s2049_s3 + $0x58] sm:$0xff] %v1137_v61  ;;  %vm1123_vm15 = vmand %vm1059_vm10, %vm1091_vm11  ;;  %v1154_v53 = vsel %vm1122_vm12, %v1692_v60, 0.0  ;;  %vm1092_vm10 = vcmp.gt.f32.partialorder %v1704_v2, 0.0 }
 0x499   : > { %v1155_v28 = vsel %vm1123_vm15, %v1696_v62, 0.0  ;;  %1186 = vst [vmem:[%s2049_s3 + $0xe0] sm:$0xff] %v1154_v53  ;;  %vm1120_vm2 = vmand %vm1056_vm13, %vm1088_vm0  ;;  %vm1093_vm13 = vcmp.gt.f32.partialorder %v1712_v6, 0.0 }
 0x49a   : > { %1187 = vst [vmem:[%s2049_s3 + $0xe8] sm:$0xff] %v1155_v28  ;;  %vm1121_vm3 = vmand %vm1057_vm14, %vm1089_vm1  ;;  %v1152_v56 = vsel %vm1120_vm2, %v1680_v54, 0.0  ;;  %v1005_v33 = vpop.xlane.xlu1 %1004 }
 0x49b   : > { %v1153_v34 = vsel %vm1121_vm3, %v1686_v57, 0.0  ;;  %1184 = vst [vmem:[%s2049_s3 + $0xd0] sm:$0xff] %v1152_v56  ;;  %vm1044_vm5 = vcmp.ge.f32.partialorder %v1702_v1, %v1005_v33  ;;  %vm1045_vm6 = vcmp.ge.f32.partialorder %v1708_v4, %v1005_v33 }
 0x49c   : > { %1185 = vst [vmem:[%s2049_s3 + $0xd8] sm:$0xff] %v1153_v34  ;;  %vm1108_vm8 = vmand %vm1044_vm5, %vm1076_vm4 }
 0x49d   : > { %vm1109_vm9 = vmand %vm1045_vm6, %vm1077_vm7  ;;  %v1140_v60 = vsel %vm1108_vm8, %v1702_v1, 0.0 }
 0x49e   : > { %v1141_v54 = vsel %vm1109_vm9, %v1708_v4, 0.0  ;;  %1172 = vst [vmem:[%s2049_s3 + $0x70] sm:$0xff] %v1140_v60  ;;  %v1029_v57 = vpop.xlane.xlu1 %1028 }
 0x49f   : > { %1173 = vst [vmem:[%s2049_s3 + $0x78] sm:$0xff] %v1141_v54  ;;  %vm1060_vm11 = vcmp.ge.f32.partialorder %v1704_v2, %v1029_v57  ;;  %vm1061_vm12 = vcmp.ge.f32.partialorder %v1712_v6, %v1029_v57 }
 0x4a0   : > { %vm1124_vm14 = vmand %vm1060_vm11, %vm1092_vm10 }
 0x4a1   : > { %vm1125_vm15 = vmand %vm1061_vm12, %vm1093_vm13  ;;  %v1156_v62 = vsel %vm1124_vm14, %v1704_v2, 0.0 }
 0x4a2   : > { %v1157_v1 = vsel %vm1125_vm15, %v1712_v6, 0.0  ;;  %1188 = vst [vmem:[%s2049_s3 + $0xf0] sm:$0xff] %v1156_v62 }
 0x4a3   : > { %1189 = vst [vmem:[%s2049_s3 + $0xf8] sm:$0xff] %v1157_v1 }
 0x4a4   : > { %1474 = shalt.err (!%p1471_p13)
}
 0x4a5   : > { %s1475_s22 = scalar_lea.hbm %s2174_s13, 4096  ;;  %s1479_s25 = scalar_lea.hbm %s2225_s1, 8192 }
 0x4a6   : > { %p1476_p0 = scmp.ne.s32.totalorder %s2174_s13, %s1475_s22  ;;  %p1480_p3 = scmp.lt.s32.totalorder %s2174_s13, %s2225_s1 }
 0x4a7   : > { %p1481_p4 = scmp.lt.s32.totalorder %s1479_s25, %s1475_s22 }
 0x4a8   : > { %p1477_p1 = pnand %p1476_p0, %p1581_p5 }
 0x4a9   : > { %p1482_p7 = por %p1481_p4, %p1480_p3 }
 0x4aa   : > { %p1478_p2 = pneg %p1477_p1 }
 0x4ac   : > { %p1483_p6 = pnand %p1482_p7, %p1478_p2 }
 0x4ae   : > { %1486 = shalt.err (!%p1483_p6)
}
 0x4af   : > { %s1531_s28 = smov 256   ;;  %s1532_s29 = smov 16  }
 0x4b0   : > { %1361 = dma.vmem_to_hbm [thread:$0]  (%p1581_p5), %s2176_s5, 4096, %s2174_s13, %s2184_s14, %s1531_s28, %s1531_s28, %s1532_s29  }
 0x4b1 PF: > { %p1373_p8 = scmp.ge.s32.totalorder %s1525_s9, 2  ;;  %s1220_s30 = sand.u32 1, %s1513_s6  }
 0x4b2   : > { %p2229_p9 = scmp.ne.s32.totalorder %s2227_s17, 0  ;;  %s1221_s2 = scalar_lea.sflag [#allocation4], %s1220_s30 }
 0x4b4   : > { %p1368_p10 = pnand %p1373_p8, %p2229_p9 }
 0x4b6   : > { %p1369_p11 = pneg %p1368_p10 }
 0x4b8   : > { %1508 = dma.done.wait (%p1369_p11), %s1221_s2, 4096  }
 0x4b9   : > { %1510 = vsyncadd (%p1369_p11), %s1221_s2, 4294963200  ;;  %p12_p12 = scmp.ge.s32.totalorder %s1568_s12, 4   ;;  %s2230_s6 = smov %s1517_s7 }
 0x4ba   : > { %s2231_s7 = smov %s1521_s8  ;;  %s2232_s8 = smov %s1579_s15 }
 0x4bb   : > { %s2233_s9 = smov %s1568_s12  ;;  %14 = sbr.rel (!%p12_p12) target bundleno = 4 (0x4), region = 62 }
 0x4c0   :  { %1226 = vsyncpa [#allocation3], 1 }
 0x4c1   :  { %1228 = vsyncpa [#allocation3 + $0x1], 1 }
 0x4c2   :  { %1229 = vsyncpa [#allocation4], 1 }
 0x4c3   :  { %1231 = vsyncpa [#allocation4 + $0x1], 1 }

</bundles_post_ra>
